<compile_context>
chip_gen: v7x
topology: tpu7x:2x2x1
jax: 0.10.0
libtpu: 0.0.40
codegen_flags: <defaults>
</compile_context>

<pallas_src>
import jax
import jax.numpy as jnp
from jax.experimental import pallas as pl
from jax.experimental.pallas import tpu as pltpu


def _normalizer_kernel(x_ref, mean_ref, inv_std_ref, o_ref):
    # x_ref / o_ref: (b_tile, F, t_tile); mean_ref / inv_std_ref: (1, F, 1) f32.
    x = x_ref[...].astype(jnp.float32)
    o_ref[...] = ((x - mean_ref[...]) * inv_std_ref[...]).astype(o_ref.dtype)


def _choose_tiles(B, F, T, itemsize, max_tile_bytes):
    """Pick (b_tile, t_tile) from the byte budget; keep >= 2 grid steps if possible."""
    # Largest lane-dense (multiple of 128) time tile under the budget, capped at T.
    max_lanes = max(128, (max_tile_bytes // (F * itemsize)) // 128 * 128)
    t_full = (T // 128) * 128          # largest 128-multiple <= T  (T >= 128 here)
    t_tile = min(max_lanes, t_full)
    n_t = pl.cdiv(T, t_tile)

    # If the time axis is a single tile and still underfills the budget, pack
    # multiple batch items per step to amortize the ~0.35 us per-step overhead.
    b_tile = 1
    if n_t == 1:
        b_tile = max(1, min(B, max_tile_bytes // (F * t_tile * itemsize)))
    n_b = pl.cdiv(B, b_tile)

    # Megacore (v7x): keep at least 2 parallel grid steps when there is enough work.
    if n_b * n_t < 2:
        if B >= 2:
            b_tile = pl.cdiv(B, 2)
            n_b = pl.cdiv(B, b_tile)
        elif t_tile >= 256:
            t_tile = pl.cdiv(pl.cdiv(t_tile, 2), 128) * 128
            n_t = pl.cdiv(T, t_tile)

    return b_tile, t_tile, n_b, n_t


def static_normalizer(x, mean, std, *, max_tile_bytes=4 << 20,
                      jnp_fallback_bytes=1 << 20):
    """y = (x - mean) / std with mean/std of shape (F, 1), x of shape (B, F, T)."""
    B, F, T = x.shape
    assert mean.shape == (F, 1) and std.shape == (F, 1)
    itemsize = jnp.dtype(x.dtype).itemsize
    total_bytes = B * F * T * itemsize

    # Tiny shapes / sub-128 lane outputs: XLA's fused elementwise beats a
    # standalone pallas_call (masked vst + launch overhead). Exact PyTorch math.
    if T < 128 or total_bytes < jnp_fallback_bytes:
        return ((x - mean[None]) / std[None]).astype(x.dtype)

    # Broadcast operands kept in f32 (tiny); reciprocal hoisted out of the kernel.
    mean32 = mean.reshape(1, F, 1).astype(jnp.float32)
    inv_std32 = (1.0 / std.astype(jnp.float32)).reshape(1, F, 1)

    b_tile, t_tile, n_b, n_t = _choose_tiles(B, F, T, itemsize, max_tile_bytes)

    return pl.pallas_call(
        _normalizer_kernel,
        out_shape=jax.ShapeDtypeStruct((B, F, T), x.dtype),
        grid_spec=pltpu.PrefetchScalarGridSpec(
            num_scalar_prefetch=0,
            grid=(n_b, n_t),
            in_specs=[
                pl.BlockSpec((b_tile, F, t_tile), lambda b, t: (b, 0, t)),
                pl.BlockSpec((1, F, 1), lambda b, t: (0, 0, 0)),
                pl.BlockSpec((1, F, 1), lambda b, t: (0, 0, 0)),
            ],
            out_specs=pl.BlockSpec((b_tile, F, t_tile), lambda b, t: (b, 0, t)),
        ),
        compiler_params=pltpu.CompilerParams(
            dimension_semantics=("parallel", "parallel"),
            vmem_limit_bytes=40 << 20,
        ),
        cost_estimate=pl.CostEstimate(
            flops=2 * B * F * T,
            transcendentals=0,
            bytes_accessed=2 * total_bytes + 2 * F * 4,
        ),
    )(x, mean32, inv_std32)


if __name__ == "__main__":
    key = jax.random.PRNGKey(0)
    kx, km, ks, kx2, kx3 = jax.random.split(key, 5)

    # --- 1) Module demo shape (batch=2, input_size=32, seq=8): jnp fallback path.
    B, F, T = 2, 32, 8
    x = jax.random.normal(kx, (B, F, T), dtype=jnp.float32)
    mean = jax.random.normal(km, (F, 1), dtype=jnp.float32)
    std = jnp.abs(jax.random.normal(ks, (F, 1), dtype=jnp.float32)) + 0.5

    y = jax.block_until_ready(static_normalizer(x, mean, std))
    y_ref = (x - mean[None]) / std[None]
    assert y.shape == x.shape and y.dtype == x.dtype
    assert jnp.allclose(y, y_ref, rtol=1e-5, atol=1e-6)

    # --- 2) Pallas path: partial time tile (T=1200 not a 128-multiple), f32.
    B2, F2, T2 = 2, 128, 1200
    mean2 = jax.random.normal(km, (F2, 1), dtype=jnp.float32)
    std2 = jnp.abs(jax.random.normal(ks, (F2, 1), dtype=jnp.float32)) + 0.5
    x2 = jax.random.normal(kx2, (B2, F2, T2), dtype=jnp.float32)

    y2 = jax.block_until_ready(static_normalizer(x2, mean2, std2))
    y2_ref = (x2 - mean2[None]) / std2[None]
    assert jnp.allclose(y2, y2_ref, rtol=1e-5, atol=1e-6)

    # --- 3) Pallas path: bf16 input (f32 math in-kernel, single rounding on output).
    B3, F3, T3 = 2, 128, 2560
    x3 = jax.random.normal(kx3, (B3, F3, T3), dtype=jnp.float32).astype(jnp.bfloat16)

    y3 = jax.block_until_ready(static_normalizer(x3, mean2, std2))
    y3_ref = ((x3.astype(jnp.float32) - mean2[None]) / std2[None]).astype(jnp.bfloat16)
    assert y3.dtype == jnp.bfloat16
    assert jnp.allclose(y3.astype(jnp.float32), y3_ref.astype(jnp.float32),
                        rtol=2e-2, atol=2e-2)

    print("KERNEL_OK")
</pallas_src>

<mosaic_0001>
module attributes {stable_mosaic.version = 11 : i64} {
  func.func @_normalizer_kernel(%arg0: i32, %arg1: i32, %arg2: memref<1x128x1152xf32, #tpu.memory_space<vmem>>, %arg3: memref<1x128x1xf32, #tpu.memory_space<vmem>>, %arg4: memref<1x128x1xf32, #tpu.memory_space<vmem>>, %arg5: memref<1x128x1152xf32, #tpu.memory_space<vmem>>) attributes {dimension_semantics = [#tpu.dimension_semantics<parallel>, #tpu.dimension_semantics<parallel>], iteration_bounds = array<i64: 2, 2>, scalar_prefetch = 0 : i64, scratch_operands = 0 : i64, tpu.core_type = #tpu.core_type<tc>, window_params = [{transform_indices = @transform_0, window_bounds = array<i64: 1, 128, 1152>}, {pipeline_mode = #tpu.pipeline_mode<synchronous>, transform_indices = @transform_1, window_bounds = array<i64: 1, 128, 1>}, {pipeline_mode = #tpu.pipeline_mode<synchronous>, transform_indices = @transform_2, window_bounds = array<i64: 1, 128, 1>}, {transform_indices = @transform_3, window_bounds = array<i64: 1, 128, 1152>}]} {
    %c0 = arith.constant 0 : index
    %c0_0 = arith.constant 0 : index
    %c0_1 = arith.constant 0 : index
    %0 = vector.load %arg2[%c0, %c0_0, %c0_1] : memref<1x128x1152xf32, #tpu.memory_space<vmem>>, vector<1x128x1152xf32>
    %c0_2 = arith.constant 0 : index
    %c0_3 = arith.constant 0 : index
    %c0_4 = arith.constant 0 : index
    %1 = vector.load %arg3[%c0_2, %c0_3, %c0_4] : memref<1x128x1xf32, #tpu.memory_space<vmem>>, vector<1x128x1xf32>
    %2 = vector.broadcast %1 : vector<1x128x1xf32> to vector<1x128x1152xf32>
    %3 = arith.subf %0, %2 : vector<1x128x1152xf32>
    %c0_5 = arith.constant 0 : index
    %c0_6 = arith.constant 0 : index
    %c0_7 = arith.constant 0 : index
    %4 = vector.load %arg4[%c0_5, %c0_6, %c0_7] : memref<1x128x1xf32, #tpu.memory_space<vmem>>, vector<1x128x1xf32>
    %5 = vector.broadcast %4 : vector<1x128x1xf32> to vector<1x128x1152xf32>
    %6 = arith.mulf %3, %5 : vector<1x128x1152xf32>
    %c0_8 = arith.constant 0 : index
    %c0_9 = arith.constant 0 : index
    %c0_10 = arith.constant 0 : index
    %7 = vector.load %arg5[%c0_8, %c0_9, %c0_10] : memref<1x128x1152xf32, #tpu.memory_space<vmem>>, vector<1x128x1152xf32>
    tpu.vector_store %arg5[%c0_8, %c0_9, %c0_10], %6 {strides = array<i32>} : memref<1x128x1152xf32, #tpu.memory_space<vmem>>, vector<1x128x1152xf32>,
    return
  }
  func.func @transform_0(%arg0: i32, %arg1: i32) -> (i32, i32, i32) {
    %c0_i32 = arith.constant 0 : i32
    %c0_i32_0 = arith.constant 0 : i32
    return %arg0, %c0_i32, %arg1 : i32, i32, i32
  }
  func.func @transform_1(%arg0: i32, %arg1: i32) -> (i32, i32, i32) {
    %c0_i32 = arith.constant 0 : i32
    %c0_i32_0 = arith.constant 0 : i32
    %c0_i32_1 = arith.constant 0 : i32
    %c0_i32_2 = arith.constant 0 : i32
    return %c0_i32, %c0_i32_0, %c0_i32_1 : i32, i32, i32
  }
  func.func @transform_2(%arg0: i32, %arg1: i32) -> (i32, i32, i32) {
    %c0_i32 = arith.constant 0 : i32
    %c0_i32_0 = arith.constant 0 : i32
    %c0_i32_1 = arith.constant 0 : i32
    %c0_i32_2 = arith.constant 0 : i32
    return %c0_i32, %c0_i32_0, %c0_i32_1 : i32, i32, i32
  }
  func.func @transform_3(%arg0: i32, %arg1: i32) -> (i32, i32, i32) {
    %c0_i32 = arith.constant 0 : i32
    %c0_i32_0 = arith.constant 0 : i32
    return %arg0, %c0_i32, %arg1 : i32, i32, i32
  }
}

</mosaic_0001>

<bundles_post_ra>
// kernel: tpu_custom_call.1
= control target key start
LH: loop header
LB: loop body
LE: loop exit
PB: predicated region body
PF: predicated region fallthrough
CT: control target
= control target key end

     0   :  { %s5751_s0 = inlined_call_operand.vmem [shape: f32[2,128,1200], index: 0, kind: input, shape index: {}]   ;;  %s5752_s1 = inlined_call_operand.vmem [shape: f32[1,128,1], index: 1, kind: input, shape index: {}]   ;;  %s5753_s2 = inlined_call_operand.vmem [shape: f32[1,128,1], index: 2, kind: input, shape index: {}]   ;;  %s5754_s3 = inlined_call_operand.vmem [shape: f32[2,128,1200], index: 3, kind: output, shape index: {}]  }
   0x1   :  { %5853 = sst [smem:[#allocation98_spill]] %s5751_s0 }
   0x2   :  { %s2991_s12 = smov 0   ;;  %s2993_s13 = smov 0  }
   0x3   :  { %s2995_s14 = smov 0   ;;  %s2997_s15 = smov 0  }
   0x4   :  { %s2999_s16 = smov 0   ;;  %s3001_s17 = smov 0  }
   0x5   :  { %s3003_s18 = smov 0  }
   0x6 LB: > { %s22_s19 = sadd.s32 1, %s2828_s16  ;;  %s25_s20 = sadd.s32 1, %s2832_s17  ;;  %s2836_s18 = sphi %s3003_s18, %s13_s18   ;;  %s2832_s17 = sphi %s3001_s17, %s6209_s17   ;;  %s2828_s16 = sphi %s2999_s16, %s6208_s16   ;;  %s2824_s15 = sphi %s2997_s15, %s6207_s15   ;;  %s2820_s14 = sphi %s2995_s14, %s6206_s14   ;;  %s2816_s13 = sphi %s2993_s13, %s6205_s13   ;;  %s2812_s12 = sphi %s2991_s12, %s6204_s12  }
   0x7   : > { %p23_p0 = scmp.ge.s32.totalorder %s22_s19, 2  ;;  %s2266_s21 = sadd.s32 4294967295, %s2836_s18  }
   0x8   : > { %p41_p1 = scmp.ne.s32.totalorder %s2816_s13, %s2812_s12  ;;  %p42_p2 = scmp.eq.s32.totalorder %s2836_s18, 0 }
   0x9   : > { %s6211_s19 = smov (%p23_p0, %s22_s19), 0  ;;  %s6213_s20 = smov (!%p23_p0, %s25_s20), %s2832_s17 }
   0xa   : > { %5854 = sst [smem:[#allocation4_spill]] %s6211_s19  ;;  %p27_p3 = scmp.ge.s32.totalorder %s6213_s20, 2 }
   0xb   : > { %p115_p4 = scmp.eq.s32.totalorder %s2266_s21, 3  ;;  %s30_s22 = ssub.s32 %s2828_s16, %s6211_s19 }
   0xc   : > { %p43_p5 = por %p42_p2, %p41_p1  ;;  %s6215_s20 = smov (%p27_p3, %s6213_s20), 0 }
   0xd   : > { %5855 = sst [smem:[#allocation5_spill]] %s6215_s20  ;;  %p3039_p6 = por %p115_p4, %p41_p1 }
   0xe   : > { %s29_s24 = ssub.s32 %s2832_s17, %s6215_s20  ;;  %s34_s26 = sadd.s32 1, %s2816_s13 }
   0xf   : > { %s31_s25 = sor.u32 %s30_s22, %s29_s24  ;;  %p2269_p8 = scmp.ge.s32.totalorder %s2836_s18, 4 }
  0x10   : > { %p32_p7 = scmp.eq.s32.totalorder %s31_s25, 0 }
  0x11   : > { %143 = sbr.rel (%p2269_p8) target bundleno = 220 (0xdc), region = 24 }
  0x12   : > { %s3047_s27 = scalar_select %p32_p7, %s2816_s13, %s34_s26  }
  0x18   : > { %146 = sbr.rel (!%p43_p5) target bundleno = 220 (0xdc), region = 28  ;;  %s148_s28 = sand.u32 (%p43_p5), 1, %s2816_s13  }
  0x19   : > { %s151_s29 = smul.u32 (%p43_p5), 9, %s2828_s16  ;;  %s5857_s0 = sld [smem:[#allocation98_spill]] (%p43_p5) }
  0x1a   : > { %s2331_s30 = smul.u32 (%p43_p5), 1152, %s148_s28 }
  0x1b   : > { %s152_s4 = ssub.s32 (%p43_p5), 10, %s151_s29  ;;  %s2332_s5 = smul.u32 (%p43_p5), 160, %s2832_s17 }
  0x1c   : > { %p153_p9 = scmp.lt.s32.totalorder (%p43_p5), %s152_s4, 9  ;;  %s3060_s22 = scalar_lea.vmem (%p43_p5), [#allocation2], %s2331_s30  }
  0x1d   : > { %s158_s6 = sadd.s32 (%p43_p5), %s2332_s5, %s151_s29 }
  0x1e   : > { %s2272_s7 = sshll.u32 (%p43_p5), %s158_s6, 3 }
  0x1f   : > { %s6217_s4 = smov (!%p153_p9, %s152_s4), 9  ;;  %s3056_s11 = scalar_lea.vmem %s5857_s0, %s2272_s7  }
  0x20   : > { %s2270_s8 = sshll.u32 %s6217_s4, 11  ;;  %s3058_s21 = sshll.u32 %s6217_s4, 3 }
  0x21   : > { %p2274_p10 = scmp.eq.s32.totalorder %s2270_s8, 0 }
  0x22   : > { %p165_p11 = scmp.lt.u32.totalorder (!%p2274_p10), %s3058_s21, 8 }
  0x23   : > { %164 = sbr.rel (%p2274_p10) target bundleno = 220 (0xdc), region = 32 }
  0x2a   : > { %168 = sbr.rel (%p165_p11) target bundleno = 201 (0xc9), region = 36  ;;  %s3064_s24 = sand.u32 (!%p165_p11), 7, %s3058_s21  }
  0x2b   : > { %p214_p12 = scmp.eq.s32.totalorder (!%p165_p11), %s3064_s24, 0  ;;  %p2275_p13 = scmp.ne.s32.totalorder (!%p165_p11), %s3064_s24, 0 }
  0x31   : > { %217 = sbr.rel (%p2275_p13) target bundleno = 116 (0x74), region = 51  ;;  %s218_s25 = sshrl.u32 (!%p2275_p13), %s3058_s21, 3 }
  0x32   : > { %s3071_s26 = sshrl.u32 (!%p2275_p13), %s218_s25, 2 }
  0x33   : > { %p2276_p0 = scmp.le.s32.totalorder (!%p2275_p13), %s3071_s26, 0 }
  0x38   : > { %2127 = sbr.rel (%p2276_p0) target bundleno = 96 (0x60), region = 229  ;;  %s5858_s28 = smov (!%p2276_p0), %s3060_s22 }
  0x39   : > { %s5859_s29 = smov (!%p2276_p0), %s3056_s11  ;;  %s3080_s30 = smov (!%p2276_p0), 0  }
  0x3a   : > { %s3082_s4 = smov (!%p2276_p0), 0  }
  0x3f LB: >> { %v231_v0 = vld [vmem:[%s2844_s29] sm:$0xff]  ;;  %v233_v1 = vld [vmem:[%s2844_s29 + $0x8] sm:$0xff]  ;;  %v235_v2 = vld [vmem:[%s2844_s29 + $0x10] sm:$0xff]  ;;  %s359_s5 = sadd.s32 1, %s2848_s30  ;;  %s225_s4 = sadd.s32 1, %s2852_s4   ;;  %s2852_s4 = sphi %s3082_s4, %s225_s4   ;;  %s2848_s30 = sphi %s3080_s30, %s5862_s30   ;;  %s2844_s29 = sphi %s5859_s29, %s5861_s29   ;;  %s2840_s28 = sphi %s5858_s28, %s5860_s28  }
  0x40   : >> { %232 = vst [vmem:[%s2840_s28] sm:$0xff] %v231_v0  ;;  %234 = vst [vmem:[%s2840_s28 + $0x8] sm:$0xff] %v233_v1  ;;  %v237_v3 = vld [vmem:[%s2844_s29 + $0x18] sm:$0xff]  ;;  %v239_v4 = vld [vmem:[%s2844_s29 + $0x50] sm:$0xff]  ;;  %p360_p1 = scmp.ge.s32.totalorder %s359_s5, %s3071_s26  ;;  %p224_p2 = scmp.ge.s32.totalorder %s225_s4, %s3071_s26 }
  0x41   : >> { %236 = vst [vmem:[%s2840_s28 + $0x10] sm:$0xff] %v235_v2  ;;  %v241_v5 = vld [vmem:[%s2844_s29 + $0x58] sm:$0xff]  ;;  %238 = vst [vmem:[%s2840_s28 + $0x18] sm:$0xff] %v237_v3  ;;  %v243_v6 = vld [vmem:[%s2844_s29 + $0x60] sm:$0xff] }
  0x42   : >> { %240 = vst [vmem:[%s2840_s28 + $0x48] sm:$0xff] %v239_v4  ;;  %242 = vst [vmem:[%s2840_s28 + $0x50] sm:$0xff] %v241_v5  ;;  %v245_v7 = vld [vmem:[%s2844_s29 + $0x68] sm:$0xff]  ;;  %v247_v8 = vld [vmem:[%s2844_s29 + $0xa0] sm:$0xff]  ;;  %s6219_s5 = smov (%p360_p1, %s359_s5), 0 }
  0x43   : >> { %244 = vst [vmem:[%s2840_s28 + $0x58] sm:$0xff] %v243_v6  ;;  %246 = vst [vmem:[%s2840_s28 + $0x60] sm:$0xff] %v245_v7  ;;  %v249_v9 = vld [vmem:[%s2844_s29 + $0xa8] sm:$0xff]  ;;  %v251_v10 = vld [vmem:[%s2844_s29 + $0xb0] sm:$0xff]  ;;  %s2277_s6 = sshll.u32 %s6219_s5, 5  ;;  %s5862_s30 = smov %s6219_s5 }
  0x44   : >> { %248 = vst [vmem:[%s2840_s28 + $0x90] sm:$0xff] %v247_v8  ;;  %v253_v11 = vld [vmem:[%s2844_s29 + $0xb8] sm:$0xff]  ;;  %250 = vst [vmem:[%s2840_s28 + $0x98] sm:$0xff] %v249_v9  ;;  %v255_v12 = vld [vmem:[%s2844_s29 + $0xf0] sm:$0xff]  ;;  %s3138_s7 = scalar_lea.vmem %s3056_s11, %s2277_s6   ;;  %s3141_s8 = scalar_lea.vmem %s3060_s22, %s2277_s6 [#allocation2]  }
  0x45   : >> { %252 = vst [vmem:[%s2840_s28 + $0xa0] sm:$0xff] %v251_v10  ;;  %254 = vst [vmem:[%s2840_s28 + $0xa8] sm:$0xff] %v253_v11  ;;  %v257_v13 = vld [vmem:[%s2844_s29 + $0xf8] sm:$0xff]  ;;  %v259_v14 = vld [vmem:[%s2844_s29 + $0x100] sm:$0xff] }
  0x46   : >> { %256 = vst [vmem:[%s2840_s28 + $0xd8] sm:$0xff] %v255_v12  ;;  %258 = vst [vmem:[%s2840_s28 + $0xe0] sm:$0xff] %v257_v13  ;;  %v261_v15 = vld [vmem:[%s2844_s29 + $0x108] sm:$0xff]  ;;  %v263_v16 = vld [vmem:[%s2844_s29 + $0x140] sm:$0xff] }
  0x47   : >> { %260 = vst [vmem:[%s2840_s28 + $0xe8] sm:$0xff] %v259_v14  ;;  %v265_v17 = vld [vmem:[%s2844_s29 + $0x148] sm:$0xff]  ;;  %262 = vst [vmem:[%s2840_s28 + $0xf0] sm:$0xff] %v261_v15  ;;  %v267_v18 = vld [vmem:[%s2844_s29 + $0x150] sm:$0xff] }
  0x48   : >> { %264 = vst [vmem:[%s2840_s28 + $0x120] sm:$0xff] %v263_v16  ;;  %266 = vst [vmem:[%s2840_s28 + $0x128] sm:$0xff] %v265_v17  ;;  %v269_v19 = vld [vmem:[%s2844_s29 + $0x158] sm:$0xff]  ;;  %v271_v20 = vld [vmem:[%s2844_s29 + $0x190] sm:$0xff] }
  0x49   : >> { %268 = vst [vmem:[%s2840_s28 + $0x130] sm:$0xff] %v267_v18  ;;  %270 = vst [vmem:[%s2840_s28 + $0x138] sm:$0xff] %v269_v19  ;;  %v273_v21 = vld [vmem:[%s2844_s29 + $0x198] sm:$0xff]  ;;  %v275_v22 = vld [vmem:[%s2844_s29 + $0x1a0] sm:$0xff] }
  0x4a   : >> { %272 = vst [vmem:[%s2840_s28 + $0x168] sm:$0xff] %v271_v20  ;;  %v277_v23 = vld [vmem:[%s2844_s29 + $0x1a8] sm:$0xff]  ;;  %274 = vst [vmem:[%s2840_s28 + $0x170] sm:$0xff] %v273_v21  ;;  %v279_v24 = vld [vmem:[%s2844_s29 + $0x1e0] sm:$0xff] }
  0x4b   : >> { %276 = vst [vmem:[%s2840_s28 + $0x178] sm:$0xff] %v275_v22  ;;  %278 = vst [vmem:[%s2840_s28 + $0x180] sm:$0xff] %v277_v23  ;;  %v281_v25 = vld [vmem:[%s2844_s29 + $0x1e8] sm:$0xff]  ;;  %v283_v26 = vld [vmem:[%s2844_s29 + $0x1f0] sm:$0xff] }
  0x4c   : >> { %280 = vst [vmem:[%s2840_s28 + $0x1b0] sm:$0xff] %v279_v24  ;;  %282 = vst [vmem:[%s2840_s28 + $0x1b8] sm:$0xff] %v281_v25  ;;  %v285_v27 = vld [vmem:[%s2844_s29 + $0x1f8] sm:$0xff]  ;;  %v287_v28 = vld [vmem:[%s2844_s29 + $0x230] sm:$0xff] }
  0x4d   : >> { %284 = vst [vmem:[%s2840_s28 + $0x1c0] sm:$0xff] %v283_v26  ;;  %v289_v29 = vld [vmem:[%s2844_s29 + $0x238] sm:$0xff]  ;;  %286 = vst [vmem:[%s2840_s28 + $0x1c8] sm:$0xff] %v285_v27  ;;  %v291_v30 = vld [vmem:[%s2844_s29 + $0x240] sm:$0xff] }
  0x4e   : >> { %288 = vst [vmem:[%s2840_s28 + $0x1f8] sm:$0xff] %v287_v28  ;;  %290 = vst [vmem:[%s2840_s28 + $0x200] sm:$0xff] %v289_v29  ;;  %v293_v31 = vld [vmem:[%s2844_s29 + $0x248] sm:$0xff]  ;;  %v295_v32 = vld [vmem:[%s2844_s29 + $0x280] sm:$0xff] }
  0x4f   : >> { %292 = vst [vmem:[%s2840_s28 + $0x208] sm:$0xff] %v291_v30  ;;  %294 = vst [vmem:[%s2840_s28 + $0x210] sm:$0xff] %v293_v31  ;;  %v297_v33 = vld [vmem:[%s2844_s29 + $0x288] sm:$0xff]  ;;  %v299_v34 = vld [vmem:[%s2844_s29 + $0x290] sm:$0xff] }
  0x50   : >> { %296 = vst [vmem:[%s2840_s28 + $0x240] sm:$0xff] %v295_v32  ;;  %v301_v35 = vld [vmem:[%s2844_s29 + $0x298] sm:$0xff]  ;;  %298 = vst [vmem:[%s2840_s28 + $0x248] sm:$0xff] %v297_v33  ;;  %v303_v36 = vld [vmem:[%s2844_s29 + $0x2d0] sm:$0xff] }
  0x51   : >> { %300 = vst [vmem:[%s2840_s28 + $0x250] sm:$0xff] %v299_v34  ;;  %302 = vst [vmem:[%s2840_s28 + $0x258] sm:$0xff] %v301_v35  ;;  %v305_v37 = vld [vmem:[%s2844_s29 + $0x2d8] sm:$0xff]  ;;  %v307_v38 = vld [vmem:[%s2844_s29 + $0x2e0] sm:$0xff] }
  0x52   : >> { %304 = vst [vmem:[%s2840_s28 + $0x288] sm:$0xff] %v303_v36  ;;  %306 = vst [vmem:[%s2840_s28 + $0x290] sm:$0xff] %v305_v37  ;;  %v309_v39 = vld [vmem:[%s2844_s29 + $0x2e8] sm:$0xff]  ;;  %v311_v40 = vld [vmem:[%s2844_s29 + $0x320] sm:$0xff] }
  0x53   : >> { %308 = vst [vmem:[%s2840_s28 + $0x298] sm:$0xff] %v307_v38  ;;  %v313_v41 = vld [vmem:[%s2844_s29 + $0x328] sm:$0xff]  ;;  %310 = vst [vmem:[%s2840_s28 + $0x2a0] sm:$0xff] %v309_v39  ;;  %v315_v42 = vld [vmem:[%s2844_s29 + $0x330] sm:$0xff] }
  0x54   : >> { %312 = vst [vmem:[%s2840_s28 + $0x2d0] sm:$0xff] %v311_v40  ;;  %314 = vst [vmem:[%s2840_s28 + $0x2d8] sm:$0xff] %v313_v41  ;;  %v317_v43 = vld [vmem:[%s2844_s29 + $0x338] sm:$0xff]  ;;  %v319_v44 = vld [vmem:[%s2844_s29 + $0x370] sm:$0xff] }
  0x55   : >> { %316 = vst [vmem:[%s2840_s28 + $0x2e0] sm:$0xff] %v315_v42  ;;  %318 = vst [vmem:[%s2840_s28 + $0x2e8] sm:$0xff] %v317_v43  ;;  %v321_v45 = vld [vmem:[%s2844_s29 + $0x378] sm:$0xff]  ;;  %v323_v46 = vld [vmem:[%s2844_s29 + $0x380] sm:$0xff] }
  0x56   : >> { %320 = vst [vmem:[%s2840_s28 + $0x318] sm:$0xff] %v319_v44  ;;  %v325_v47 = vld [vmem:[%s2844_s29 + $0x388] sm:$0xff]  ;;  %322 = vst [vmem:[%s2840_s28 + $0x320] sm:$0xff] %v321_v45  ;;  %v327_v48 = vld [vmem:[%s2844_s29 + $0x3c0] sm:$0xff] }
  0x57   : >> { %324 = vst [vmem:[%s2840_s28 + $0x328] sm:$0xff] %v323_v46  ;;  %326 = vst [vmem:[%s2840_s28 + $0x330] sm:$0xff] %v325_v47  ;;  %v329_v49 = vld [vmem:[%s2844_s29 + $0x3c8] sm:$0xff]  ;;  %v331_v50 = vld [vmem:[%s2844_s29 + $0x3d0] sm:$0xff] }
  0x58   : >> { %328 = vst [vmem:[%s2840_s28 + $0x360] sm:$0xff] %v327_v48  ;;  %330 = vst [vmem:[%s2840_s28 + $0x368] sm:$0xff] %v329_v49  ;;  %v333_v51 = vld [vmem:[%s2844_s29 + $0x3d8] sm:$0xff]  ;;  %v335_v52 = vld [vmem:[%s2844_s29 + $0x410] sm:$0xff] }
  0x59   : >> { %332 = vst [vmem:[%s2840_s28 + $0x370] sm:$0xff] %v331_v50  ;;  %v337_v53 = vld [vmem:[%s2844_s29 + $0x418] sm:$0xff]  ;;  %334 = vst [vmem:[%s2840_s28 + $0x378] sm:$0xff] %v333_v51  ;;  %v339_v54 = vld [vmem:[%s2844_s29 + $0x420] sm:$0xff]  ;;  %227 = sbr.rel (!%p224_p2) target bundleno = 63 (0x3f), region = 235 }
  0x5a   : >> { %336 = vst [vmem:[%s2840_s28 + $0x3a8] sm:$0xff] %v335_v52  ;;  %338 = vst [vmem:[%s2840_s28 + $0x3b0] sm:$0xff] %v337_v53  ;;  %v341_v55 = vld [vmem:[%s2844_s29 + $0x428] sm:$0xff]  ;;  %v343_v56 = vld [vmem:[%s2844_s29 + $0x460] sm:$0xff] }
  0x5b   : >> { %340 = vst [vmem:[%s2840_s28 + $0x3b8] sm:$0xff] %v339_v54  ;;  %342 = vst [vmem:[%s2840_s28 + $0x3c0] sm:$0xff] %v341_v55  ;;  %v345_v57 = vld [vmem:[%s2844_s29 + $0x468] sm:$0xff]  ;;  %v347_v58 = vld [vmem:[%s2844_s29 + $0x470] sm:$0xff] }
  0x5c   : >> { %344 = vst [vmem:[%s2840_s28 + $0x3f0] sm:$0xff] %v343_v56  ;;  %v349_v59 = vld [vmem:[%s2844_s29 + $0x478] sm:$0xff]  ;;  %346 = vst [vmem:[%s2840_s28 + $0x3f8] sm:$0xff] %v345_v57  ;;  %v351_v60 = vld [vmem:[%s2844_s29 + $0x4b0] sm:$0xff] }
  0x5d   : >> { %348 = vst [vmem:[%s2840_s28 + $0x400] sm:$0xff] %v347_v58  ;;  %350 = vst [vmem:[%s2840_s28 + $0x408] sm:$0xff] %v349_v59  ;;  %v353_v61 = vld [vmem:[%s2844_s29 + $0x4b8] sm:$0xff]  ;;  %v355_v62 = vld [vmem:[%s2844_s29 + $0x4c0] sm:$0xff] }
  0x5e   : >> { %352 = vst [vmem:[%s2840_s28 + $0x438] sm:$0xff] %v351_v60  ;;  %354 = vst [vmem:[%s2840_s28 + $0x440] sm:$0xff] %v353_v61  ;;  %v357_v63 = vld [vmem:[%s2844_s29 + $0x4c8] sm:$0xff]  ;;  %s5861_s29 = smov %s3138_s7 }
  0x5f   : >> { %356 = vst [vmem:[%s2840_s28 + $0x448] sm:$0xff] %v355_v62  ;;  %358 = vst [vmem:[%s2840_s28 + $0x450] sm:$0xff] %v357_v63  ;;  %s5860_s28 = smov %s3141_s8 }
  0x60 PF: > { %s3247_s9 = sand.u32 3, %s218_s25   ;;  %s2323_s10 = sshll.u32 %s3071_s26, 9 }
  0x61   : > { %s370_s6 = sshra.s32 %s2323_s10, 4  ;;  %p2282_p3 = scmp.le.s32.totalorder %s3247_s9, 0 }
  0x62   : > { %s3251_s0 = scalar_lea.vmem %s3056_s11, %s370_s6   ;;  %s3254_s8 = scalar_lea.vmem %s3060_s22, %s370_s6 [#allocation2]  }
  0x63   : > { %2141 = sbr.rel (%p2282_p3) target bundleno = 116 (0x74), region = 240  ;;  %s5863_s28 = smov (!%p2282_p3), %s3254_s8 }
  0x64   : > { %s5864_s29 = smov (!%p2282_p3), %s3251_s0  ;;  %s3263_s30 = smov (!%p2282_p3), 0  }
  0x65   : > { %s3265_s4 = smov (!%p2282_p3), 0  }
  0x6a LB: >> { %v386_v0 = vld [vmem:[%s2860_s29] sm:$0xff]  ;;  %v388_v1 = vld [vmem:[%s2860_s29 + $0x50] sm:$0xff]  ;;  %s418_s25 = sadd.s32 1, %s2864_s30  ;;  %s380_s4 = sadd.s32 1, %s2868_s4   ;;  %s2868_s4 = sphi %s3265_s4, %s380_s4   ;;  %s2864_s30 = sphi %s3263_s30, %s5865_s30   ;;  %s2860_s29 = sphi %s5864_s29, %s423_s29   ;;  %s2856_s28 = sphi %s5863_s28, %s424_s28  }
  0x6b   : >> { %v390_v2 = vld [vmem:[%s2860_s29 + $0xa0] sm:$0xff]  ;;  %387 = vst [vmem:[%s2856_s28] sm:$0xff] %v386_v0  ;;  %389 = vst [vmem:[%s2856_s28 + $0x48] sm:$0xff] %v388_v1  ;;  %v392_v3 = vld [vmem:[%s2860_s29 + $0xf0] sm:$0xff]  ;;  %p419_p4 = scmp.ge.s32.totalorder %s418_s25, %s3247_s9  ;;  %p379_p5 = scmp.ge.s32.totalorder %s380_s4, %s3247_s9 }
  0x6c   : >> { %391 = vst [vmem:[%s2856_s28 + $0x90] sm:$0xff] %v390_v2  ;;  %v394_v4 = vld [vmem:[%s2860_s29 + $0x140] sm:$0xff]  ;;  %v396_v5 = vld [vmem:[%s2860_s29 + $0x190] sm:$0xff]  ;;  %393 = vst [vmem:[%s2856_s28 + $0xd8] sm:$0xff] %v392_v3 }
  0x6d   : >> { %395 = vst [vmem:[%s2856_s28 + $0x120] sm:$0xff] %v394_v4  ;;  %397 = vst [vmem:[%s2856_s28 + $0x168] sm:$0xff] %v396_v5  ;;  %v398_v6 = vld [vmem:[%s2860_s29 + $0x1e0] sm:$0xff]  ;;  %v400_v7 = vld [vmem:[%s2860_s29 + $0x230] sm:$0xff]  ;;  %s6221_s25 = smov (%p419_p4, %s418_s25), 0  ;;  %382 = sbr.rel (!%p379_p5) target bundleno = 106 (0x6a), region = 246 }
  0x6e   : >> { %v402_v8 = vld [vmem:[%s2860_s29 + $0x280] sm:$0xff]  ;;  %399 = vst [vmem:[%s2856_s28 + $0x1b0] sm:$0xff] %v398_v6  ;;  %401 = vst [vmem:[%s2856_s28 + $0x1f8] sm:$0xff] %v400_v7  ;;  %v404_v9 = vld [vmem:[%s2860_s29 + $0x2d0] sm:$0xff]  ;;  %s2283_s26 = sshll.u32 %s6221_s25, 3  ;;  %s5865_s30 = smov %s6221_s25 }
  0x6f   : >> { %403 = vst [vmem:[%s2856_s28 + $0x240] sm:$0xff] %v402_v8  ;;  %v406_v10 = vld [vmem:[%s2860_s29 + $0x320] sm:$0xff]  ;;  %v408_v11 = vld [vmem:[%s2860_s29 + $0x370] sm:$0xff]  ;;  %405 = vst [vmem:[%s2856_s28 + $0x288] sm:$0xff] %v404_v9 }
  0x70   : >> { %407 = vst [vmem:[%s2856_s28 + $0x2d0] sm:$0xff] %v406_v10  ;;  %409 = vst [vmem:[%s2856_s28 + $0x318] sm:$0xff] %v408_v11  ;;  %v410_v12 = vld [vmem:[%s2860_s29 + $0x3c0] sm:$0xff]  ;;  %v412_v13 = vld [vmem:[%s2860_s29 + $0x410] sm:$0xff] }
  0x71   : >> { %v414_v14 = vld [vmem:[%s2860_s29 + $0x460] sm:$0xff]  ;;  %411 = vst [vmem:[%s2856_s28 + $0x360] sm:$0xff] %v410_v12  ;;  %413 = vst [vmem:[%s2856_s28 + $0x3a8] sm:$0xff] %v412_v13  ;;  %v416_v15 = vld [vmem:[%s2860_s29 + $0x4b0] sm:$0xff]  ;;  %s423_s29 = scalar_lea.vmem %s3251_s0, %s2283_s26  }
  0x72   : >> { %415 = vst [vmem:[%s2856_s28 + $0x3f0] sm:$0xff] %v414_v14  ;;  %417 = vst [vmem:[%s2856_s28 + $0x438] sm:$0xff] %v416_v15  ;;  %s424_s28 = scalar_lea.vmem %s3254_s8, %s2283_s26 [#allocation2]  }
  0x74 PF: > { %427 = sbr.rel (%p214_p12) target bundleno = 201 (0xc9), region = 69  ;;  %s429_s5 = ssub.s32 (!%p214_p12), %s3058_s21, %s3064_s24 }
  0x75   : > { %s433_s7 = sshrl.u32 (!%p214_p12), %s3058_s21, 3  ;;  %s3328_s10 = scalar_lea.vmem (!%p214_p12), %s3056_s11, %s429_s5 }
  0x76   : > { %s3331_s6 = scalar_lea.vmem (!%p214_p12), %s3060_s22, %s429_s5 [#allocation2]  ;;  %s3335_s4 = sshrl.u32 (!%p214_p12), %s433_s7, 2 }
  0x77   : > { %p2285_p7 = scmp.le.s32.totalorder (!%p214_p12), %s3335_s4, 0 }
  0x7b   : > { %2155 = sbr.rel (%p2285_p7) target bundleno = 163 (0xa3), region = 251  ;;  %s5866_s0 = smov (!%p2285_p7), %s3060_s22 }
  0x7c   : > { %s5867_s9 = smov (!%p2285_p7), %s3056_s11  ;;  %s3344_s8 = smov (!%p2285_p7), 0  }
  0x7d   : > { %s3346_s28 = smov (!%p2285_p7), 0  }
  0x82 LB: >> { %v446_v16 = vld [vmem:[%s2876_s9] sm:$0xff]  ;;  %v448_v17 = vld [vmem:[%s2876_s9 + $0x8] sm:$0xff]  ;;  %v450_v18 = vld [vmem:[%s2876_s9 + $0x10] sm:$0xff]  ;;  %s574_s29 = sadd.s32 1, %s2880_s8  ;;  %s440_s28 = sadd.s32 1, %s2884_s28   ;;  %s2884_s28 = sphi %s3346_s28, %s440_s28   ;;  %s2880_s8 = sphi %s3344_s8, %s5870_s8   ;;  %s2876_s9 = sphi %s5867_s9, %s5869_s9   ;;  %s2872_s0 = sphi %s5866_s0, %s5868_s0  }
  0x83   : >> { %447 = vst [vmem:[%s2872_s0] sm:$0xff] %v446_v16  ;;  %449 = vst [vmem:[%s2872_s0 + $0x8] sm:$0xff] %v448_v17  ;;  %v452_v19 = vld [vmem:[%s2876_s9 + $0x18] sm:$0xff]  ;;  %v454_v20 = vld [vmem:[%s2876_s9 + $0x50] sm:$0xff]  ;;  %p575_p8 = scmp.ge.s32.totalorder %s574_s29, %s3335_s4  ;;  %p439_p9 = scmp.ge.s32.totalorder %s440_s28, %s3335_s4 }
  0x84   : >> { %451 = vst [vmem:[%s2872_s0 + $0x10] sm:$0xff] %v450_v18  ;;  %v456_v21 = vld [vmem:[%s2876_s9 + $0x58] sm:$0xff]  ;;  %453 = vst [vmem:[%s2872_s0 + $0x18] sm:$0xff] %v452_v19  ;;  %v458_v22 = vld [vmem:[%s2876_s9 + $0x60] sm:$0xff] }
  0x85   : >> { %455 = vst [vmem:[%s2872_s0 + $0x48] sm:$0xff] %v454_v20  ;;  %457 = vst [vmem:[%s2872_s0 + $0x50] sm:$0xff] %v456_v21  ;;  %v460_v23 = vld [vmem:[%s2876_s9 + $0x68] sm:$0xff]  ;;  %v462_v24 = vld [vmem:[%s2876_s9 + $0xa0] sm:$0xff]  ;;  %s6223_s29 = smov (%p575_p8, %s574_s29), 0 }
  0x86   : >> { %459 = vst [vmem:[%s2872_s0 + $0x58] sm:$0xff] %v458_v22  ;;  %461 = vst [vmem:[%s2872_s0 + $0x60] sm:$0xff] %v460_v23  ;;  %v464_v25 = vld [vmem:[%s2876_s9 + $0xa8] sm:$0xff]  ;;  %v466_v26 = vld [vmem:[%s2876_s9 + $0xb0] sm:$0xff]  ;;  %s2286_s30 = sshll.u32 %s6223_s29, 5  ;;  %s5870_s8 = smov %s6223_s29 }
  0x87   : >> { %463 = vst [vmem:[%s2872_s0 + $0x90] sm:$0xff] %v462_v24  ;;  %v468_v27 = vld [vmem:[%s2876_s9 + $0xb8] sm:$0xff]  ;;  %465 = vst [vmem:[%s2872_s0 + $0x98] sm:$0xff] %v464_v25  ;;  %v470_v28 = vld [vmem:[%s2876_s9 + $0xf0] sm:$0xff]  ;;  %s3402_s25 = scalar_lea.vmem %s3056_s11, %s2286_s30   ;;  %s3405_s26 = scalar_lea.vmem %s3060_s22, %s2286_s30 [#allocation2]  }
  0x88   : >> { %467 = vst [vmem:[%s2872_s0 + $0xa0] sm:$0xff] %v466_v26  ;;  %469 = vst [vmem:[%s2872_s0 + $0xa8] sm:$0xff] %v468_v27  ;;  %v472_v29 = vld [vmem:[%s2876_s9 + $0xf8] sm:$0xff]  ;;  %v474_v30 = vld [vmem:[%s2876_s9 + $0x100] sm:$0xff] }
  0x89   : >> { %471 = vst [vmem:[%s2872_s0 + $0xd8] sm:$0xff] %v470_v28  ;;  %473 = vst [vmem:[%s2872_s0 + $0xe0] sm:$0xff] %v472_v29  ;;  %v476_v31 = vld [vmem:[%s2876_s9 + $0x108] sm:$0xff]  ;;  %v478_v32 = vld [vmem:[%s2876_s9 + $0x140] sm:$0xff] }
  0x8a   : >> { %475 = vst [vmem:[%s2872_s0 + $0xe8] sm:$0xff] %v474_v30  ;;  %v480_v33 = vld [vmem:[%s2876_s9 + $0x148] sm:$0xff]  ;;  %477 = vst [vmem:[%s2872_s0 + $0xf0] sm:$0xff] %v476_v31  ;;  %v482_v34 = vld [vmem:[%s2876_s9 + $0x150] sm:$0xff] }
  0x8b   : >> { %479 = vst [vmem:[%s2872_s0 + $0x120] sm:$0xff] %v478_v32  ;;  %481 = vst [vmem:[%s2872_s0 + $0x128] sm:$0xff] %v480_v33  ;;  %v484_v35 = vld [vmem:[%s2876_s9 + $0x158] sm:$0xff]  ;;  %v486_v36 = vld [vmem:[%s2876_s9 + $0x190] sm:$0xff] }
  0x8c   : >> { %483 = vst [vmem:[%s2872_s0 + $0x130] sm:$0xff] %v482_v34  ;;  %485 = vst [vmem:[%s2872_s0 + $0x138] sm:$0xff] %v484_v35  ;;  %v488_v37 = vld [vmem:[%s2876_s9 + $0x198] sm:$0xff]  ;;  %v490_v38 = vld [vmem:[%s2876_s9 + $0x1a0] sm:$0xff] }
  0x8d   : >> { %487 = vst [vmem:[%s2872_s0 + $0x168] sm:$0xff] %v486_v36  ;;  %v492_v39 = vld [vmem:[%s2876_s9 + $0x1a8] sm:$0xff]  ;;  %489 = vst [vmem:[%s2872_s0 + $0x170] sm:$0xff] %v488_v37  ;;  %v494_v40 = vld [vmem:[%s2876_s9 + $0x1e0] sm:$0xff] }
  0x8e   : >> { %491 = vst [vmem:[%s2872_s0 + $0x178] sm:$0xff] %v490_v38  ;;  %493 = vst [vmem:[%s2872_s0 + $0x180] sm:$0xff] %v492_v39  ;;  %v496_v41 = vld [vmem:[%s2876_s9 + $0x1e8] sm:$0xff]  ;;  %v498_v42 = vld [vmem:[%s2876_s9 + $0x1f0] sm:$0xff] }
  0x8f   : >> { %495 = vst [vmem:[%s2872_s0 + $0x1b0] sm:$0xff] %v494_v40  ;;  %497 = vst [vmem:[%s2872_s0 + $0x1b8] sm:$0xff] %v496_v41  ;;  %v500_v43 = vld [vmem:[%s2876_s9 + $0x1f8] sm:$0xff]  ;;  %v502_v44 = vld [vmem:[%s2876_s9 + $0x230] sm:$0xff] }
  0x90   : >> { %499 = vst [vmem:[%s2872_s0 + $0x1c0] sm:$0xff] %v498_v42  ;;  %v504_v45 = vld [vmem:[%s2876_s9 + $0x238] sm:$0xff]  ;;  %501 = vst [vmem:[%s2872_s0 + $0x1c8] sm:$0xff] %v500_v43  ;;  %v506_v46 = vld [vmem:[%s2876_s9 + $0x240] sm:$0xff] }
  0x91   : >> { %503 = vst [vmem:[%s2872_s0 + $0x1f8] sm:$0xff] %v502_v44  ;;  %505 = vst [vmem:[%s2872_s0 + $0x200] sm:$0xff] %v504_v45  ;;  %v508_v47 = vld [vmem:[%s2876_s9 + $0x248] sm:$0xff]  ;;  %v510_v48 = vld [vmem:[%s2876_s9 + $0x280] sm:$0xff] }
  0x92   : >> { %507 = vst [vmem:[%s2872_s0 + $0x208] sm:$0xff] %v506_v46  ;;  %509 = vst [vmem:[%s2872_s0 + $0x210] sm:$0xff] %v508_v47  ;;  %v512_v49 = vld [vmem:[%s2876_s9 + $0x288] sm:$0xff]  ;;  %v514_v50 = vld [vmem:[%s2876_s9 + $0x290] sm:$0xff] }
  0x93   : >> { %511 = vst [vmem:[%s2872_s0 + $0x240] sm:$0xff] %v510_v48  ;;  %v516_v51 = vld [vmem:[%s2876_s9 + $0x298] sm:$0xff]  ;;  %513 = vst [vmem:[%s2872_s0 + $0x248] sm:$0xff] %v512_v49  ;;  %v518_v52 = vld [vmem:[%s2876_s9 + $0x2d0] sm:$0xff] }
  0x94   : >> { %515 = vst [vmem:[%s2872_s0 + $0x250] sm:$0xff] %v514_v50  ;;  %517 = vst [vmem:[%s2872_s0 + $0x258] sm:$0xff] %v516_v51  ;;  %v520_v53 = vld [vmem:[%s2876_s9 + $0x2d8] sm:$0xff]  ;;  %v522_v54 = vld [vmem:[%s2876_s9 + $0x2e0] sm:$0xff] }
  0x95   : >> { %519 = vst [vmem:[%s2872_s0 + $0x288] sm:$0xff] %v518_v52  ;;  %521 = vst [vmem:[%s2872_s0 + $0x290] sm:$0xff] %v520_v53  ;;  %v524_v55 = vld [vmem:[%s2876_s9 + $0x2e8] sm:$0xff]  ;;  %v526_v56 = vld [vmem:[%s2876_s9 + $0x320] sm:$0xff] }
  0x96   : >> { %523 = vst [vmem:[%s2872_s0 + $0x298] sm:$0xff] %v522_v54  ;;  %v528_v57 = vld [vmem:[%s2876_s9 + $0x328] sm:$0xff]  ;;  %525 = vst [vmem:[%s2872_s0 + $0x2a0] sm:$0xff] %v524_v55  ;;  %v530_v58 = vld [vmem:[%s2876_s9 + $0x330] sm:$0xff] }
  0x97   : >> { %527 = vst [vmem:[%s2872_s0 + $0x2d0] sm:$0xff] %v526_v56  ;;  %529 = vst [vmem:[%s2872_s0 + $0x2d8] sm:$0xff] %v528_v57  ;;  %v532_v59 = vld [vmem:[%s2876_s9 + $0x338] sm:$0xff]  ;;  %v534_v60 = vld [vmem:[%s2876_s9 + $0x370] sm:$0xff] }
  0x98   : >> { %531 = vst [vmem:[%s2872_s0 + $0x2e0] sm:$0xff] %v530_v58  ;;  %533 = vst [vmem:[%s2872_s0 + $0x2e8] sm:$0xff] %v532_v59  ;;  %v536_v61 = vld [vmem:[%s2876_s9 + $0x378] sm:$0xff]  ;;  %v538_v62 = vld [vmem:[%s2876_s9 + $0x380] sm:$0xff] }
  0x99   : >> { %535 = vst [vmem:[%s2872_s0 + $0x318] sm:$0xff] %v534_v60  ;;  %v540_v63 = vld [vmem:[%s2876_s9 + $0x388] sm:$0xff]  ;;  %537 = vst [vmem:[%s2872_s0 + $0x320] sm:$0xff] %v536_v61  ;;  %v542_v0 = vld [vmem:[%s2876_s9 + $0x3c0] sm:$0xff] }
  0x9a   : >> { %539 = vst [vmem:[%s2872_s0 + $0x328] sm:$0xff] %v538_v62  ;;  %541 = vst [vmem:[%s2872_s0 + $0x330] sm:$0xff] %v540_v63  ;;  %v544_v1 = vld [vmem:[%s2876_s9 + $0x3c8] sm:$0xff]  ;;  %v546_v2 = vld [vmem:[%s2876_s9 + $0x3d0] sm:$0xff] }
  0x9b   : >> { %543 = vst [vmem:[%s2872_s0 + $0x360] sm:$0xff] %v542_v0  ;;  %545 = vst [vmem:[%s2872_s0 + $0x368] sm:$0xff] %v544_v1  ;;  %v548_v3 = vld [vmem:[%s2876_s9 + $0x3d8] sm:$0xff]  ;;  %v550_v4 = vld [vmem:[%s2876_s9 + $0x410] sm:$0xff] }
  0x9c   : >> { %547 = vst [vmem:[%s2872_s0 + $0x370] sm:$0xff] %v546_v2  ;;  %v552_v5 = vld [vmem:[%s2876_s9 + $0x418] sm:$0xff]  ;;  %549 = vst [vmem:[%s2872_s0 + $0x378] sm:$0xff] %v548_v3  ;;  %v554_v6 = vld [vmem:[%s2876_s9 + $0x420] sm:$0xff]  ;;  %442 = sbr.rel (!%p439_p9) target bundleno = 130 (0x82), region = 257 }
  0x9d   : >> { %551 = vst [vmem:[%s2872_s0 + $0x3a8] sm:$0xff] %v550_v4  ;;  %553 = vst [vmem:[%s2872_s0 + $0x3b0] sm:$0xff] %v552_v5  ;;  %v556_v7 = vld [vmem:[%s2876_s9 + $0x428] sm:$0xff]  ;;  %v558_v8 = vld [vmem:[%s2876_s9 + $0x460] sm:$0xff] }
  0x9e   : >> { %555 = vst [vmem:[%s2872_s0 + $0x3b8] sm:$0xff] %v554_v6  ;;  %557 = vst [vmem:[%s2872_s0 + $0x3c0] sm:$0xff] %v556_v7  ;;  %v560_v9 = vld [vmem:[%s2876_s9 + $0x468] sm:$0xff]  ;;  %v562_v10 = vld [vmem:[%s2876_s9 + $0x470] sm:$0xff] }
  0x9f   : >> { %559 = vst [vmem:[%s2872_s0 + $0x3f0] sm:$0xff] %v558_v8  ;;  %v564_v11 = vld [vmem:[%s2876_s9 + $0x478] sm:$0xff]  ;;  %561 = vst [vmem:[%s2872_s0 + $0x3f8] sm:$0xff] %v560_v9  ;;  %v566_v12 = vld [vmem:[%s2876_s9 + $0x4b0] sm:$0xff] }
  0xa0   : >> { %563 = vst [vmem:[%s2872_s0 + $0x400] sm:$0xff] %v562_v10  ;;  %565 = vst [vmem:[%s2872_s0 + $0x408] sm:$0xff] %v564_v11  ;;  %v568_v13 = vld [vmem:[%s2876_s9 + $0x4b8] sm:$0xff]  ;;  %v570_v14 = vld [vmem:[%s2876_s9 + $0x4c0] sm:$0xff] }
  0xa1   : >> { %567 = vst [vmem:[%s2872_s0 + $0x438] sm:$0xff] %v566_v12  ;;  %569 = vst [vmem:[%s2872_s0 + $0x440] sm:$0xff] %v568_v13  ;;  %v572_v15 = vld [vmem:[%s2876_s9 + $0x4c8] sm:$0xff]  ;;  %s5869_s9 = smov %s3402_s25 }
  0xa2   : >> { %571 = vst [vmem:[%s2872_s0 + $0x448] sm:$0xff] %v570_v14  ;;  %573 = vst [vmem:[%s2872_s0 + $0x450] sm:$0xff] %v572_v15  ;;  %s5868_s0 = smov %s3405_s26 }
  0xa3 PF: > { %s3511_s5 = sand.u32 3, %s433_s7   ;;  %s2325_s30 = sshll.u32 %s3335_s4, 9 }
  0xa4   : > { %s585_s20 = sshra.s32 %s2325_s30, 4  ;;  %p2291_p10 = scmp.le.s32.totalorder %s3511_s5, 0 }
  0xa5   : > { %s3515_s19 = scalar_lea.vmem %s3056_s11, %s585_s20   ;;  %s3518_s26 = scalar_lea.vmem %s3060_s22, %s585_s20 [#allocation2]  }
  0xa6   : > { %2169 = sbr.rel (%p2291_p10) target bundleno = 183 (0xb7), region = 262  ;;  %s5871_s0 = smov (!%p2291_p10), %s3518_s26 }
  0xa7   : > { %s5872_s9 = smov (!%p2291_p10), %s3515_s19  ;;  %s3527_s8 = smov (!%p2291_p10), 0  }
  0xa8   : > { %s3529_s28 = smov (!%p2291_p10), 0  }
  0xad LB: >> { %v601_v16 = vld [vmem:[%s2892_s9] sm:$0xff]  ;;  %v603_v17 = vld [vmem:[%s2892_s9 + $0x50] sm:$0xff]  ;;  %s633_s20 = sadd.s32 1, %s2896_s8  ;;  %s595_s28 = sadd.s32 1, %s2900_s28   ;;  %s2900_s28 = sphi %s3529_s28, %s595_s28   ;;  %s2896_s8 = sphi %s3527_s8, %s5873_s8   ;;  %s2892_s9 = sphi %s5872_s9, %s638_s9   ;;  %s2888_s0 = sphi %s5871_s0, %s639_s0  }
  0xae   : >> { %v605_v18 = vld [vmem:[%s2892_s9 + $0xa0] sm:$0xff]  ;;  %602 = vst [vmem:[%s2888_s0] sm:$0xff] %v601_v16  ;;  %604 = vst [vmem:[%s2888_s0 + $0x48] sm:$0xff] %v603_v17  ;;  %v607_v19 = vld [vmem:[%s2892_s9 + $0xf0] sm:$0xff]  ;;  %p634_p11 = scmp.ge.s32.totalorder %s633_s20, %s3511_s5  ;;  %p594_p12 = scmp.ge.s32.totalorder %s595_s28, %s3511_s5 }
  0xaf   : >> { %606 = vst [vmem:[%s2888_s0 + $0x90] sm:$0xff] %v605_v18  ;;  %v609_v20 = vld [vmem:[%s2892_s9 + $0x140] sm:$0xff]  ;;  %v611_v21 = vld [vmem:[%s2892_s9 + $0x190] sm:$0xff]  ;;  %608 = vst [vmem:[%s2888_s0 + $0xd8] sm:$0xff] %v607_v19 }
  0xb0   : >> { %610 = vst [vmem:[%s2888_s0 + $0x120] sm:$0xff] %v609_v20  ;;  %612 = vst [vmem:[%s2888_s0 + $0x168] sm:$0xff] %v611_v21  ;;  %v613_v22 = vld [vmem:[%s2892_s9 + $0x1e0] sm:$0xff]  ;;  %v615_v23 = vld [vmem:[%s2892_s9 + $0x230] sm:$0xff]  ;;  %s6225_s20 = smov (%p634_p11, %s633_s20), 0  ;;  %597 = sbr.rel (!%p594_p12) target bundleno = 173 (0xad), region = 268 }
  0xb1   : >> { %v617_v24 = vld [vmem:[%s2892_s9 + $0x280] sm:$0xff]  ;;  %614 = vst [vmem:[%s2888_s0 + $0x1b0] sm:$0xff] %v613_v22  ;;  %616 = vst [vmem:[%s2888_s0 + $0x1f8] sm:$0xff] %v615_v23  ;;  %v619_v25 = vld [vmem:[%s2892_s9 + $0x2d0] sm:$0xff]  ;;  %s2292_s7 = sshll.u32 %s6225_s20, 3  ;;  %s5873_s8 = smov %s6225_s20 }
  0xb2   : >> { %618 = vst [vmem:[%s2888_s0 + $0x240] sm:$0xff] %v617_v24  ;;  %v621_v26 = vld [vmem:[%s2892_s9 + $0x320] sm:$0xff]  ;;  %v623_v27 = vld [vmem:[%s2892_s9 + $0x370] sm:$0xff]  ;;  %620 = vst [vmem:[%s2888_s0 + $0x288] sm:$0xff] %v619_v25 }
  0xb3   : >> { %622 = vst [vmem:[%s2888_s0 + $0x2d0] sm:$0xff] %v621_v26  ;;  %624 = vst [vmem:[%s2888_s0 + $0x318] sm:$0xff] %v623_v27  ;;  %v625_v28 = vld [vmem:[%s2892_s9 + $0x3c0] sm:$0xff]  ;;  %v627_v29 = vld [vmem:[%s2892_s9 + $0x410] sm:$0xff] }
  0xb4   : >> { %v629_v30 = vld [vmem:[%s2892_s9 + $0x460] sm:$0xff]  ;;  %626 = vst [vmem:[%s2888_s0 + $0x360] sm:$0xff] %v625_v28  ;;  %628 = vst [vmem:[%s2888_s0 + $0x3a8] sm:$0xff] %v627_v29  ;;  %v631_v31 = vld [vmem:[%s2892_s9 + $0x4b0] sm:$0xff]  ;;  %s638_s9 = scalar_lea.vmem %s3515_s19, %s2292_s7  }
  0xb5   : >> { %630 = vst [vmem:[%s2888_s0 + $0x3f0] sm:$0xff] %v629_v30  ;;  %632 = vst [vmem:[%s2888_s0 + $0x438] sm:$0xff] %v631_v31  ;;  %s639_s0 = scalar_lea.vmem %s3518_s26, %s2292_s7 [#allocation2]  }
  0xb7 PF: > { %s2966_s4 = smov 0  }
  0xb8   : > { %s3587_s29 = sshllo.u32 %s2966_s4, %s3064_s24 }
  0xb9   : > { %v649_v32 = vld [vmem:[%s3328_s10] sm:%s3587_s29]  ;;  %v651_v33 = vld [vmem:[%s3328_s10 + $0x50] sm:%s3587_s29] }
  0xba   : > { %650 = vst [vmem:[%s3331_s6] sm:%s3587_s29] %v649_v32  ;;  %652 = vst [vmem:[%s3331_s6 + $0x48] sm:%s3587_s29] %v651_v33 }
  0xbb   : > { %v653_v34 = vld [vmem:[%s3328_s10 + $0xa0] sm:%s3587_s29]  ;;  %v655_v35 = vld [vmem:[%s3328_s10 + $0xf0] sm:%s3587_s29] }
  0xbc   : > { %654 = vst [vmem:[%s3331_s6 + $0x90] sm:%s3587_s29] %v653_v34  ;;  %656 = vst [vmem:[%s3331_s6 + $0xd8] sm:%s3587_s29] %v655_v35 }
  0xbd   : > { %v657_v36 = vld [vmem:[%s3328_s10 + $0x140] sm:%s3587_s29]  ;;  %v659_v37 = vld [vmem:[%s3328_s10 + $0x190] sm:%s3587_s29] }
  0xbe   : > { %658 = vst [vmem:[%s3331_s6 + $0x120] sm:%s3587_s29] %v657_v36  ;;  %660 = vst [vmem:[%s3331_s6 + $0x168] sm:%s3587_s29] %v659_v37 }
  0xbf   : > { %v661_v38 = vld [vmem:[%s3328_s10 + $0x1e0] sm:%s3587_s29]  ;;  %v663_v39 = vld [vmem:[%s3328_s10 + $0x230] sm:%s3587_s29] }
  0xc0   : > { %662 = vst [vmem:[%s3331_s6 + $0x1b0] sm:%s3587_s29] %v661_v38  ;;  %664 = vst [vmem:[%s3331_s6 + $0x1f8] sm:%s3587_s29] %v663_v39 }
  0xc1   : > { %v665_v40 = vld [vmem:[%s3328_s10 + $0x280] sm:%s3587_s29]  ;;  %v667_v41 = vld [vmem:[%s3328_s10 + $0x2d0] sm:%s3587_s29] }
  0xc2   : > { %666 = vst [vmem:[%s3331_s6 + $0x240] sm:%s3587_s29] %v665_v40  ;;  %668 = vst [vmem:[%s3331_s6 + $0x288] sm:%s3587_s29] %v667_v41 }
  0xc3   : > { %v669_v42 = vld [vmem:[%s3328_s10 + $0x320] sm:%s3587_s29]  ;;  %v671_v43 = vld [vmem:[%s3328_s10 + $0x370] sm:%s3587_s29] }
  0xc4   : > { %670 = vst [vmem:[%s3331_s6 + $0x2d0] sm:%s3587_s29] %v669_v42  ;;  %672 = vst [vmem:[%s3331_s6 + $0x318] sm:%s3587_s29] %v671_v43 }
  0xc5   : > { %v673_v44 = vld [vmem:[%s3328_s10 + $0x3c0] sm:%s3587_s29]  ;;  %v675_v45 = vld [vmem:[%s3328_s10 + $0x410] sm:%s3587_s29] }
  0xc6   : > { %674 = vst [vmem:[%s3331_s6 + $0x360] sm:%s3587_s29] %v673_v44  ;;  %676 = vst [vmem:[%s3331_s6 + $0x3a8] sm:%s3587_s29] %v675_v45 }
  0xc7   : > { %v677_v46 = vld [vmem:[%s3328_s10 + $0x460] sm:%s3587_s29]  ;;  %v679_v47 = vld [vmem:[%s3328_s10 + $0x4b0] sm:%s3587_s29] }
  0xc8   : > { %678 = vst [vmem:[%s3331_s6 + $0x3f0] sm:%s3587_s29] %v677_v46  ;;  %680 = vst [vmem:[%s3331_s6 + $0x438] sm:%s3587_s29] %v679_v47 }
  0xc9 PF: > { %p2294_p13 = scmp.ge.u32.totalorder %s3058_s21, 8 }
  0xca   : > { %s2967_s19 = smov (!%p2294_p13), 0  }
  0xcb   : > { %171 = sbr.rel (%p2294_p13) target bundleno = 220 (0xdc), region = 40  ;;  %s3655_s24 = sshllo.u32 (!%p2294_p13), %s2967_s19, %s3058_s21 }
  0xcc   : > { %v181_v48 = vld [vmem:[%s3056_s11] sm:%s3655_s24] (!%p2294_p13)  ;;  %v183_v49 = vld [vmem:[%s3056_s11 + $0x50] sm:%s3655_s24] (!%p2294_p13) }
  0xcd   : > { %182 = vst [vmem:[%s3060_s22] sm:%s3655_s24] (!%p2294_p13), %v181_v48  ;;  %184 = vst [vmem:[%s3060_s22 + $0x48] sm:%s3655_s24] (!%p2294_p13), %v183_v49 }
  0xce   : > { %v185_v50 = vld [vmem:[%s3056_s11 + $0xa0] sm:%s3655_s24] (!%p2294_p13)  ;;  %v187_v51 = vld [vmem:[%s3056_s11 + $0xf0] sm:%s3655_s24] (!%p2294_p13) }
  0xcf   : > { %186 = vst [vmem:[%s3060_s22 + $0x90] sm:%s3655_s24] (!%p2294_p13), %v185_v50  ;;  %188 = vst [vmem:[%s3060_s22 + $0xd8] sm:%s3655_s24] (!%p2294_p13), %v187_v51 }
  0xd0   : > { %v189_v52 = vld [vmem:[%s3056_s11 + $0x140] sm:%s3655_s24] (!%p2294_p13)  ;;  %v191_v53 = vld [vmem:[%s3056_s11 + $0x190] sm:%s3655_s24] (!%p2294_p13) }
  0xd1   : > { %190 = vst [vmem:[%s3060_s22 + $0x120] sm:%s3655_s24] (!%p2294_p13), %v189_v52  ;;  %192 = vst [vmem:[%s3060_s22 + $0x168] sm:%s3655_s24] (!%p2294_p13), %v191_v53 }
  0xd2   : > { %v193_v54 = vld [vmem:[%s3056_s11 + $0x1e0] sm:%s3655_s24]  ;;  %v195_v55 = vld [vmem:[%s3056_s11 + $0x230] sm:%s3655_s24] }
  0xd3   : > { %194 = vst [vmem:[%s3060_s22 + $0x1b0] sm:%s3655_s24] %v193_v54  ;;  %196 = vst [vmem:[%s3060_s22 + $0x1f8] sm:%s3655_s24] %v195_v55 }
  0xd4   : > { %v197_v56 = vld [vmem:[%s3056_s11 + $0x280] sm:%s3655_s24]  ;;  %v199_v57 = vld [vmem:[%s3056_s11 + $0x2d0] sm:%s3655_s24] }
  0xd5   : > { %198 = vst [vmem:[%s3060_s22 + $0x240] sm:%s3655_s24] %v197_v56  ;;  %200 = vst [vmem:[%s3060_s22 + $0x288] sm:%s3655_s24] %v199_v57 }
  0xd6   : > { %v201_v58 = vld [vmem:[%s3056_s11 + $0x320] sm:%s3655_s24]  ;;  %v203_v59 = vld [vmem:[%s3056_s11 + $0x370] sm:%s3655_s24] }
  0xd7   : > { %202 = vst [vmem:[%s3060_s22 + $0x2d0] sm:%s3655_s24] %v201_v58  ;;  %204 = vst [vmem:[%s3060_s22 + $0x318] sm:%s3655_s24] %v203_v59 }
  0xd8   : > { %v205_v60 = vld [vmem:[%s3056_s11 + $0x3c0] sm:%s3655_s24]  ;;  %v207_v61 = vld [vmem:[%s3056_s11 + $0x410] sm:%s3655_s24] }
  0xd9   : > { %206 = vst [vmem:[%s3060_s22 + $0x360] sm:%s3655_s24] %v205_v60  ;;  %208 = vst [vmem:[%s3060_s22 + $0x3a8] sm:%s3655_s24] %v207_v61 }
  0xda   : > { %v209_v62 = vld [vmem:[%s3056_s11 + $0x460] sm:%s3655_s24]  ;;  %v211_v63 = vld [vmem:[%s3056_s11 + $0x4b0] sm:%s3655_s24] }
  0xdb   : > { %210 = vst [vmem:[%s3060_s22 + $0x3f0] sm:%s3655_s24] %v209_v62  ;;  %212 = vst [vmem:[%s3060_s22 + $0x438] sm:%s3655_s24] %v211_v63 }
  0xdc PF: > { %p2295_p0 = scmp.ge.s32.totalorder %s2836_s18, 1  ;;  %p683_p1 = scmp.lt.s32.totalorder %s2836_s18, 5 }
  0xde   : > { %p684_p2 = pnand %p2295_p0, %p683_p1 }
  0xe0   : > { %687 = sbr.rel (%p684_p2) target bundleno = 668 (0x29c), region = 94 }
  0xe7   : > { %v868_v0 = vld [vmem:[%s5752_s1 + $0x10] sm:$0xff]  ;;  %v866_v1 = vld [vmem:[%s5752_s1] sm:$0xff]  ;;  %v2968_v2 = vmov 0   ;;  %v869_v3 = vld [vmem:[%s5752_s1 + $0x18] sm:$0xff]  ;;  %s690_s30 = sand.u32 1, %s2812_s12   ;;  %s1497_s9 = smul.u32 (%p3039_p6), 9, %s2820_s14 }
  0xe8   : > { %2653 = vset.pattern.permute.xlu1 %v2968_v2  ;;  %2652 = vset.pattern.permute.xlu0 %v2968_v2  ;;  %v867_v4 = vld [vmem:[%s5752_s1 + $0x8] sm:$0xff]  ;;  %v870_v6 = vld [vmem:[%s5752_s1 + $0x20] sm:$0xff]  ;;  %v873_v7 = vld [vmem:[%s5752_s1 + $0x38] sm:$0xff]  ;;  %s3820_s26 = smul.u32 1152, %s690_s30 }
  0xe9   : > { %894 = vperm.xlu1 %2653, %v868_v0   ;;  %884 = vperm.xlu0 %2652, %v866_v1   ;;  %v871_v5 = vld [vmem:[%s5752_s1 + $0x28] sm:$0xff]  ;;  %v872_v8 = vld [vmem:[%s5752_s1 + $0x30] sm:$0xff]  ;;  %v874_v10 = vld [vmem:[%s5752_s1 + $0x40] sm:$0xff]  ;;  %s2334_s8 = smul.u32 (%p3039_p6), 160, %s2824_s15  ;;  %s1498_s28 = ssub.s32 (%p3039_p6), 10, %s1497_s9 }
  0xea   : > { %v875_v9 = vld [vmem:[%s5752_s1 + $0x48] sm:$0xff]  ;;  %v877_v11 = vld [vmem:[%s5752_s1 + $0x58] sm:$0xff]  ;;  %v876_v12 = vld [vmem:[%s5752_s1 + $0x50] sm:$0xff]  ;;  %s3823_s0 = scalar_lea.vmem [#allocation2], %s3820_s26  ;;  %s4525_s12 = scalar_lea.vmem [#allocation3], %s3820_s26  }
  0xeb   : > { %v879_v13 = vld [vmem:[%s5752_s1 + $0x68] sm:$0xff]  ;;  %v878_v14 = vld [vmem:[%s5752_s1 + $0x60] sm:$0xff]  ;;  %v881_v15 = vld [vmem:[%s5752_s1 + $0x78] sm:$0xff]  ;;  %p1499_p3 = scmp.lt.s32.totalorder (%p3039_p6), %s1498_s28, 9  ;;  %s1504_s20 = sadd.s32 (%p3039_p6), %s2334_s8, %s1497_s9 }
  0xec   : > { %v880_v16 = vld [vmem:[%s5752_s1 + $0x70] sm:$0xff]  ;;  %v1107_v17 = vld [vmem:[%s5753_s2 + $0x8] sm:$0xff]  ;;  %v1106_v18 = vld [vmem:[%s5753_s2] sm:$0xff]  ;;  %s2298_s7 = sshll.u32 (%p3039_p6), %s1504_s20, 3 }
  0xed   : > { %899 = vperm.xlu1 %2653, %v869_v3   ;;  %889 = vperm.xlu0 %2652, %v867_v4   ;;  %v1109_v19 = vld [vmem:[%s5753_s2 + $0x18] sm:$0xff]  ;;  %v1108_v20 = vld [vmem:[%s5753_s2 + $0x10] sm:$0xff]  ;;  %v1111_v21 = vld [vmem:[%s5753_s2 + $0x28] sm:$0xff]  ;;  %s5067_s19 = scalar_lea.vmem (%p3039_p6), %s5754_s3, %s2298_s7  }
  0xee   : > { %v1110_v22 = vld [vmem:[%s5753_s2 + $0x20] sm:$0xff]  ;;  %v1113_v23 = vld [vmem:[%s5753_s2 + $0x38] sm:$0xff]  ;;  %v1112_v24 = vld [vmem:[%s5753_s2 + $0x30] sm:$0xff] }
  0xef   : > { %v1115_v25 = vld [vmem:[%s5753_s2 + $0x48] sm:$0xff]  ;;  %v1114_v26 = vld [vmem:[%s5753_s2 + $0x40] sm:$0xff]  ;;  %v1117_v27 = vld [vmem:[%s5753_s2 + $0x58] sm:$0xff] }
  0xf0   : > { %v1116_v28 = vld [vmem:[%s5753_s2 + $0x50] sm:$0xff]  ;;  %v1119_v29 = vld [vmem:[%s5753_s2 + $0x68] sm:$0xff]  ;;  %v1118_v30 = vld [vmem:[%s5753_s2 + $0x60] sm:$0xff] }
  0xf1   : > { %909 = vperm.xlu1 %2653, %v871_v5   ;;  %904 = vperm.xlu0 %2652, %v870_v6   ;;  %v1121_v31 = vld [vmem:[%s5753_s2 + $0x78] sm:$0xff]  ;;  %v1120_v32 = vld [vmem:[%s5753_s2 + $0x70] sm:$0xff]  ;;  %v3832_v35 = vld [vmem:[%s3823_s0 + $0xa0] sm:$0xff] }
  0xf2   : > { %v3826_v33 = vld [vmem:[%s3823_s0 + $0x90] sm:$0xff]  ;;  %v3829_v34 = vld [vmem:[%s3823_s0 + $0x98] sm:$0xff]  ;;  %5875 = vst [vmem:[#allocation7_spill] sm:$0xff] %v3832_v35  ;;  %v3835_v36 = vld [vmem:[%s3823_s0 + $0xa8] sm:$0xff] }
  0xf3   : > { %5874 = vst [vmem:[#allocation6_spill] sm:$0xff] %v3829_v34  ;;  %5876 = vst [vmem:[#allocation8_spill] sm:$0xff] %v3835_v36  ;;  %v3838_v37 = vld [vmem:[%s3823_s0 + $0xb0] sm:$0xff]  ;;  %v3841_v38 = vld [vmem:[%s3823_s0 + $0xb8] sm:$0xff] }
  0xf4   : > { %5877 = vst [vmem:[#allocation9_spill] sm:$0xff] %v3838_v37  ;;  %5878 = vst [vmem:[#allocation10_spill] sm:$0xff] %v3841_v38  ;;  %v3844_v39 = vld [vmem:[%s3823_s0 + $0xc0] sm:$0xff]  ;;  %v3847_v40 = vld [vmem:[%s3823_s0 + $0xc8] sm:$0xff] }
  0xf5   : > { %919 = vperm.xlu1 %2653, %v873_v7   ;;  %914 = vperm.xlu0 %2652, %v872_v8   ;;  %5879 = vst [vmem:[#allocation11_spill] sm:$0xff] %v3844_v39  ;;  %5880 = vst [vmem:[#allocation12_spill] sm:$0xff] %v3847_v40  ;;  %v3850_v41 = vld [vmem:[%s3823_s0 + $0xd0] sm:$0xff]  ;;  %v3853_v42 = vld [vmem:[%s3823_s0] sm:$0xff] }
  0xf6   : > { %5881 = vst [vmem:[#allocation13_spill] sm:$0xff] %v3850_v41  ;;  %v3856_v43 = vld [vmem:[%s3823_s0 + $0x8] sm:$0xff]  ;;  %v3859_v44 = vld [vmem:[%s3823_s0 + $0x10] sm:$0xff]  ;;  %v3862_v45 = vld [vmem:[%s3823_s0 + $0x18] sm:$0xff] }
  0xf7   : > { %v3865_v46 = vld [vmem:[%s3823_s0 + $0x20] sm:$0xff]  ;;  %v3868_v47 = vld [vmem:[%s3823_s0 + $0x28] sm:$0xff]  ;;  %v3871_v48 = vld [vmem:[%s3823_s0 + $0x30] sm:$0xff] }
  0xf8   : > { %v3878_v51 = vld [vmem:[%s3823_s0 + $0x38] sm:$0xff]  ;;  %v3881_v52 = vld [vmem:[%s3823_s0 + $0x40] sm:$0xff]  ;;  %v3898_v59 = vld [vmem:[%s3823_s0 + $0xe8] sm:$0xff] }
  0xf9   : > { %929 = vperm.xlu1 %2653, %v875_v9   ;;  %924 = vperm.xlu0 %2652, %v874_v10   ;;  %v3884_v53 = vld [vmem:[%s3823_s0 + $0xd8] sm:$0xff]  ;;  %v3887_v54 = vld [vmem:[%s3823_s0 + $0xe0] sm:$0xff]  ;;  %v3901_v60 = vld [vmem:[%s3823_s0 + $0xf0] sm:$0xff] }
  0xfa   : > { %v3904_v61 = vld [vmem:[%s3823_s0 + $0xf8] sm:$0xff]  ;;  %v3907_v62 = vld [vmem:[%s3823_s0 + $0x100] sm:$0xff]  ;;  %v3918_v3 = vld [vmem:[%s3823_s0 + $0x108] sm:$0xff] }
  0xfb   : > { %v3921_v4 = vld [vmem:[%s3823_s0 + $0x110] sm:$0xff]  ;;  %v3924_v5 = vld [vmem:[%s3823_s0 + $0x118] sm:$0xff]  ;;  %v3927_v6 = vld [vmem:[%s3823_s0 + $0x48] sm:$0xff] }
  0xfc   : > { %v4002_v63 = vld [vmem:[%s3823_s0 + $0x188] sm:$0xff]  ;;  %v4005_v58 = vld [vmem:[%s3823_s0 + $0x190] sm:$0xff]  ;;  %v4008_v57 = vld [vmem:[%s3823_s0 + $0x198] sm:$0xff] }
  0xfd   : > { %939 = vperm.xlu1 %2653, %v877_v11   ;;  %934 = vperm.xlu0 %2652, %v876_v12   ;;  %v3938_v11 = vld [vmem:[%s3823_s0 + $0x50] sm:$0xff]  ;;  %v3941_v12 = vld [vmem:[%s3823_s0 + $0x58] sm:$0xff]  ;;  %5886 = vst [vmem:[#allocation18_spill] sm:$0xff] %v4002_v63  ;;  %5887 = vst [vmem:[#allocation19_spill] sm:$0xff] %v4005_v58 }
  0xfe   : > { %5888 = vst [vmem:[#allocation20_spill] sm:$0xff] %v4008_v57  ;;  %v4011_v56 = vld [vmem:[%s3823_s0 + $0x1a0] sm:$0xff]  ;;  %v4022_v7 = vld [vmem:[%s3823_s0 + $0x1a8] sm:$0xff]  ;;  %v4055_v9 = vld [vmem:[%s3823_s0 + $0x150] sm:$0xff] }
  0xff   : > { %5889 = vst [vmem:[#allocation21_spill] sm:$0xff] %v4011_v56  ;;  %5890 = vst [vmem:[#allocation22_spill] sm:$0xff] %v4022_v7  ;;  %v4052_v10 = vld [vmem:[%s3823_s0 + $0x148] sm:$0xff]  ;;  %v4066_v1 = vld [vmem:[%s3823_s0 + $0x158] sm:$0xff] }
 0x100   : > { %5898 = vst [vmem:[#allocation30_spill] sm:$0xff] %v4052_v10  ;;  %5899 = vst [vmem:[#allocation31_spill] sm:$0xff] %v4055_v9  ;;  %v4069_v2 = vld [vmem:[%s3823_s0 + $0x160] sm:$0xff]  ;;  %v4072_v41 = vld [vmem:[%s3823_s0 + $0x1f8] sm:$0xff] }
 0x101   : > { %949 = vperm.xlu1 %2653, %v879_v13   ;;  %944 = vperm.xlu0 %2652, %v878_v14   ;;  %v3944_v13 = vld [vmem:[%s3823_s0 + $0x60] sm:$0xff]  ;;  %v3947_v14 = vld [vmem:[%s3823_s0 + $0x68] sm:$0xff]  ;;  %5900 = vst [vmem:[#allocation32_spill] sm:$0xff] %v4066_v1  ;;  %5901 = vst [vmem:[#allocation33_spill] sm:$0xff] %v4069_v2 }
 0x102   : > { %5902 = vst [vmem:[#allocation34_spill] sm:$0xff] %v4072_v41  ;;  %v4075_v40 = vld [vmem:[%s3823_s0 + $0x200] sm:$0xff]  ;;  %v4086_v39 = vld [vmem:[%s3823_s0 + $0x208] sm:$0xff]  ;;  %v4089_v38 = vld [vmem:[%s3823_s0 + $0x210] sm:$0xff] }
 0x103   : > { %5903 = vst [vmem:[#allocation35_spill] sm:$0xff] %v4075_v40  ;;  %5904 = vst [vmem:[#allocation36_spill] sm:$0xff] %v4086_v39  ;;  %v4092_v37 = vld [vmem:[%s3823_s0 + $0x218] sm:$0xff]  ;;  %v4095_v36 = vld [vmem:[%s3823_s0 + $0x220] sm:$0xff] }
 0x104   : > { %5905 = vst [vmem:[#allocation37_spill] sm:$0xff] %v4089_v38  ;;  %5906 = vst [vmem:[#allocation38_spill] sm:$0xff] %v4092_v37  ;;  %v4130_v58 = vld [vmem:[%s3823_s0 + $0x1b8] sm:$0xff]  ;;  %v4133_v63 = vld [vmem:[%s3823_s0 + $0x1c0] sm:$0xff] }
 0x105   : > { %959 = vperm.xlu1 %2653, %v881_v15   ;;  %954 = vperm.xlu0 %2652, %v880_v16   ;;  %v4046_v16 = vld [vmem:[%s3823_s0 + $0x138] sm:$0xff]  ;;  %v4049_v15 = vld [vmem:[%s3823_s0 + $0x140] sm:$0xff]  ;;  %5907 = vst [vmem:[#allocation39_spill] sm:$0xff] %v4095_v36  ;;  %5914 = vst [vmem:[#allocation46_spill] sm:$0xff] %v4130_v58 }
 0x106   : > { %5896 = vst [vmem:[#allocation28_spill] sm:$0xff] %v4046_v16  ;;  %5897 = vst [vmem:[#allocation29_spill] sm:$0xff] %v4049_v15  ;;  %v4136_v0 = vld [vmem:[%s3823_s0 + $0x1c8] sm:$0xff]  ;;  %v4139_v8 = vld [vmem:[%s3823_s0 + $0x1d0] sm:$0xff] }
 0x107   : > { %5915 = vst [vmem:[#allocation47_spill] sm:$0xff] %v4133_v63  ;;  %5916 = vst [vmem:[#allocation48_spill] sm:$0xff] %v4136_v0  ;;  %v4153_v7 = vld [vmem:[%s3823_s0 + $0x1e0] sm:$0xff]  ;;  %v4159_v35 = vld [vmem:[%s3823_s0 + $0x1f0] sm:$0xff] }
 0x108   : > { %5917 = vst [vmem:[#allocation49_spill] sm:$0xff] %v4139_v8  ;;  %5919 = vst [vmem:[#allocation51_spill] sm:$0xff] %v4153_v7  ;;  %v4170_v9 = vld [vmem:[%s3823_s0 + $0x288] sm:$0xff]  ;;  %v4173_v10 = vld [vmem:[%s3823_s0 + $0x290] sm:$0xff] }
 0x109   : > { %1129 = vperm.xlu1 %2653, %v1107_v17   ;;  %1124 = vperm.xlu0 %2652, %v1106_v18   ;;  %5921 = vst [vmem:[#allocation53_spill] sm:$0xff] %v4159_v35  ;;  %5922 = vst [vmem:[#allocation54_spill] sm:$0xff] %v4170_v9  ;;  %v4176_v15 = vld [vmem:[%s3823_s0 + $0x298] sm:$0xff]  ;;  %v4179_v16 = vld [vmem:[%s3823_s0 + $0x2a0] sm:$0xff] }
 0x10a   : > { %5923 = vst [vmem:[#allocation55_spill] sm:$0xff] %v4173_v10  ;;  %5924 = vst [vmem:[#allocation56_spill] sm:$0xff] %v4176_v15  ;;  %v4190_v40 = vld [vmem:[%s3823_s0 + $0x2a8] sm:$0xff]  ;;  %v4193_v41 = vld [vmem:[%s3823_s0 + $0x2b0] sm:$0xff] }
 0x10b   : > { %5925 = vst [vmem:[#allocation57_spill] sm:$0xff] %v4179_v16  ;;  %5926 = vst [vmem:[#allocation58_spill] sm:$0xff] %v4190_v40  ;;  %v4196_v2 = vld [vmem:[%s3823_s0 + $0x2b8] sm:$0xff]  ;;  %v4199_v1 = vld [vmem:[%s3823_s0 + $0x2c0] sm:$0xff] }
 0x10c   : > { %5927 = vst [vmem:[#allocation59_spill] sm:$0xff] %v4193_v41  ;;  %5928 = vst [vmem:[#allocation60_spill] sm:$0xff] %v4196_v2  ;;  %v4212_v37 = vld [vmem:[%s3823_s0 + $0x2c8] sm:$0xff]  ;;  %v4217_v39 = vld [vmem:[%s3823_s0 + $0x240] sm:$0xff] }
 0x10d   : > { %1139 = vperm.xlu1 %2653, %v1109_v19   ;;  %1134 = vperm.xlu0 %2652, %v1108_v20   ;;  %5929 = vst [vmem:[#allocation61_spill] sm:$0xff] %v4199_v1  ;;  %5930 = vst [vmem:[#allocation62_spill] sm:$0xff] %v4217_v39  ;;  %v4223_v55 = vld [vmem:[%s3823_s0 + $0x250] sm:$0xff]  ;;  %v4254_v8 = vld [vmem:[%s3823_s0 + $0x278] sm:$0xff] }
 0x10e   : > { %5932 = vst [vmem:[#allocation64_spill] sm:$0xff] %v4223_v55  ;;  %5936 = vst [vmem:[#allocation68_spill] sm:$0xff] %v4254_v8  ;;  %v4257_v0 = vld [vmem:[%s3823_s0 + $0x280] sm:$0xff]  ;;  %v4260_v63 = vld [vmem:[%s3823_s0 + $0x318] sm:$0xff] }
 0x10f   : > { %5937 = vst [vmem:[#allocation69_spill] sm:$0xff] %v4257_v0  ;;  %5938 = vst [vmem:[#allocation70_spill] sm:$0xff] %v4260_v63  ;;  %v4263_v58 = vld [vmem:[%s3823_s0 + $0x320] sm:$0xff]  ;;  %v4274_v35 = vld [vmem:[%s3823_s0 + $0x328] sm:$0xff] }
 0x110   : > { %5939 = vst [vmem:[#allocation71_spill] sm:$0xff] %v4263_v58  ;;  %5940 = vst [vmem:[#allocation72_spill] sm:$0xff] %v4274_v35  ;;  %v4280_v7 = vld [vmem:[%s3823_s0 + $0x338] sm:$0xff]  ;;  %v4296_v15 = vld [vmem:[%s3823_s0 + $0x348] sm:$0xff] }
 0x111   : > { %1149 = vperm.xlu1 %2653, %v1111_v21   ;;  %1144 = vperm.xlu0 %2652, %v1110_v22   ;;  %v3962_v21 = vld [vmem:[%s3823_s0 + $0x70] sm:$0xff]  ;;  %v3965_v22 = vld [vmem:[%s3823_s0 + $0x78] sm:$0xff]  ;;  %5942 = vst [vmem:[#allocation74_spill] sm:$0xff] %v4280_v7  ;;  %v4321_v40 = vld [vmem:[%s3823_s0 + $0x2e0] sm:$0xff] }
 0x112   : > { %v4299_v10 = vld [vmem:[%s3823_s0 + $0x350] sm:$0xff]  ;;  %v4302_v9 = vld [vmem:[%s3823_s0 + $0x358] sm:$0xff]  ;;  %5948 = vst [vmem:[#allocation80_spill] sm:$0xff] %v4321_v40  ;;  %v4344_v39 = vld [vmem:[%s3823_s0 + $0x308] sm:$0xff] }
 0x113   : > { %5944 = vst [vmem:[#allocation76_spill] sm:$0xff] %v4299_v10  ;;  %5945 = vst [vmem:[#allocation77_spill] sm:$0xff] %v4302_v9  ;;  %v4318_v41 = vld [vmem:[%s3823_s0 + $0x2d8] sm:$0xff]  ;;  %v4327_v34 = vld [vmem:[%s3823_s0 + $0x2f0] sm:$0xff] }
 0x114   : > { %5947 = vst [vmem:[#allocation79_spill] sm:$0xff] %v4318_v41  ;;  %5950 = vst [vmem:[#allocation82_spill] sm:$0xff] %v4327_v34  ;;  %v4338_v55 = vld [vmem:[%s3823_s0 + $0x2f8] sm:$0xff]  ;;  %v4377_v0 = vld [vmem:[%s3823_s0 + $0x3c0] sm:$0xff] }
 0x115   : > { %1159 = vperm.xlu1 %2653, %v1113_v23   ;;  %1154 = vperm.xlu0 %2652, %v1112_v24   ;;  %v3968_v23 = vld [vmem:[%s3823_s0 + $0x80] sm:$0xff]  ;;  %v3971_v24 = vld [vmem:[%s3823_s0 + $0x88] sm:$0xff]  ;;  %5951 = vst [vmem:[#allocation83_spill] sm:$0xff] %v4338_v55  ;;  %5953 = vst [vmem:[#allocation85_spill] sm:$0xff] %v4344_v39 }
 0x116   : > { %v4374_v63 = vld [vmem:[%s3823_s0 + $0x3b8] sm:$0xff]  ;;  %5957 = vst [vmem:[#allocation89_spill] sm:$0xff] %v4377_v0  ;;  %v4380_v8 = vld [vmem:[%s3823_s0 + $0x3c8] sm:$0xff]  ;;  %v4393_v7 = vld [vmem:[%s3823_s0 + $0x3d0] sm:$0xff] }
 0x117   : > { %5956 = vst [vmem:[#allocation88_spill] sm:$0xff] %v4374_v63  ;;  %v4399_v35 = vld [vmem:[%s3823_s0 + $0x3e0] sm:$0xff]  ;;  %v4416_v10 = vld [vmem:[%s3823_s0 + $0x368] sm:$0xff]  ;;  %v4427_v34 = vld [vmem:[%s3823_s0 + $0x370] sm:$0xff] }
 0x118   : > { %5959 = vst [vmem:[#allocation91_spill] sm:$0xff] %v4399_v35  ;;  %v4413_v9 = vld [vmem:[%s3823_s0 + $0x360] sm:$0xff]  ;;  %5960 = vst [vmem:[#allocation92_spill] sm:$0xff] %v4427_v34  ;;  %v4447_v39 = vld [vmem:[%s3823_s0 + $0x390] sm:$0xff] }
 0x119   : > { %1169 = vperm.xlu1 %2653, %v1115_v25   ;;  %1164 = vperm.xlu0 %2652, %v1114_v26   ;;  %v4031_v26 = vld [vmem:[%s3823_s0 + $0x130] sm:$0xff]  ;;  %v4433_v40 = vld [vmem:[%s3823_s0 + $0x380] sm:$0xff]  ;;  %5962 = vst [vmem:[#allocation94_spill] sm:$0xff] %v4447_v39  ;;  %v4468_v63 = vld [vmem:[%s3823_s0 + $0x438] sm:$0xff] }
 0x11a   : > { %5893 = vst [vmem:[#allocation25_spill] sm:$0xff] %v4031_v26  ;;  %v4307_v26 = vld [vmem:[%s3823_s0 + $0x2d0] sm:$0xff]  ;;  %v4465_v0 = vld [vmem:[%s3823_s0 + $0x3a0] sm:$0xff] }
 0x11b   : > { %5946 = vst [vmem:[#allocation78_spill] sm:$0xff] %v4307_v26  ;;  %v4410_v26 = vld [vmem:[%s3823_s0 + $0x3e8] sm:$0xff]  ;;  %5965 = vst [vmem:[#allocation97_spill] sm:$0xff] %v4465_v0 }
 0x11d   : > { %1179 = vperm.xlu1 %2653, %v1117_v27   ;;  %1174 = vperm.xlu0 %2652, %v1116_v28   ;;  %v4025_v28 = vld [vmem:[%s3823_s0 + $0x120] sm:$0xff]  ;;  %v4028_v27 = vld [vmem:[%s3823_s0 + $0x128] sm:$0xff] }
 0x11e   : > { %5891 = vst [vmem:[#allocation23_spill] sm:$0xff] %v4025_v28  ;;  %5892 = vst [vmem:[#allocation24_spill] sm:$0xff] %v4028_v27  ;;  %v4150_v28 = vld [vmem:[%s3823_s0 + $0x1d8] sm:$0xff]  ;;  %v4220_v27 = vld [vmem:[%s3823_s0 + $0x248] sm:$0xff] }
 0x11f   : > { %5918 = vst [vmem:[#allocation50_spill] sm:$0xff] %v4150_v28  ;;  %5931 = vst [vmem:[#allocation63_spill] sm:$0xff] %v4220_v27  ;;  %v4283_v28 = vld [vmem:[%s3823_s0 + $0x340] sm:$0xff] }
 0x120   : > { %5943 = vst [vmem:[#allocation75_spill] sm:$0xff] %v4283_v28  ;;  %v4341_v27 = vld [vmem:[%s3823_s0 + $0x300] sm:$0xff] }
 0x121   : > { %1189 = vperm.xlu1 %2653, %v1119_v29   ;;  %1184 = vperm.xlu0 %2652, %v1118_v30   ;;  %v3982_v29 = vld [vmem:[%s3823_s0 + $0x168] sm:$0xff]  ;;  %v3985_v30 = vld [vmem:[%s3823_s0 + $0x170] sm:$0xff]  ;;  %5952 = vst [vmem:[#allocation84_spill] sm:$0xff] %v4341_v27  ;;  %v4450_v27 = vld [vmem:[%s3823_s0 + $0x398] sm:$0xff] }
 0x122   : > { %5882 = vst [vmem:[#allocation14_spill] sm:$0xff] %v3982_v29  ;;  %5883 = vst [vmem:[#allocation15_spill] sm:$0xff] %v3985_v30  ;;  %v4112_v30 = vld [vmem:[%s3823_s0 + $0x238] sm:$0xff]  ;;  %v4115_v29 = vld [vmem:[%s3823_s0 + $0x1b0] sm:$0xff] }
 0x123   : > { %5910 = vst [vmem:[#allocation42_spill] sm:$0xff] %v4112_v30  ;;  %5911 = vst [vmem:[#allocation43_spill] sm:$0xff] %v4115_v29 }
 0x124   : > { %5963 = vst [vmem:[#allocation95_spill] sm:$0xff] %v4450_v27 }
 0x125   : > { %1199 = vperm.xlu1 %2653, %v1121_v31   ;;  %1194 = vperm.xlu0 %2652, %v1120_v32   ;;  %v3988_v31 = vld [vmem:[%s3823_s0 + $0x178] sm:$0xff]  ;;  %v3991_v32 = vld [vmem:[%s3823_s0 + $0x180] sm:$0xff] }
 0x126   : > { %5884 = vst [vmem:[#allocation16_spill] sm:$0xff] %v3988_v31  ;;  %5885 = vst [vmem:[#allocation17_spill] sm:$0xff] %v3991_v32  ;;  %v4106_v32 = vld [vmem:[%s3823_s0 + $0x228] sm:$0xff]  ;;  %v4109_v31 = vld [vmem:[%s3823_s0 + $0x230] sm:$0xff] }
 0x127   : > { %5908 = vst [vmem:[#allocation40_spill] sm:$0xff] %v4106_v32  ;;  %5909 = vst [vmem:[#allocation41_spill] sm:$0xff] %v4109_v31  ;;  %v4234_v31 = vld [vmem:[%s3823_s0 + $0x258] sm:$0xff]  ;;  %v4237_v32 = vld [vmem:[%s3823_s0 + $0x260] sm:$0xff] }
 0x128   : > { %5933 = vst [vmem:[#allocation65_spill] sm:$0xff] %v4237_v32  ;;  %v4361_v32 = vld [vmem:[%s3823_s0 + $0x3b0] sm:$0xff] }
 0x129   : > { %5955 = vst [vmem:[#allocation87_spill] sm:$0xff] %v4361_v32  ;;  %v4471_v32 = vld [vmem:[%s3823_s0 + $0x440] sm:$0xff] }
 0x168   : > { %v3873_v49 = vpop.permute.xlu1 %894  ;;  %v3875_v50 = vpop.permute.xlu0 %884 }
 0x16c   : > { %v3957_v19 = vpop.permute.xlu1 %899  ;;  %v3959_v20 = vpop.permute.xlu0 %889 }
 0x16d   : > { %v5968_v1 = vsub.f32 %v3941_v12, %v3959_v20  ;;  %v5969_v0 = vsub.f32 %v3944_v13, %v3959_v20  ;;  %v5970_v28 = vsub.f32 %v3947_v14, %v3959_v20  ;;  %v5973_v12 = vsub.f32 %v3968_v23, %v3959_v20 }
 0x16e   : > { %v5974_v13 = vsub.f32 %v3971_v24, %v3959_v20  ;;  %v5975_v14 = vsub.f32 %v3853_v42, %v3875_v50  ;;  %v5977_v23 = vsub.f32 %v3859_v44, %v3875_v50  ;;  %v5980_v44 = vsub.f32 %v3868_v47, %v3875_v50 }
 0x16f   : > { %v5984_v47 = vsub.f32 %v3884_v53, %v3957_v19 }
 0x170   : > { %v4041_v18 = vpop.permute.xlu1 %909  ;;  %v4043_v17 = vpop.permute.xlu0 %904 }
 0x171   : > { %5894 = vst [vmem:[#allocation26_spill] sm:$0xff] %v4041_v18  ;;  %5895 = vst [vmem:[#allocation27_spill] sm:$0xff] %v4043_v17  ;;  %v4156_v18 = vld [vmem:[%s3823_s0 + $0x1e8] sm:$0xff]  ;;  %v4243_v17 = vld [vmem:[%s3823_s0 + $0x270] sm:$0xff] }
 0x172   : > { %5920 = vst [vmem:[#allocation52_spill] sm:$0xff] %v4156_v18  ;;  %5935 = vst [vmem:[#allocation67_spill] sm:$0xff] %v4243_v17  ;;  %v4277_v18 = vld [vmem:[%s3823_s0 + $0x330] sm:$0xff] }
 0x173   : > { %5941 = vst [vmem:[#allocation73_spill] sm:$0xff] %v4277_v18  ;;  %v4355_v17 = vld [vmem:[%s3823_s0 + $0x310] sm:$0xff]  ;;  %v4396_v18 = vld [vmem:[%s3823_s0 + $0x3d8] sm:$0xff] }
 0x174   : > { %v4125_v56 = vpop.permute.xlu1 %919  ;;  %v4127_v57 = vpop.permute.xlu0 %914  ;;  %5954 = vst [vmem:[#allocation86_spill] sm:$0xff] %v4355_v17  ;;  %5958 = vst [vmem:[#allocation90_spill] sm:$0xff] %v4396_v18  ;;  %v4444_v17 = vld [vmem:[%s3823_s0 + $0x388] sm:$0xff]  ;;  %v5966_v18 = vsub.f32 %v3927_v6, %v3959_v20  ;;  %v5971_v6 = vsub.f32 %v3962_v21, %v3959_v20  ;;  %v5976_v21 = vsub.f32 %v3856_v43, %v3875_v50 }
 0x175   : > { %5912 = vst [vmem:[#allocation44_spill] sm:$0xff] %v4125_v56  ;;  %5913 = vst [vmem:[#allocation45_spill] sm:$0xff] %v4127_v57  ;;  %v4240_v56 = vld [vmem:[%s3823_s0 + $0x268] sm:$0xff]  ;;  %v5979_v43 = vsub.f32 %v3865_v46, %v3875_v50  ;;  %v5983_v46 = vsub.f32 %v3881_v52, %v3875_v50  ;;  %v5987_v52 = vsub.f32 %v3901_v60, %v3957_v19 }
 0x176   : > { %5934 = vst [vmem:[#allocation66_spill] sm:$0xff] %v4240_v56  ;;  %v4324_v57 = vld [vmem:[%s3823_s0 + $0x2e8] sm:$0xff]  ;;  %5961 = vst [vmem:[#allocation93_spill] sm:$0xff] %v4444_v17 }
 0x177   : > { %5949 = vst [vmem:[#allocation81_spill] sm:$0xff] %v4324_v57  ;;  %v4358_v56 = vld [vmem:[%s3823_s0 + $0x3a8] sm:$0xff]  ;;  %v4430_v57 = vld [vmem:[%s3823_s0 + $0x378] sm:$0xff] }
 0x178   : > { %v4209_v36 = vpop.permute.xlu1 %929  ;;  %v4214_v38 = vpop.permute.xlu0 %924 }
 0x17c   : > { %v4293_v16 = vpop.permute.xlu1 %939  ;;  %v4304_v30 = vpop.permute.xlu0 %934 }
 0x180   : > { %v4371_v58 = vpop.permute.xlu1 %949  ;;  %v4382_v29 = vpop.permute.xlu0 %944 }
 0x184   : > { %v4452_v55 = vpop.permute.xlu1 %959  ;;  %v4454_v41 = vpop.permute.xlu0 %954 }
 0x185   : > { %5964 = vst [vmem:[#allocation96_spill] sm:$0xff] %v4454_v41  ;;  %v5967_v41 = vsub.f32 %v3938_v11, %v3959_v20  ;;  %v5972_v11 = vsub.f32 %v3965_v22, %v3959_v20 }
 0x188   : > { %v1130_v25 = vpop.permute.xlu1 %1129  ;;  %v1125_v34 = vpop.permute.xlu0 %1124 }
 0x189   : > { %v1211_v17 = vmul.f32 %v1130_v25, %v5966_v18  ;;  %v1212_v39 = vmul.f32 %v1130_v25, %v5967_v41  ;;  %v1213_v2 = vmul.f32 %v1130_v25, %v5968_v1  ;;  %v1214_v27 = vmul.f32 %v1130_v25, %v5969_v0 }
 0x18a   : > { %v1215_v35 = vmul.f32 %v1130_v25, %v5970_v28  ;;  %v1216_v18 = vmul.f32 %v1130_v25, %v5971_v6  ;;  %v1217_v41 = vmul.f32 %v1130_v25, %v5972_v11  ;;  %v1218_v1 = vmul.f32 %v1130_v25, %v5973_v12 }
 0x18b   : > { %v1219_v0 = vmul.f32 %v1130_v25, %v5974_v13  ;;  %1355 = vst [vmem:[%s4525_s12 + $0x48] sm:$0xff] %v1211_v17  ;;  %1356 = vst [vmem:[%s4525_s12 + $0x50] sm:$0xff] %v1212_v39  ;;  %v1202_v20 = vmul.f32 %v1125_v34, %v5975_v14  ;;  %v1203_v22 = vmul.f32 %v1125_v34, %v5976_v21 }
 0x18c   : > { %1357 = vst [vmem:[%s4525_s12 + $0x58] sm:$0xff] %v1213_v2  ;;  %1358 = vst [vmem:[%s4525_s12 + $0x60] sm:$0xff] %v1214_v27  ;;  %v1204_v24 = vmul.f32 %v1125_v34, %v5977_v23  ;;  %v5978_v39 = vsub.f32 %v3862_v45, %v3875_v50  ;;  %v1206_v2 = vmul.f32 %v1125_v34, %v5979_v43  ;;  %v1140_v27 = vpop.permute.xlu1 %1139  ;;  %v1135_v28 = vpop.permute.xlu0 %1134  ;;  %v5998_v23 = vld [vmem:[#allocation8_spill] sm:$0xff] }
 0x18d   : > { %1359 = vst [vmem:[%s4525_s12 + $0x68] sm:$0xff] %v1215_v35  ;;  %1360 = vst [vmem:[%s4525_s12 + $0x70] sm:$0xff] %v1216_v18  ;;  %v1207_v17 = vmul.f32 %v1125_v34, %v5980_v44  ;;  %v5981_v35 = vsub.f32 %v3871_v48, %v3875_v50  ;;  %v5982_v45 = vsub.f32 %v3878_v51, %v3875_v50 }
 0x18e   : > { %1361 = vst [vmem:[%s4525_s12 + $0x78] sm:$0xff] %v1217_v41  ;;  %1362 = vst [vmem:[%s4525_s12 + $0x80] sm:$0xff] %v1218_v1  ;;  %v1205_v42 = vmul.f32 %v1125_v34, %v5978_v39  ;;  %v1210_v18 = vmul.f32 %v1125_v34, %v5983_v46  ;;  %v1229_v48 = vmul.f32 %v1140_v27, %v5984_v47  ;;  %v6000_v39 = vld [vmem:[#allocation9_spill] sm:$0xff]  ;;  %v6006_v46 = vld [vmem:[#allocation12_spill] sm:$0xff] }
 0x18f   : > { %v1208_v25 = vmul.f32 %v1125_v34, %v5981_v35  ;;  %1363 = vst [vmem:[%s4525_s12 + $0x88] sm:$0xff] %v1219_v0  ;;  %v1209_v6 = vmul.f32 %v1125_v34, %v5982_v45  ;;  %1346 = vst [vmem:[%s4525_s12] sm:$0xff] %v1202_v20  ;;  %v5985_v11 = vsub.f32 %v3887_v54, %v3957_v19 }
 0x190   : > { %1347 = vst [vmem:[%s4525_s12 + $0x8] sm:$0xff] %v1203_v22  ;;  %1348 = vst [vmem:[%s4525_s12 + $0x10] sm:$0xff] %v1204_v24  ;;  %v5986_v34 = vsub.f32 %v3898_v59, %v3957_v19  ;;  %v1232_v53 = vmul.f32 %v1140_v27, %v5987_v52  ;;  %v5988_v54 = vsub.f32 %v3904_v61, %v3957_v19  ;;  %v1145_v44 = vpop.permute.xlu0 %1144 }
 0x191   : > { %v1230_v51 = vmul.f32 %v1140_v27, %v5985_v11  ;;  %1349 = vst [vmem:[%s4525_s12 + $0x18] sm:$0xff] %v1205_v42  ;;  %1350 = vst [vmem:[%s4525_s12 + $0x20] sm:$0xff] %v1206_v2  ;;  %v5989_v12 = vsub.f32 %v3907_v62, %v3957_v19  ;;  %v5990_v13 = vsub.f32 %v3918_v3, %v3957_v19  ;;  %v5994_v3 = vld [vmem:[#allocation6_spill] sm:$0xff]  ;;  %v1150_v2 = vpop.permute.xlu1 %1149 }
 0x192   : > { %1351 = vst [vmem:[%s4525_s12 + $0x28] sm:$0xff] %v1207_v17  ;;  %1352 = vst [vmem:[%s4525_s12 + $0x30] sm:$0xff] %v1208_v25  ;;  %v1231_v50 = vmul.f32 %v1140_v27, %v5986_v34  ;;  %v1233_v41 = vmul.f32 %v1140_v27, %v5988_v54  ;;  %v5991_v0 = vsub.f32 %v3921_v4, %v3957_v19  ;;  %v6002_v17 = vld [vmem:[#allocation10_spill] sm:$0xff]  ;;  %v6013_v54 = vld [vmem:[#allocation15_spill] sm:$0xff] }
 0x193   : > { %v1234_v1 = vmul.f32 %v1140_v27, %v5989_v12  ;;  %1353 = vst [vmem:[%s4525_s12 + $0x38] sm:$0xff] %v1209_v6  ;;  %1354 = vst [vmem:[%s4525_s12 + $0x40] sm:$0xff] %v1210_v18  ;;  %v1235_v59 = vmul.f32 %v1140_v27, %v5990_v13  ;;  %v5992_v14 = vsub.f32 %v3924_v5, %v3957_v19  ;;  %v5996_v19 = vld [vmem:[#allocation7_spill] sm:$0xff]  ;;  %v6010_v34 = vld [vmem:[#allocation14_spill] sm:$0xff] }
 0x194   : > { %v1236_v60 = vmul.f32 %v1140_v27, %v5991_v0  ;;  %1373 = vst [vmem:[%s4525_s12 + $0xd8] sm:$0xff] %v1229_v48  ;;  %1374 = vst [vmem:[%s4525_s12 + $0xe0] sm:$0xff] %v1230_v51  ;;  %v5993_v62 = vsub.f32 %v3826_v33, %v3873_v49  ;;  %v5995_v4 = vsub.f32 %v5994_v3, %v3873_v49  ;;  %v6008_v48 = vld [vmem:[#allocation13_spill] sm:$0xff] }
 0x195   : > { %v1237_v61 = vmul.f32 %v1140_v27, %v5992_v14  ;;  %1375 = vst [vmem:[%s4525_s12 + $0xe8] sm:$0xff] %v1231_v50  ;;  %1376 = vst [vmem:[%s4525_s12 + $0xf0] sm:$0xff] %v1232_v53  ;;  %v5997_v21 = vsub.f32 %v5996_v19, %v3873_v49  ;;  %v5999_v33 = vsub.f32 %v5998_v23, %v3873_v49  ;;  %v6004_v27 = vld [vmem:[#allocation11_spill] sm:$0xff]  ;;  %v6011_v50 = vld [vmem:[#allocation26_spill] sm:$0xff] }
 0x196   : > { %v1220_v20 = vmul.f32 %v1135_v28, %v5993_v62  ;;  %1377 = vst [vmem:[%s4525_s12 + $0xf8] sm:$0xff] %v1233_v41  ;;  %1378 = vst [vmem:[%s4525_s12 + $0x100] sm:$0xff] %v1234_v1  ;;  %v1221_v5 = vmul.f32 %v1135_v28, %v5995_v4  ;;  %v6001_v42 = vsub.f32 %v6000_v39, %v3873_v49  ;;  %v6015_v1 = vld [vmem:[#allocation16_spill] sm:$0xff]  ;;  %v6017_v13 = vld [vmem:[#allocation17_spill] sm:$0xff] }
 0x197   : > { %v1222_v22 = vmul.f32 %v1135_v28, %v5997_v21  ;;  %v1223_v24 = vmul.f32 %v1135_v28, %v5999_v33  ;;  %1379 = vst [vmem:[%s4525_s12 + $0x108] sm:$0xff] %v1235_v59  ;;  %1380 = vst [vmem:[%s4525_s12 + $0x110] sm:$0xff] %v1236_v60  ;;  %v6003_v35 = vsub.f32 %v6002_v17, %v3873_v49  ;;  %v6019_v60 = vld [vmem:[#allocation18_spill] sm:$0xff]  ;;  %v6021_v62 = vld [vmem:[#allocation19_spill] sm:$0xff] }
 0x198   : > { %v1224_v43 = vmul.f32 %v1135_v28, %v6001_v42  ;;  %1381 = vst [vmem:[%s4525_s12 + $0x118] sm:$0xff] %v1237_v61  ;;  %v6005_v45 = vsub.f32 %v6004_v27, %v3873_v49  ;;  %v6007_v18 = vsub.f32 %v6006_v46, %v3873_v49  ;;  %v6009_v11 = vsub.f32 %v6008_v48, %v3873_v49  ;;  %v6023_v4 = vld [vmem:[#allocation20_spill] sm:$0xff]  ;;  %v6025_v21 = vld [vmem:[#allocation21_spill] sm:$0xff]  ;;  %v6027_v33 = vld [vmem:[#allocation22_spill] sm:$0xff] }
 0x199   : > { %v1225_v25 = vmul.f32 %v1135_v28, %v6003_v35  ;;  %1364 = vst [vmem:[%s4525_s12 + $0x90] sm:$0xff] %v1220_v20  ;;  %1365 = vst [vmem:[%s4525_s12 + $0x98] sm:$0xff] %v1221_v5  ;;  %v6012_v52 = vsub.f32 %v6010_v34, %v6011_v50  ;;  %v6014_v41 = vsub.f32 %v6013_v54, %v6011_v50  ;;  %v6029_v42 = vld [vmem:[#allocation23_spill] sm:$0xff]  ;;  %v6036_v48 = vld [vmem:[#allocation28_spill] sm:$0xff] }
 0x19a   : > { %v1226_v6 = vmul.f32 %v1135_v28, %v6005_v45  ;;  %v1227_v47 = vmul.f32 %v1135_v28, %v6007_v18  ;;  %v1228_v51 = vmul.f32 %v1135_v28, %v6009_v11  ;;  %1366 = vst [vmem:[%s4525_s12 + $0xa0] sm:$0xff] %v1222_v22  ;;  %1367 = vst [vmem:[%s4525_s12 + $0xa8] sm:$0xff] %v1223_v24  ;;  %v6038_v34 = vld [vmem:[#allocation29_spill] sm:$0xff] }
 0x19b   : > { %1368 = vst [vmem:[%s4525_s12 + $0xb0] sm:$0xff] %v1224_v43  ;;  %v1247_v53 = vmul.f32 %v1150_v2, %v6012_v52  ;;  %v1248_v12 = vmul.f32 %v1150_v2, %v6014_v41  ;;  %v6016_v49 = vsub.f32 %v6015_v1, %v6011_v50  ;;  %v6018_v59 = vsub.f32 %v6017_v13, %v6011_v50  ;;  %v6030_v43 = vld [vmem:[#allocation27_spill] sm:$0xff] }
 0x19c   : > { %1369 = vst [vmem:[%s4525_s12 + $0xb8] sm:$0xff] %v1225_v25  ;;  %1370 = vst [vmem:[%s4525_s12 + $0xc0] sm:$0xff] %v1226_v6  ;;  %v6020_v14 = vsub.f32 %v6019_v60, %v6011_v50  ;;  %v6022_v20 = vsub.f32 %v6021_v62, %v6011_v50  ;;  %v6024_v5 = vsub.f32 %v6023_v4, %v6011_v50  ;;  %v6032_v25 = vld [vmem:[#allocation24_spill] sm:$0xff]  ;;  %v6034_v6 = vld [vmem:[#allocation25_spill] sm:$0xff] }
 0x19d   : > { %v1249_v28 = vmul.f32 %v1150_v2, %v6016_v49  ;;  %v1250_v0 = vmul.f32 %v1150_v2, %v6018_v59  ;;  %1371 = vst [vmem:[%s4525_s12 + $0xc8] sm:$0xff] %v1227_v47  ;;  %1372 = vst [vmem:[%s4525_s12 + $0xd0] sm:$0xff] %v1228_v51  ;;  %v6026_v22 = vsub.f32 %v6025_v21, %v6011_v50  ;;  %v1155_v47 = vpop.permute.xlu0 %1154  ;;  %v6049_v62 = vld [vmem:[#allocation44_spill] sm:$0xff]  ;;  %v6051_v4 = vld [vmem:[#allocation35_spill] sm:$0xff] }
 0x19e   : > { %v1251_v61 = vmul.f32 %v1150_v2, %v6020_v14  ;;  %v1252_v3 = vmul.f32 %v1150_v2, %v6022_v20  ;;  %v1253_v19 = vmul.f32 %v1150_v2, %v6024_v5  ;;  %v6028_v24 = vsub.f32 %v6027_v33, %v6011_v50  ;;  %1391 = vst [vmem:[%s4525_s12 + $0x168] sm:$0xff] %v1247_v53  ;;  %v6040_v53 = vld [vmem:[#allocation30_spill] sm:$0xff]  ;;  %v6053_v21 = vld [vmem:[#allocation36_spill] sm:$0xff] }
 0x19f   : > { %v1254_v23 = vmul.f32 %v1150_v2, %v6026_v22  ;;  %1392 = vst [vmem:[%s4525_s12 + $0x170] sm:$0xff] %v1248_v12  ;;  %1393 = vst [vmem:[%s4525_s12 + $0x178] sm:$0xff] %v1249_v28  ;;  %v6031_v17 = vsub.f32 %v6029_v42, %v6030_v43  ;;  %v6033_v27 = vsub.f32 %v6032_v25, %v6030_v43  ;;  %v6042_v12 = vld [vmem:[#allocation31_spill] sm:$0xff]  ;;  %v6044_v28 = vld [vmem:[#allocation32_spill] sm:$0xff] }
 0x1a0   : > { %v1255_v39 = vmul.f32 %v1150_v2, %v6028_v24  ;;  %1394 = vst [vmem:[%s4525_s12 + $0x180] sm:$0xff] %v1250_v0  ;;  %v6035_v46 = vsub.f32 %v6034_v6, %v6030_v43  ;;  %v1160_v2 = vpop.permute.xlu1 %1159  ;;  %1395 = vst [vmem:[%s4525_s12 + $0x188] sm:$0xff] %v1251_v61  ;;  %v6037_v11 = vsub.f32 %v6036_v48, %v6030_v43  ;;  %v6046_v0 = vld [vmem:[#allocation33_spill] sm:$0xff]  ;;  %v6048_v61 = vld [vmem:[#allocation34_spill] sm:$0xff] }
 0x1a1   : > { %v1238_v35 = vmul.f32 %v1145_v44, %v6031_v17  ;;  %v1239_v45 = vmul.f32 %v1145_v44, %v6033_v27  ;;  %1396 = vst [vmem:[%s4525_s12 + $0x190] sm:$0xff] %v1252_v3  ;;  %1397 = vst [vmem:[%s4525_s12 + $0x198] sm:$0xff] %v1253_v19  ;;  %v6039_v50 = vsub.f32 %v6038_v34, %v6030_v43  ;;  %v6059_v17 = vld [vmem:[#allocation39_spill] sm:$0xff]  ;;  %v6061_v27 = vld [vmem:[#allocation40_spill] sm:$0xff] }
 0x1a2   : > { %v1240_v18 = vmul.f32 %v1145_v44, %v6035_v46  ;;  %1398 = vst [vmem:[%s4525_s12 + $0x1a0] sm:$0xff] %v1254_v23  ;;  %v1241_v51 = vmul.f32 %v1145_v44, %v6037_v11  ;;  %v6041_v54 = vsub.f32 %v6040_v53, %v6030_v43  ;;  %v6043_v1 = vsub.f32 %v6042_v12, %v6030_v43  ;;  %v6055_v23 = vld [vmem:[#allocation37_spill] sm:$0xff]  ;;  %v6065_v11 = vld [vmem:[#allocation42_spill] sm:$0xff]  ;;  %v1165_v12 = vpop.permute.xlu0 %1164 }
 0x1a3   : > { %v1242_v52 = vmul.f32 %v1145_v44, %v6039_v50  ;;  %1399 = vst [vmem:[%s4525_s12 + $0x1a8] sm:$0xff] %v1255_v39  ;;  %v6045_v13 = vsub.f32 %v6044_v28, %v6030_v43  ;;  %v6047_v60 = vsub.f32 %v6046_v0, %v6030_v43  ;;  %1382 = vst [vmem:[%s4525_s12 + $0x120] sm:$0xff] %v1238_v35  ;;  %v6057_v39 = vld [vmem:[#allocation38_spill] sm:$0xff]  ;;  %v6063_v46 = vld [vmem:[#allocation41_spill] sm:$0xff] }
 0x1a4   : > { %v1243_v41 = vmul.f32 %v1145_v44, %v6041_v54  ;;  %v1244_v49 = vmul.f32 %v1145_v44, %v6043_v1  ;;  %1383 = vst [vmem:[%s4525_s12 + $0x128] sm:$0xff] %v1239_v45  ;;  %1384 = vst [vmem:[%s4525_s12 + $0x130] sm:$0xff] %v1240_v18  ;;  %v6050_v20 = vsub.f32 %v6048_v61, %v6049_v62  ;;  %v6067_v50 = vld [vmem:[#allocation43_spill] sm:$0xff]  ;;  %v6070_v1 = vld [vmem:[#allocation46_spill] sm:$0xff] }
 0x1a5   : > { %v1245_v59 = vmul.f32 %v1145_v44, %v6045_v13  ;;  %v1246_v14 = vmul.f32 %v1145_v44, %v6047_v60  ;;  %v6052_v5 = vsub.f32 %v6051_v4, %v6049_v62  ;;  %1385 = vst [vmem:[%s4525_s12 + $0x138] sm:$0xff] %v1241_v51  ;;  %1386 = vst [vmem:[%s4525_s12 + $0x140] sm:$0xff] %v1242_v52  ;;  %v6068_v52 = vld [vmem:[#allocation45_spill] sm:$0xff]  ;;  %v6072_v28 = vld [vmem:[#allocation47_spill] sm:$0xff] }
 0x1a6   : > { %v1265_v3 = vmul.f32 %v1160_v2, %v6050_v20  ;;  %1387 = vst [vmem:[%s4525_s12 + $0x148] sm:$0xff] %v1243_v41  ;;  %1388 = vst [vmem:[%s4525_s12 + $0x150] sm:$0xff] %v1244_v49  ;;  %v6054_v44 = vsub.f32 %v6053_v21, %v6049_v62  ;;  %v6056_v33 = vsub.f32 %v6055_v23, %v6049_v62  ;;  %v1170_v41 = vpop.permute.xlu1 %1169  ;;  %v6074_v0 = vld [vmem:[#allocation48_spill] sm:$0xff]  ;;  %v6076_v61 = vld [vmem:[#allocation49_spill] sm:$0xff] }
 0x1a7   : > { %v1266_v19 = vmul.f32 %v1160_v2, %v6052_v5  ;;  %v6058_v42 = vsub.f32 %v6057_v39, %v6049_v62  ;;  %v6060_v35 = vsub.f32 %v6059_v17, %v6049_v62  ;;  %1389 = vst [vmem:[%s4525_s12 + $0x158] sm:$0xff] %v1245_v59  ;;  %1390 = vst [vmem:[%s4525_s12 + $0x160] sm:$0xff] %v1246_v14 }
 0x1a8   : > { %v1267_v22 = vmul.f32 %v1160_v2, %v6054_v44  ;;  %v1268_v24 = vmul.f32 %v1160_v2, %v6056_v33  ;;  %v6062_v45 = vsub.f32 %v6061_v27, %v6049_v62  ;;  %v6064_v18 = vsub.f32 %v6063_v46, %v6049_v62  ;;  %1409 = vst [vmem:[%s4525_s12 + $0x1f8] sm:$0xff] %v1265_v3  ;;  %v6078_v3 = vld [vmem:[#allocation50_spill] sm:$0xff] }
 0x1a9   : > { %v1269_v43 = vmul.f32 %v1160_v2, %v6058_v42  ;;  %v1270_v25 = vmul.f32 %v1160_v2, %v6060_v35  ;;  %v6066_v51 = vsub.f32 %v6065_v11, %v6049_v62  ;;  %1410 = vst [vmem:[%s4525_s12 + $0x200] sm:$0xff] %v1266_v19  ;;  %v6069_v53 = vsub.f32 %v6067_v50, %v6068_v52  ;;  %v6080_v19 = vld [vmem:[#allocation51_spill] sm:$0xff] }
 0x1aa   : > { %v1271_v6 = vmul.f32 %v1160_v2, %v6062_v45  ;;  %v1272_v48 = vmul.f32 %v1160_v2, %v6064_v18  ;;  %1411 = vst [vmem:[%s4525_s12 + $0x208] sm:$0xff] %v1267_v22  ;;  %1412 = vst [vmem:[%s4525_s12 + $0x210] sm:$0xff] %v1268_v24  ;;  %v6073_v13 = vsub.f32 %v6072_v28, %v6068_v52  ;;  %v6082_v22 = vld [vmem:[#allocation52_spill] sm:$0xff]  ;;  %v6084_v24 = vld [vmem:[#allocation53_spill] sm:$0xff] }
 0x1ab   : > { %v1273_v34 = vmul.f32 %v1160_v2, %v6066_v51  ;;  %v1256_v54 = vmul.f32 %v1155_v47, %v6069_v53  ;;  %1413 = vst [vmem:[%s4525_s12 + $0x218] sm:$0xff] %v1269_v43  ;;  %1414 = vst [vmem:[%s4525_s12 + $0x220] sm:$0xff] %v1270_v25  ;;  %v6071_v2 = vsub.f32 %v6070_v1, %v6068_v52  ;;  %v6086_v43 = vld [vmem:[#allocation54_spill] sm:$0xff]  ;;  %v6088_v25 = vld [vmem:[#allocation55_spill] sm:$0xff] }
 0x1ac   : > { %v1258_v59 = vmul.f32 %v1155_v47, %v6073_v13  ;;  %v6075_v60 = vsub.f32 %v6074_v0, %v6068_v52  ;;  %v6077_v62 = vsub.f32 %v6076_v61, %v6068_v52  ;;  %1415 = vst [vmem:[%s4525_s12 + $0x228] sm:$0xff] %v1271_v6  ;;  %1416 = vst [vmem:[%s4525_s12 + $0x230] sm:$0xff] %v1272_v48  ;;  %v6090_v6 = vld [vmem:[#allocation56_spill] sm:$0xff]  ;;  %v6092_v18 = vld [vmem:[#allocation57_spill] sm:$0xff]  ;;  %v1180_v0 = vpop.permute.xlu1 %1179 }
 0x1ad   : > { %v1257_v49 = vmul.f32 %v1155_v47, %v6071_v2  ;;  %1417 = vst [vmem:[%s4525_s12 + $0x238] sm:$0xff] %v1273_v34  ;;  %v6079_v4 = vsub.f32 %v6078_v3, %v6068_v52  ;;  %v6081_v21 = vsub.f32 %v6080_v19, %v6068_v52  ;;  %v6083_v23 = vsub.f32 %v6082_v22, %v6068_v52  ;;  %v6094_v51 = vld [vmem:[#allocation58_spill] sm:$0xff]  ;;  %v6098_v1 = vld [vmem:[#allocation60_spill] sm:$0xff]  ;;  %v6100_v28 = vld [vmem:[#allocation61_spill] sm:$0xff] }
 0x1ae   : > { %v1259_v14 = vmul.f32 %v1155_v47, %v6075_v60  ;;  %v1260_v20 = vmul.f32 %v1155_v47, %v6077_v62  ;;  %v6085_v39 = vsub.f32 %v6084_v24, %v6068_v52  ;;  %1400 = vst [vmem:[%s4525_s12 + $0x1b0] sm:$0xff] %v1256_v54  ;;  %1402 = vst [vmem:[%s4525_s12 + $0x1c0] sm:$0xff] %v1258_v59  ;;  %v6096_v52 = vld [vmem:[#allocation59_spill] sm:$0xff]  ;;  %v6103_v61 = vld [vmem:[#allocation62_spill] sm:$0xff] }
 0x1af   : > { %v1261_v5 = vmul.f32 %v1155_v47, %v6079_v4  ;;  %v1262_v44 = vmul.f32 %v1155_v47, %v6081_v21  ;;  %v1263_v33 = vmul.f32 %v1155_v47, %v6083_v23  ;;  %1401 = vst [vmem:[%s4525_s12 + $0x1b8] sm:$0xff] %v1257_v49  ;;  %v6087_v17 = vsub.f32 %v6086_v43, %v4209_v36  ;;  %v6105_v3 = vld [vmem:[#allocation63_spill] sm:$0xff]  ;;  %v6107_v19 = vld [vmem:[#allocation64_spill] sm:$0xff]  ;;  %v6110_v22 = vld [vmem:[#allocation65_spill] sm:$0xff] }
 0x1b0   : > { %v1264_v42 = vmul.f32 %v1155_v47, %v6085_v39  ;;  %1403 = vst [vmem:[%s4525_s12 + $0x1c8] sm:$0xff] %v1259_v14  ;;  %1404 = vst [vmem:[%s4525_s12 + $0x1d0] sm:$0xff] %v1260_v20  ;;  %v6089_v27 = vsub.f32 %v6088_v25, %v4209_v36  ;;  %v6091_v46 = vsub.f32 %v6090_v6, %v4209_v36  ;;  %v6112_v24 = vld [vmem:[#allocation66_spill] sm:$0xff]  ;;  %v6114_v43 = vld [vmem:[#allocation67_spill] sm:$0xff] }
 0x1b1   : > { %v1283_v35 = vmul.f32 %v1170_v41, %v6087_v17  ;;  %v6093_v48 = vsub.f32 %v6092_v18, %v4209_v36  ;;  %1405 = vst [vmem:[%s4525_s12 + $0x1d8] sm:$0xff] %v1261_v5  ;;  %1406 = vst [vmem:[%s4525_s12 + $0x1e0] sm:$0xff] %v1262_v44  ;;  %v6095_v34 = vsub.f32 %v6094_v51, %v4209_v36  ;;  %v6116_v25 = vld [vmem:[#allocation68_spill] sm:$0xff] }
 0x1b2   : > { %v1284_v45 = vmul.f32 %v1170_v41, %v6089_v27  ;;  %v1285_v47 = vmul.f32 %v1170_v41, %v6091_v46  ;;  %1407 = vst [vmem:[%s4525_s12 + $0x1e8] sm:$0xff] %v1263_v33  ;;  %1408 = vst [vmem:[%s4525_s12 + $0x1f0] sm:$0xff] %v1264_v42  ;;  %v6097_v53 = vsub.f32 %v6096_v52, %v4209_v36  ;;  %v6126_v52 = vld [vmem:[#allocation73_spill] sm:$0xff] }
 0x1b3   : > { %v1286_v11 = vmul.f32 %v1170_v41, %v6093_v48  ;;  %v1287_v50 = vmul.f32 %v1170_v41, %v6095_v34  ;;  %v6099_v2 = vsub.f32 %v6098_v1, %v4209_v36  ;;  %v6101_v13 = vsub.f32 %v6100_v28, %v4209_v36  ;;  %1427 = vst [vmem:[%s4525_s12 + $0x288] sm:$0xff] %v1283_v35  ;;  %v6128_v1 = vld [vmem:[#allocation74_spill] sm:$0xff]  ;;  %v6130_v28 = vld [vmem:[#allocation75_spill] sm:$0xff] }
 0x1b4   : > { %v1288_v54 = vmul.f32 %v1170_v41, %v6097_v53  ;;  %v6102_v60 = vsub.f32 %v4212_v37, %v4209_v36  ;;  %1428 = vst [vmem:[%s4525_s12 + $0x290] sm:$0xff] %v1284_v45  ;;  %1429 = vst [vmem:[%s4525_s12 + $0x298] sm:$0xff] %v1285_v47  ;;  %v6104_v62 = vsub.f32 %v6103_v61, %v4214_v38  ;;  %v1175_v37 = vpop.permute.xlu0 %1174  ;;  %v6118_v45 = vld [vmem:[#allocation69_spill] sm:$0xff]  ;;  %v6120_v47 = vld [vmem:[#allocation70_spill] sm:$0xff] }
 0x1b5   : > { %v1289_v49 = vmul.f32 %v1170_v41, %v6099_v2  ;;  %v1290_v59 = vmul.f32 %v1170_v41, %v6101_v13  ;;  %1430 = vst [vmem:[%s4525_s12 + $0x2a0] sm:$0xff] %v1286_v11  ;;  %v6106_v4 = vsub.f32 %v6105_v3, %v4214_v38  ;;  %v6108_v21 = vsub.f32 %v6107_v19, %v4214_v38  ;;  %v6122_v11 = vld [vmem:[#allocation71_spill] sm:$0xff]  ;;  %v6133_v61 = vld [vmem:[#allocation76_spill] sm:$0xff]  ;;  %v6135_v3 = vld [vmem:[#allocation77_spill] sm:$0xff] }
 0x1b6   : > { %v1291_v14 = vmul.f32 %v1170_v41, %v6102_v60  ;;  %v1274_v20 = vmul.f32 %v1165_v12, %v6104_v62  ;;  %1431 = vst [vmem:[%s4525_s12 + $0x2a8] sm:$0xff] %v1287_v50  ;;  %1432 = vst [vmem:[%s4525_s12 + $0x2b0] sm:$0xff] %v1288_v54  ;;  %v6109_v41 = vsub.f32 %v4234_v31, %v4214_v38  ;;  %v6137_v19 = vld [vmem:[#allocation78_spill] sm:$0xff] }
 0x1b7   : > { %v1275_v5 = vmul.f32 %v1165_v12, %v6106_v4  ;;  %v1276_v36 = vmul.f32 %v1165_v12, %v6108_v21  ;;  %1433 = vst [vmem:[%s4525_s12 + $0x2b8] sm:$0xff] %v1289_v49  ;;  %1434 = vst [vmem:[%s4525_s12 + $0x2c0] sm:$0xff] %v1290_v59  ;;  %v6111_v23 = vsub.f32 %v6110_v22, %v4214_v38 }
 0x1b8   : > { %v1277_v44 = vmul.f32 %v1165_v12, %v6109_v41  ;;  %v6113_v39 = vsub.f32 %v6112_v24, %v4214_v38  ;;  %v6115_v17 = vsub.f32 %v6114_v43, %v4214_v38  ;;  %1435 = vst [vmem:[%s4525_s12 + $0x2c8] sm:$0xff] %v1291_v14  ;;  %v6117_v27 = vsub.f32 %v6116_v25, %v4214_v38  ;;  %v1190_v41 = vpop.permute.xlu1 %1189 }
 0x1b9   : > { %v1278_v33 = vmul.f32 %v1165_v12, %v6111_v23  ;;  %v6119_v6 = vsub.f32 %v6118_v45, %v4214_v38  ;;  %1418 = vst [vmem:[%s4525_s12 + $0x240] sm:$0xff] %v1274_v20  ;;  %1419 = vst [vmem:[%s4525_s12 + $0x248] sm:$0xff] %v1275_v5  ;;  %v6121_v18 = vsub.f32 %v6120_v47, %v4293_v16  ;;  %v6124_v38 = vld [vmem:[#allocation72_spill] sm:$0xff] }
 0x1ba   : > { %v1279_v42 = vmul.f32 %v1165_v12, %v6113_v39  ;;  %v1280_v35 = vmul.f32 %v1165_v12, %v6115_v17  ;;  %v1281_v31 = vmul.f32 %v1165_v12, %v6117_v27  ;;  %1420 = vst [vmem:[%s4525_s12 + $0x250] sm:$0xff] %v1276_v36  ;;  %v6123_v51 = vsub.f32 %v6122_v11, %v4293_v16 }
 0x1bb   : > { %v1282_v46 = vmul.f32 %v1165_v12, %v6119_v6  ;;  %v1301_v48 = vmul.f32 %v1180_v0, %v6121_v18  ;;  %1421 = vst [vmem:[%s4525_s12 + $0x258] sm:$0xff] %v1277_v44  ;;  %1422 = vst [vmem:[%s4525_s12 + $0x260] sm:$0xff] %v1278_v33  ;;  %v6125_v12 = vsub.f32 %v6124_v38, %v4293_v16  ;;  %v6143_v33 = vld [vmem:[#allocation81_spill] sm:$0xff] }
 0x1bc   : > { %v1302_v34 = vmul.f32 %v1180_v0, %v6123_v51  ;;  %1423 = vst [vmem:[%s4525_s12 + $0x268] sm:$0xff] %v1279_v42  ;;  %1424 = vst [vmem:[%s4525_s12 + $0x270] sm:$0xff] %v1280_v35  ;;  %v6127_v53 = vsub.f32 %v6126_v52, %v4293_v16  ;;  %v6129_v2 = vsub.f32 %v6128_v1, %v4293_v16  ;;  %v6145_v42 = vld [vmem:[#allocation82_spill] sm:$0xff]  ;;  %v6147_v35 = vld [vmem:[#allocation83_spill] sm:$0xff] }
 0x1bd   : > { %v1303_v50 = vmul.f32 %v1180_v0, %v6125_v12  ;;  %v6131_v13 = vsub.f32 %v6130_v28, %v4293_v16  ;;  %1425 = vst [vmem:[%s4525_s12 + $0x278] sm:$0xff] %v1281_v31  ;;  %1426 = vst [vmem:[%s4525_s12 + $0x280] sm:$0xff] %v1282_v46  ;;  %v6132_v60 = vsub.f32 %v4296_v15, %v4293_v16  ;;  %v6139_v15 = vld [vmem:[#allocation79_spill] sm:$0xff]  ;;  %v6149_v31 = vld [vmem:[#allocation84_spill] sm:$0xff] }
 0x1be   : > { %v1304_v54 = vmul.f32 %v1180_v0, %v6127_v53  ;;  %v1305_v49 = vmul.f32 %v1180_v0, %v6129_v2  ;;  %v6134_v62 = vsub.f32 %v6133_v61, %v4293_v16  ;;  %v6136_v4 = vsub.f32 %v6135_v3, %v4293_v16  ;;  %1445 = vst [vmem:[%s4525_s12 + $0x318] sm:$0xff] %v1301_v48  ;;  %v6151_v46 = vld [vmem:[#allocation85_spill] sm:$0xff]  ;;  %v6153_v48 = vld [vmem:[#allocation86_spill] sm:$0xff] }
 0x1bf   : > { %v1306_v59 = vmul.f32 %v1180_v0, %v6131_v13  ;;  %v1307_v14 = vmul.f32 %v1180_v0, %v6132_v60  ;;  %1446 = vst [vmem:[%s4525_s12 + $0x320] sm:$0xff] %v1302_v34  ;;  %v6138_v21 = vsub.f32 %v6137_v19, %v4304_v30  ;;  %1447 = vst [vmem:[%s4525_s12 + $0x328] sm:$0xff] %v1303_v50  ;;  %v1185_v34 = vpop.permute.xlu0 %1184  ;;  %v6156_v50 = vld [vmem:[#allocation87_spill] sm:$0xff]  ;;  %v6160_v1 = vld [vmem:[#allocation89_spill] sm:$0xff] }
 0x1c0   : > { %v1308_v20 = vmul.f32 %v1180_v0, %v6134_v62  ;;  %v1309_v5 = vmul.f32 %v1180_v0, %v6136_v4  ;;  %1448 = vst [vmem:[%s4525_s12 + $0x330] sm:$0xff] %v1304_v54  ;;  %1449 = vst [vmem:[%s4525_s12 + $0x338] sm:$0xff] %v1305_v49  ;;  %v6140_v44 = vsub.f32 %v6139_v15, %v4304_v30  ;;  %v6141_v0 = vld [vmem:[#allocation80_spill] sm:$0xff]  ;;  %v6164_v60 = vld [vmem:[#allocation90_spill] sm:$0xff] }
 0x1c1   : > { %v1292_v36 = vmul.f32 %v1175_v37, %v6138_v21  ;;  %1450 = vst [vmem:[%s4525_s12 + $0x340] sm:$0xff] %v1306_v59  ;;  %v6142_v22 = vsub.f32 %v6141_v0, %v4304_v30  ;;  %v6144_v24 = vsub.f32 %v6143_v33, %v4304_v30  ;;  %v6146_v43 = vsub.f32 %v6145_v42, %v4304_v30  ;;  %v6166_v62 = vld [vmem:[#allocation91_spill] sm:$0xff] }
 0x1c2   : > { %v1293_v16 = vmul.f32 %v1175_v37, %v6140_v44  ;;  %1451 = vst [vmem:[%s4525_s12 + $0x348] sm:$0xff] %v1307_v14  ;;  %1452 = vst [vmem:[%s4525_s12 + $0x350] sm:$0xff] %v1308_v20  ;;  %v6148_v25 = vsub.f32 %v6147_v35, %v4304_v30  ;;  %v6150_v45 = vsub.f32 %v6149_v31, %v4304_v30  ;;  %v859_v4 = vld [vmem:[%s3823_s0 + $0x448] sm:$0xff] }
 0x1c3   : > { %v1294_v23 = vmul.f32 %v1175_v37, %v6142_v22  ;;  %v1295_v39 = vmul.f32 %v1175_v37, %v6144_v24  ;;  %v1296_v17 = vmul.f32 %v1175_v37, %v6146_v43  ;;  %1453 = vst [vmem:[%s4525_s12 + $0x358] sm:$0xff] %v1309_v5  ;;  %v6152_v47 = vsub.f32 %v6151_v46, %v4304_v30  ;;  %v861_v5 = vld [vmem:[%s3823_s0 + $0x458] sm:$0xff]  ;;  %v6177_v43 = vld [vmem:[#allocation94_spill] sm:$0xff] }
 0x1c4   : > { %v1297_v27 = vmul.f32 %v1175_v37, %v6148_v25  ;;  %v1298_v6 = vmul.f32 %v1175_v37, %v6150_v45  ;;  %v6154_v11 = vsub.f32 %v6153_v48, %v4304_v30  ;;  %1436 = vst [vmem:[%s4525_s12 + $0x2d0] sm:$0xff] %v1292_v36  ;;  %1437 = vst [vmem:[%s4525_s12 + $0x2d8] sm:$0xff] %v1293_v16  ;;  %v6158_v30 = vld [vmem:[#allocation88_spill] sm:$0xff]  ;;  %v6175_v24 = vld [vmem:[#allocation93_spill] sm:$0xff]  ;;  %v1200_v25 = vpop.permute.xlu1 %1199 }
 0x1c5   : > { %v1299_v18 = vmul.f32 %v1175_v37, %v6152_v47  ;;  %1438 = vst [vmem:[%s4525_s12 + $0x2e0] sm:$0xff] %v1294_v23  ;;  %1439 = vst [vmem:[%s4525_s12 + $0x2e8] sm:$0xff] %v1295_v39  ;;  %v6155_v38 = vsub.f32 %v4358_v56, %v4371_v58  ;;  %v6157_v52 = vsub.f32 %v6156_v50, %v4371_v58  ;;  %v6171_v16 = vld [vmem:[#allocation92_spill] sm:$0xff] }
 0x1c6   : > { %v1300_v51 = vmul.f32 %v1175_v37, %v6154_v11  ;;  %1440 = vst [vmem:[%s4525_s12 + $0x2f0] sm:$0xff] %v1296_v17  ;;  %v6159_v37 = vsub.f32 %v6158_v30, %v4371_v58  ;;  %v6161_v2 = vsub.f32 %v6160_v1, %v4371_v58  ;;  %1441 = vst [vmem:[%s4525_s12 + $0x2f8] sm:$0xff] %v1297_v27  ;;  %v865_v27 = vld [vmem:[%s3823_s0 + $0x478] sm:$0xff]  ;;  %v851_v1 = vld [vmem:[%s3823_s0 + $0x408] sm:$0xff] }
 0x1c7   : > { %v1319_v12 = vmul.f32 %v1190_v41, %v6155_v38  ;;  %v1320_v53 = vmul.f32 %v1190_v41, %v6157_v52  ;;  %1442 = vst [vmem:[%s4525_s12 + $0x300] sm:$0xff] %v1298_v6  ;;  %1443 = vst [vmem:[%s4525_s12 + $0x308] sm:$0xff] %v1299_v18  ;;  %v6162_v56 = vsub.f32 %v4380_v8, %v4371_v58  ;;  %v860_v8 = vld [vmem:[%s3823_s0 + $0x450] sm:$0xff]  ;;  %v849_v38 = vld [vmem:[%s3823_s0 + $0x3f8] sm:$0xff] }
 0x1c8   : > { %v1321_v54 = vmul.f32 %v1190_v41, %v6159_v37  ;;  %v1322_v49 = vmul.f32 %v1190_v41, %v6161_v2  ;;  %1444 = vst [vmem:[%s4525_s12 + $0x310] sm:$0xff] %v1300_v51  ;;  %v6163_v13 = vsub.f32 %v4393_v7, %v4371_v58  ;;  %v6165_v14 = vsub.f32 %v6164_v60, %v4371_v58  ;;  %v852_v2 = vld [vmem:[%s3823_s0 + $0x410] sm:$0xff]  ;;  %v854_v60 = vld [vmem:[%s3823_s0 + $0x420] sm:$0xff] }
 0x1c9   : > { %v1323_v28 = vmul.f32 %v1190_v41, %v6162_v56  ;;  %v6167_v20 = vsub.f32 %v6166_v62, %v4371_v58  ;;  %v6168_v7 = vsub.f32 %v4410_v26, %v4371_v58  ;;  %1463 = vst [vmem:[%s4525_s12 + $0x3a8] sm:$0xff] %v1319_v12  ;;  %1464 = vst [vmem:[%s4525_s12 + $0x3b0] sm:$0xff] %v1320_v53  ;;  %v862_v58 = vld [vmem:[%s3823_s0 + $0x460] sm:$0xff]  ;;  %v863_v26 = vld [vmem:[%s3823_s0 + $0x468] sm:$0xff] }
 0x1ca   : > { %v1324_v59 = vmul.f32 %v1190_v41, %v6163_v13  ;;  %v1325_v61 = vmul.f32 %v1190_v41, %v6165_v14  ;;  %1465 = vst [vmem:[%s4525_s12 + $0x3b8] sm:$0xff] %v1321_v54  ;;  %1466 = vst [vmem:[%s4525_s12 + $0x3c0] sm:$0xff] %v1322_v49  ;;  %v6169_v21 = vsub.f32 %v4413_v9, %v4382_v29  ;;  %v850_v12 = vld [vmem:[%s3823_s0 + $0x400] sm:$0xff]  ;;  %v853_v49 = vld [vmem:[%s3823_s0 + $0x418] sm:$0xff] }
 0x1cb   : > { %v1326_v3 = vmul.f32 %v1190_v41, %v6167_v20  ;;  %v1327_v19 = vmul.f32 %v1190_v41, %v6168_v7  ;;  %v6170_v15 = vsub.f32 %v4416_v10, %v4382_v29  ;;  %v6172_v0 = vsub.f32 %v6171_v16, %v4382_v29  ;;  %v864_v41 = vld [vmem:[%s3823_s0 + $0x470] sm:$0xff]  ;;  %1467 = vst [vmem:[%s4525_s12 + $0x3c8] sm:$0xff] %v1323_v28  ;;  %v855_v14 = vld [vmem:[%s3823_s0 + $0x428] sm:$0xff] }
 0x1cc   : > { %v1310_v36 = vmul.f32 %v1185_v34, %v6169_v21  ;;  %1468 = vst [vmem:[%s4525_s12 + $0x3d0] sm:$0xff] %v1324_v59  ;;  %1469 = vst [vmem:[%s4525_s12 + $0x3d8] sm:$0xff] %v1325_v61  ;;  %v6173_v9 = vsub.f32 %v4430_v57, %v4382_v29  ;;  %v6174_v23 = vsub.f32 %v4433_v40, %v4382_v29  ;;  %v6179_v57 = vld [vmem:[#allocation95_spill] sm:$0xff]  ;;  %v6181_v40 = vld [vmem:[#allocation97_spill] sm:$0xff]  ;;  %v1195_v59 = vpop.permute.xlu0 %1194 }
 0x1cd   : > { %v1311_v44 = vmul.f32 %v1185_v34, %v6170_v15  ;;  %v1312_v22 = vmul.f32 %v1185_v34, %v6172_v0  ;;  %1470 = vst [vmem:[%s4525_s12 + $0x3e0] sm:$0xff] %v1326_v3  ;;  %v6176_v39 = vsub.f32 %v6175_v24, %v4382_v29  ;;  %v6178_v17 = vsub.f32 %v6177_v43, %v4382_v29  ;;  %v6185_v62 = vld [vmem:[#allocation96_spill] sm:$0xff] }
 0x1ce   : > { %v1313_v10 = vmul.f32 %v1185_v34, %v6173_v9  ;;  %v1314_v33 = vmul.f32 %v1185_v34, %v6174_v23  ;;  %1471 = vst [vmem:[%s4525_s12 + $0x3e8] sm:$0xff] %v1327_v19  ;;  %v6180_v31 = vsub.f32 %v6179_v57, %v4382_v29  ;;  %v6182_v6 = vsub.f32 %v6181_v40, %v4382_v29 }
 0x1cf   : > { %v1315_v42 = vmul.f32 %v1185_v34, %v6176_v39  ;;  %v1316_v35 = vmul.f32 %v1185_v34, %v6178_v17  ;;  %1454 = vst [vmem:[%s4525_s12 + $0x360] sm:$0xff] %v1310_v36  ;;  %1455 = vst [vmem:[%s4525_s12 + $0x368] sm:$0xff] %v1311_v44  ;;  %v1099_v47 = vsub.f32 %v859_v4, %v4452_v55 }
 0x1d0   : > { %v1317_v45 = vmul.f32 %v1185_v34, %v6180_v31  ;;  %v1318_v46 = vmul.f32 %v1185_v34, %v6182_v6  ;;  %1456 = vst [vmem:[%s4525_s12 + $0x370] sm:$0xff] %v1312_v22  ;;  %v1100_v18 = vsub.f32 %v860_v8, %v4452_v55  ;;  %1457 = vst [vmem:[%s4525_s12 + $0x378] sm:$0xff] %v1313_v10  ;;  %v848_v34 = vld [vmem:[%s3823_s0 + $0x3f0] sm:$0xff] }
 0x1d1   : > { %1458 = vst [vmem:[%s4525_s12 + $0x380] sm:$0xff] %v1314_v33  ;;  %1459 = vst [vmem:[%s4525_s12 + $0x388] sm:$0xff] %v1315_v42  ;;  %v1101_v29 = vsub.f32 %v861_v5, %v4452_v55  ;;  %v1102_v48 = vsub.f32 %v862_v58, %v4452_v55  ;;  %v1103_v11 = vsub.f32 %v863_v26, %v4452_v55 }
 0x1d2   : > { %1460 = vst [vmem:[%s4525_s12 + $0x390] sm:$0xff] %v1316_v35  ;;  %v1104_v51 = vsub.f32 %v864_v41, %v4452_v55  ;;  %1461 = vst [vmem:[%s4525_s12 + $0x398] sm:$0xff] %v1317_v45  ;;  %v1105_v50 = vsub.f32 %v865_v27, %v4452_v55  ;;  %v6183_v52 = vsub.f32 %v4468_v63, %v4452_v55 }
 0x1d3   : > { %1462 = vst [vmem:[%s4525_s12 + $0x3a0] sm:$0xff] %v1318_v46  ;;  %v6184_v30 = vsub.f32 %v4471_v32, %v4452_v55  ;;  %v1339_v54 = vmul.f32 %v1200_v25, %v1099_v47  ;;  %v1340_v56 = vmul.f32 %v1200_v25, %v1100_v18  ;;  %v1341_v28 = vmul.f32 %v1200_v25, %v1101_v29  ;;  %v856_v55 = vld [vmem:[%s3823_s0 + $0x430] sm:$0xff] }
 0x1d4   : > { %v1337_v53 = vmul.f32 %v1200_v25, %v6183_v52  ;;  %v1342_v13 = vmul.f32 %v1200_v25, %v1102_v48  ;;  %v1343_v63 = vmul.f32 %v1200_v25, %v1103_v11  ;;  %v1344_v32 = vmul.f32 %v1200_v25, %v1104_v51 }
 0x1d5   : > { %v1338_v37 = vmul.f32 %v1200_v25, %v6184_v30  ;;  %v1345_v61 = vmul.f32 %v1200_v25, %v1105_v50  ;;  %1483 = vst [vmem:[%s4525_s12 + $0x448] sm:$0xff] %v1339_v54  ;;  %v1088_v20 = vsub.f32 %v848_v34, %v6185_v62  ;;  %v1089_v3 = vsub.f32 %v849_v38, %v6185_v62 }
 0x1d6   : > { %1481 = vst [vmem:[%s4525_s12 + $0x438] sm:$0xff] %v1337_v53  ;;  %1484 = vst [vmem:[%s4525_s12 + $0x450] sm:$0xff] %v1340_v56  ;;  %v1090_v4 = vsub.f32 %v850_v12, %v6185_v62  ;;  %v1091_v8 = vsub.f32 %v851_v1, %v6185_v62  ;;  %v1092_v5 = vsub.f32 %v852_v2, %v6185_v62 }
 0x1d7   : > { %1482 = vst [vmem:[%s4525_s12 + $0x440] sm:$0xff] %v1338_v37  ;;  %1485 = vst [vmem:[%s4525_s12 + $0x458] sm:$0xff] %v1341_v28  ;;  %v1093_v7 = vsub.f32 %v853_v49, %v6185_v62  ;;  %v1094_v19 = vsub.f32 %v854_v60, %v6185_v62  ;;  %v1095_v21 = vsub.f32 %v855_v14, %v6185_v62 }
 0x1d8   : > { %1486 = vst [vmem:[%s4525_s12 + $0x460] sm:$0xff] %v1342_v13  ;;  %1487 = vst [vmem:[%s4525_s12 + $0x468] sm:$0xff] %v1343_v63  ;;  %v1096_v36 = vsub.f32 %v856_v55, %v6185_v62  ;;  %v1328_v15 = vmul.f32 %v1195_v59, %v1088_v20  ;;  %v1329_v44 = vmul.f32 %v1195_v59, %v1089_v3  ;;  %1496 = sbr.rel (!%p3039_p6) target bundleno = 668 (0x29c), region = 102 }
 0x1d9   : > { %1488 = vst [vmem:[%s4525_s12 + $0x470] sm:$0xff] %v1344_v32  ;;  %1489 = vst [vmem:[%s4525_s12 + $0x478] sm:$0xff] %v1345_v61  ;;  %v1330_v16 = vmul.f32 %v1195_v59, %v1090_v4  ;;  %v1331_v0 = vmul.f32 %v1195_v59, %v1091_v8  ;;  %v1332_v22 = vmul.f32 %v1195_v59, %v1092_v5 }
 0x1da   : > { %v1333_v58 = vmul.f32 %v1195_v59, %v1093_v7  ;;  %v1334_v26 = vmul.f32 %v1195_v59, %v1094_v19  ;;  %v1335_v41 = vmul.f32 %v1195_v59, %v1095_v21  ;;  %v1336_v9 = vmul.f32 %v1195_v59, %v1096_v36  ;;  %1472 = vst [vmem:[%s4525_s12 + $0x3f0] sm:$0xff] %v1328_v15 }
 0x1db   : > { %1473 = vst [vmem:[%s4525_s12 + $0x3f8] sm:$0xff] %v1329_v44  ;;  %1474 = vst [vmem:[%s4525_s12 + $0x400] sm:$0xff] %v1330_v16 }
 0x1dc   : > { %1475 = vst [vmem:[%s4525_s12 + $0x408] sm:$0xff] %v1331_v0  ;;  %1476 = vst [vmem:[%s4525_s12 + $0x410] sm:$0xff] %v1332_v22 }
 0x1dd   : > { %1477 = vst [vmem:[%s4525_s12 + $0x418] sm:$0xff] %v1333_v58  ;;  %1478 = vst [vmem:[%s4525_s12 + $0x420] sm:$0xff] %v1334_v26 }
 0x1de   : > { %1479 = vst [vmem:[%s4525_s12 + $0x428] sm:$0xff] %v1335_v41  ;;  %1480 = vst [vmem:[%s4525_s12 + $0x430] sm:$0xff] %v1336_v9 }
 0x1df   : > { %s6227_s28 = smov (!%p1499_p3, %s1498_s28), 9 }
 0x1e0   : > { %s2296_s24 = sshll.u32 %s6227_s28, 11  ;;  %s5069_s21 = sshll.u32 %s6227_s28, 3 }
 0x1e1   : > { %p2300_p4 = scmp.eq.s32.totalorder %s2296_s24, 0 }
 0x1e2   : > { %p1511_p6 = scmp.lt.u32.totalorder (!%p2300_p4), %s5069_s21, 8 }
 0x1e3   : > { %1510 = sbr.rel (%p2300_p4) target bundleno = 668 (0x29c), region = 106 }
 0x1ea   : > { %1514 = sbr.rel (%p1511_p6) target bundleno = 649 (0x289), region = 110  ;;  %s5073_s14 = sand.u32 (!%p1511_p6), 7, %s5069_s21  }
 0x1eb   : > { %p1560_p5 = scmp.eq.s32.totalorder (!%p1511_p6), %s5073_s14, 0  ;;  %p2301_p7 = scmp.ne.s32.totalorder (!%p1511_p6), %s5073_s14, 0 }
 0x1f1   : > { %1563 = sbr.rel (%p2301_p7) target bundleno = 564 (0x234), region = 125  ;;  %s1564_s15 = sshrl.u32 (!%p2301_p7), %s5069_s21, 3 }
 0x1f2   : > { %s5080_s23 = sshrl.u32 (!%p2301_p7), %s1564_s15, 2 }
 0x1f3   : > { %p2302_p8 = scmp.le.s32.totalorder (!%p2301_p7), %s5080_s23, 0 }
 0x1f8   : > { %2183 = sbr.rel (%p2302_p8) target bundleno = 544 (0x220), region = 273  ;;  %s6186_s10 = smov (!%p2302_p8), %s5067_s19 }
 0x1f9   : > { %s6187_s6 = smov (!%p2302_p8), %s4525_s12  ;;  %s5089_s25 = smov (!%p2302_p8), 0  }
 0x1fa   : > { %s5091_s11 = smov (!%p2302_p8), 0  }
 0x1ff LB: >> { %v1577_v10 = vld [vmem:[%s2908_s6] sm:$0xff]  ;;  %v1579_v23 = vld [vmem:[%s2908_s6 + $0x8] sm:$0xff]  ;;  %v1581_v33 = vld [vmem:[%s2908_s6 + $0x10] sm:$0xff]  ;;  %s1705_s22 = sadd.s32 1, %s2912_s25  ;;  %s1571_s11 = sadd.s32 1, %s2916_s11   ;;  %s2916_s11 = sphi %s5091_s11, %s1571_s11   ;;  %s2912_s25 = sphi %s5089_s25, %s6190_s25   ;;  %s2908_s6 = sphi %s6187_s6, %s6189_s6   ;;  %s2904_s10 = sphi %s6186_s10, %s6188_s10  }
 0x200   : >> { %1578 = vst [vmem:[%s2904_s10] sm:$0xff] %v1577_v10  ;;  %1580 = vst [vmem:[%s2904_s10 + $0x8] sm:$0xff] %v1579_v23  ;;  %v1583_v24 = vld [vmem:[%s2908_s6 + $0x18] sm:$0xff]  ;;  %v1585_v39 = vld [vmem:[%s2908_s6 + $0x48] sm:$0xff]  ;;  %p1706_p9 = scmp.ge.s32.totalorder %s1705_s22, %s5080_s23  ;;  %p1570_p10 = scmp.ge.s32.totalorder %s1571_s11, %s5080_s23 }
 0x201   : >> { %1582 = vst [vmem:[%s2904_s10 + $0x10] sm:$0xff] %v1581_v33  ;;  %v1587_v42 = vld [vmem:[%s2908_s6 + $0x50] sm:$0xff]  ;;  %1584 = vst [vmem:[%s2904_s10 + $0x18] sm:$0xff] %v1583_v24  ;;  %v1589_v43 = vld [vmem:[%s2908_s6 + $0x58] sm:$0xff] }
 0x202   : >> { %1586 = vst [vmem:[%s2904_s10 + $0x50] sm:$0xff] %v1585_v39  ;;  %1588 = vst [vmem:[%s2904_s10 + $0x58] sm:$0xff] %v1587_v42  ;;  %v1591_v17 = vld [vmem:[%s2908_s6 + $0x60] sm:$0xff]  ;;  %v1593_v35 = vld [vmem:[%s2908_s6 + $0x90] sm:$0xff]  ;;  %s6229_s22 = smov (%p1706_p9, %s1705_s22), 0 }
 0x203   : >> { %1590 = vst [vmem:[%s2904_s10 + $0x60] sm:$0xff] %v1589_v43  ;;  %1592 = vst [vmem:[%s2904_s10 + $0x68] sm:$0xff] %v1591_v17  ;;  %v1595_v25 = vld [vmem:[%s2908_s6 + $0x98] sm:$0xff]  ;;  %v1597_v27 = vld [vmem:[%s2908_s6 + $0xa0] sm:$0xff]  ;;  %s2303_s5 = sshll.u32 %s6229_s22, 5  ;;  %s6190_s25 = smov %s6229_s22 }
 0x204   : >> { %1594 = vst [vmem:[%s2904_s10 + $0xa0] sm:$0xff] %v1593_v35  ;;  %v1599_v57 = vld [vmem:[%s2908_s6 + $0xa8] sm:$0xff]  ;;  %1596 = vst [vmem:[%s2904_s10 + $0xa8] sm:$0xff] %v1595_v25  ;;  %v1601_v31 = vld [vmem:[%s2908_s6 + $0xd8] sm:$0xff]  ;;  %s5147_s30 = scalar_lea.vmem %s4525_s12, %s2303_s5 [#allocation3]   ;;  %s5150_s26 = scalar_lea.vmem %s5067_s19, %s2303_s5  }
 0x205   : >> { %1598 = vst [vmem:[%s2904_s10 + $0xb0] sm:$0xff] %v1597_v27  ;;  %1600 = vst [vmem:[%s2904_s10 + $0xb8] sm:$0xff] %v1599_v57  ;;  %v1603_v45 = vld [vmem:[%s2908_s6 + $0xe0] sm:$0xff]  ;;  %v1605_v40 = vld [vmem:[%s2908_s6 + $0xe8] sm:$0xff] }
 0x206   : >> { %1602 = vst [vmem:[%s2904_s10 + $0xf0] sm:$0xff] %v1601_v31  ;;  %1604 = vst [vmem:[%s2904_s10 + $0xf8] sm:$0xff] %v1603_v45  ;;  %v1607_v6 = vld [vmem:[%s2908_s6 + $0xf0] sm:$0xff]  ;;  %v1609_v46 = vld [vmem:[%s2908_s6 + $0x120] sm:$0xff] }
 0x207   : >> { %1606 = vst [vmem:[%s2904_s10 + $0x100] sm:$0xff] %v1605_v40  ;;  %v1611_v47 = vld [vmem:[%s2908_s6 + $0x128] sm:$0xff]  ;;  %1608 = vst [vmem:[%s2904_s10 + $0x108] sm:$0xff] %v1607_v6  ;;  %v1613_v18 = vld [vmem:[%s2908_s6 + $0x130] sm:$0xff] }
 0x208   : >> { %1610 = vst [vmem:[%s2904_s10 + $0x140] sm:$0xff] %v1609_v46  ;;  %1612 = vst [vmem:[%s2904_s10 + $0x148] sm:$0xff] %v1611_v47  ;;  %v1615_v29 = vld [vmem:[%s2908_s6 + $0x138] sm:$0xff]  ;;  %v1617_v48 = vld [vmem:[%s2908_s6 + $0x168] sm:$0xff] }
 0x209   : >> { %1614 = vst [vmem:[%s2904_s10 + $0x150] sm:$0xff] %v1613_v18  ;;  %1616 = vst [vmem:[%s2904_s10 + $0x158] sm:$0xff] %v1615_v29  ;;  %v1619_v11 = vld [vmem:[%s2908_s6 + $0x170] sm:$0xff]  ;;  %v1621_v51 = vld [vmem:[%s2908_s6 + $0x178] sm:$0xff] }
 0x20a   : >> { %1618 = vst [vmem:[%s2904_s10 + $0x190] sm:$0xff] %v1617_v48  ;;  %v1623_v34 = vld [vmem:[%s2908_s6 + $0x180] sm:$0xff]  ;;  %1620 = vst [vmem:[%s2904_s10 + $0x198] sm:$0xff] %v1619_v11  ;;  %v1625_v38 = vld [vmem:[%s2908_s6 + $0x1b0] sm:$0xff] }
 0x20b   : >> { %1622 = vst [vmem:[%s2904_s10 + $0x1a0] sm:$0xff] %v1621_v51  ;;  %1624 = vst [vmem:[%s2904_s10 + $0x1a8] sm:$0xff] %v1623_v34  ;;  %v1627_v12 = vld [vmem:[%s2908_s6 + $0x1b8] sm:$0xff]  ;;  %v1629_v50 = vld [vmem:[%s2908_s6 + $0x1c0] sm:$0xff] }
 0x20c   : >> { %1626 = vst [vmem:[%s2904_s10 + $0x1e0] sm:$0xff] %v1625_v38  ;;  %1628 = vst [vmem:[%s2904_s10 + $0x1e8] sm:$0xff] %v1627_v12  ;;  %v1631_v52 = vld [vmem:[%s2908_s6 + $0x1c8] sm:$0xff]  ;;  %v1633_v53 = vld [vmem:[%s2908_s6 + $0x1f8] sm:$0xff] }
 0x20d   : >> { %1630 = vst [vmem:[%s2904_s10 + $0x1f0] sm:$0xff] %v1629_v50  ;;  %v1635_v30 = vld [vmem:[%s2908_s6 + $0x200] sm:$0xff]  ;;  %1632 = vst [vmem:[%s2904_s10 + $0x1f8] sm:$0xff] %v1631_v52  ;;  %v1637_v37 = vld [vmem:[%s2908_s6 + $0x208] sm:$0xff] }
 0x20e   : >> { %1634 = vst [vmem:[%s2904_s10 + $0x230] sm:$0xff] %v1633_v53  ;;  %1636 = vst [vmem:[%s2904_s10 + $0x238] sm:$0xff] %v1635_v30  ;;  %v1639_v54 = vld [vmem:[%s2908_s6 + $0x210] sm:$0xff]  ;;  %v1641_v1 = vld [vmem:[%s2908_s6 + $0x240] sm:$0xff] }
 0x20f   : >> { %1638 = vst [vmem:[%s2904_s10 + $0x240] sm:$0xff] %v1637_v37  ;;  %1640 = vst [vmem:[%s2904_s10 + $0x248] sm:$0xff] %v1639_v54  ;;  %v1643_v2 = vld [vmem:[%s2908_s6 + $0x248] sm:$0xff]  ;;  %v1645_v49 = vld [vmem:[%s2908_s6 + $0x250] sm:$0xff] }
 0x210   : >> { %1642 = vst [vmem:[%s2904_s10 + $0x280] sm:$0xff] %v1641_v1  ;;  %v1647_v56 = vld [vmem:[%s2908_s6 + $0x258] sm:$0xff]  ;;  %1644 = vst [vmem:[%s2904_s10 + $0x288] sm:$0xff] %v1643_v2  ;;  %v1649_v28 = vld [vmem:[%s2908_s6 + $0x288] sm:$0xff] }
 0x211   : >> { %1646 = vst [vmem:[%s2904_s10 + $0x290] sm:$0xff] %v1645_v49  ;;  %1648 = vst [vmem:[%s2904_s10 + $0x298] sm:$0xff] %v1647_v56  ;;  %v1651_v13 = vld [vmem:[%s2908_s6 + $0x290] sm:$0xff]  ;;  %v1653_v63 = vld [vmem:[%s2908_s6 + $0x298] sm:$0xff] }
 0x212   : >> { %1650 = vst [vmem:[%s2904_s10 + $0x2d0] sm:$0xff] %v1649_v28  ;;  %1652 = vst [vmem:[%s2904_s10 + $0x2d8] sm:$0xff] %v1651_v13  ;;  %v1655_v59 = vld [vmem:[%s2908_s6 + $0x2a0] sm:$0xff]  ;;  %v1657_v60 = vld [vmem:[%s2908_s6 + $0x2d0] sm:$0xff] }
 0x213   : >> { %1654 = vst [vmem:[%s2904_s10 + $0x2e0] sm:$0xff] %v1653_v63  ;;  %v1659_v14 = vld [vmem:[%s2908_s6 + $0x2d8] sm:$0xff]  ;;  %1656 = vst [vmem:[%s2904_s10 + $0x2e8] sm:$0xff] %v1655_v59  ;;  %v1661_v55 = vld [vmem:[%s2908_s6 + $0x2e0] sm:$0xff] }
 0x214   : >> { %1658 = vst [vmem:[%s2904_s10 + $0x320] sm:$0xff] %v1657_v60  ;;  %1660 = vst [vmem:[%s2904_s10 + $0x328] sm:$0xff] %v1659_v14  ;;  %v1663_v32 = vld [vmem:[%s2908_s6 + $0x2e8] sm:$0xff]  ;;  %v1665_v61 = vld [vmem:[%s2908_s6 + $0x318] sm:$0xff] }
 0x215   : >> { %1662 = vst [vmem:[%s2904_s10 + $0x330] sm:$0xff] %v1661_v55  ;;  %1664 = vst [vmem:[%s2904_s10 + $0x338] sm:$0xff] %v1663_v32  ;;  %v1667_v62 = vld [vmem:[%s2908_s6 + $0x320] sm:$0xff]  ;;  %v1669_v20 = vld [vmem:[%s2908_s6 + $0x328] sm:$0xff] }
 0x216   : >> { %1666 = vst [vmem:[%s2904_s10 + $0x370] sm:$0xff] %v1665_v61  ;;  %v1671_v3 = vld [vmem:[%s2908_s6 + $0x330] sm:$0xff]  ;;  %1668 = vst [vmem:[%s2904_s10 + $0x378] sm:$0xff] %v1667_v62  ;;  %v1673_v4 = vld [vmem:[%s2908_s6 + $0x360] sm:$0xff] }
 0x217   : >> { %1670 = vst [vmem:[%s2904_s10 + $0x380] sm:$0xff] %v1669_v20  ;;  %1672 = vst [vmem:[%s2904_s10 + $0x388] sm:$0xff] %v1671_v3  ;;  %v1675_v8 = vld [vmem:[%s2908_s6 + $0x368] sm:$0xff]  ;;  %v1677_v5 = vld [vmem:[%s2908_s6 + $0x370] sm:$0xff] }
 0x218   : >> { %1674 = vst [vmem:[%s2904_s10 + $0x3c0] sm:$0xff] %v1673_v4  ;;  %1676 = vst [vmem:[%s2904_s10 + $0x3c8] sm:$0xff] %v1675_v8  ;;  %v1679_v7 = vld [vmem:[%s2908_s6 + $0x378] sm:$0xff]  ;;  %v1681_v19 = vld [vmem:[%s2908_s6 + $0x3a8] sm:$0xff] }
 0x219   : >> { %1678 = vst [vmem:[%s2904_s10 + $0x3d0] sm:$0xff] %v1677_v5  ;;  %v1683_v21 = vld [vmem:[%s2908_s6 + $0x3b0] sm:$0xff]  ;;  %1680 = vst [vmem:[%s2904_s10 + $0x3d8] sm:$0xff] %v1679_v7  ;;  %v1685_v36 = vld [vmem:[%s2908_s6 + $0x3b8] sm:$0xff]  ;;  %1573 = sbr.rel (!%p1570_p10) target bundleno = 511 (0x1ff), region = 279 }
 0x21a   : >> { %1682 = vst [vmem:[%s2904_s10 + $0x410] sm:$0xff] %v1681_v19  ;;  %1684 = vst [vmem:[%s2904_s10 + $0x418] sm:$0xff] %v1683_v21  ;;  %v1687_v15 = vld [vmem:[%s2908_s6 + $0x3c0] sm:$0xff]  ;;  %v1689_v44 = vld [vmem:[%s2908_s6 + $0x3f0] sm:$0xff] }
 0x21b   : >> { %1686 = vst [vmem:[%s2904_s10 + $0x420] sm:$0xff] %v1685_v36  ;;  %1688 = vst [vmem:[%s2904_s10 + $0x428] sm:$0xff] %v1687_v15  ;;  %v1691_v16 = vld [vmem:[%s2908_s6 + $0x3f8] sm:$0xff]  ;;  %v1693_v0 = vld [vmem:[%s2908_s6 + $0x400] sm:$0xff] }
 0x21c   : >> { %1690 = vst [vmem:[%s2904_s10 + $0x460] sm:$0xff] %v1689_v44  ;;  %v1695_v22 = vld [vmem:[%s2908_s6 + $0x408] sm:$0xff]  ;;  %1692 = vst [vmem:[%s2904_s10 + $0x468] sm:$0xff] %v1691_v16  ;;  %v1697_v58 = vld [vmem:[%s2908_s6 + $0x438] sm:$0xff] }
 0x21d   : >> { %1694 = vst [vmem:[%s2904_s10 + $0x470] sm:$0xff] %v1693_v0  ;;  %1696 = vst [vmem:[%s2904_s10 + $0x478] sm:$0xff] %v1695_v22  ;;  %v1699_v26 = vld [vmem:[%s2908_s6 + $0x440] sm:$0xff]  ;;  %v1701_v41 = vld [vmem:[%s2908_s6 + $0x448] sm:$0xff] }
 0x21e   : >> { %1698 = vst [vmem:[%s2904_s10 + $0x4b0] sm:$0xff] %v1697_v58  ;;  %1700 = vst [vmem:[%s2904_s10 + $0x4b8] sm:$0xff] %v1699_v26  ;;  %v1703_v9 = vld [vmem:[%s2908_s6 + $0x450] sm:$0xff]  ;;  %s6189_s6 = smov %s5147_s30 }
 0x21f   : >> { %1702 = vst [vmem:[%s2904_s10 + $0x4c0] sm:$0xff] %v1701_v41  ;;  %1704 = vst [vmem:[%s2904_s10 + $0x4c8] sm:$0xff] %v1703_v9  ;;  %s6188_s10 = smov %s5150_s26 }
 0x220 PF: > { %s5256_s0 = sand.u32 3, %s1564_s15   ;;  %s2327_s9 = sshll.u32 %s5080_s23, 9 }
 0x221   : > { %s1716_s8 = sshra.s32 %s2327_s9, 4  ;;  %p2308_p11 = scmp.le.s32.totalorder %s5256_s0, 0 }
 0x222   : > { %s5260_s28 = scalar_lea.vmem %s4525_s12, %s1716_s8 [#allocation3]   ;;  %s5263_s20 = scalar_lea.vmem %s5067_s19, %s1716_s8  }
 0x223   : > { %2197 = sbr.rel (%p2308_p11) target bundleno = 564 (0x234), region = 284  ;;  %s6191_s7 = smov (!%p2308_p11), %s5263_s20 }
 0x224   : > { %s6192_s4 = smov (!%p2308_p11), %s5260_s28  ;;  %s5272_s29 = smov (!%p2308_p11), 0  }
 0x225   : > { %s5274_s24 = smov (!%p2308_p11), 0  }
 0x22a LB: >> { %v1732_v10 = vld [vmem:[%s2924_s4] sm:$0xff]  ;;  %v1734_v23 = vld [vmem:[%s2924_s4 + $0x48] sm:$0xff]  ;;  %v1736_v33 = vld [vmem:[%s2924_s4 + $0x90] sm:$0xff]  ;;  %s1764_s15 = sadd.s32 1, %s2928_s29  ;;  %s1726_s24 = sadd.s32 1, %s2932_s24   ;;  %s2932_s24 = sphi %s5274_s24, %s1726_s24   ;;  %s2928_s29 = sphi %s5272_s29, %s6193_s29   ;;  %s2924_s4 = sphi %s6192_s4, %s1769_s4   ;;  %s2920_s7 = sphi %s6191_s7, %s1770_s7  }
 0x22b   : >> { %1733 = vst [vmem:[%s2920_s7] sm:$0xff] %v1732_v10  ;;  %1735 = vst [vmem:[%s2920_s7 + $0x50] sm:$0xff] %v1734_v23  ;;  %v1738_v24 = vld [vmem:[%s2924_s4 + $0xd8] sm:$0xff]  ;;  %v1740_v39 = vld [vmem:[%s2924_s4 + $0x120] sm:$0xff]  ;;  %p1765_p12 = scmp.ge.s32.totalorder %s1764_s15, %s5256_s0  ;;  %p1725_p13 = scmp.ge.s32.totalorder %s1726_s24, %s5256_s0 }
 0x22c   : >> { %1737 = vst [vmem:[%s2920_s7 + $0xa0] sm:$0xff] %v1736_v33  ;;  %v1742_v42 = vld [vmem:[%s2924_s4 + $0x168] sm:$0xff]  ;;  %1739 = vst [vmem:[%s2920_s7 + $0xf0] sm:$0xff] %v1738_v24  ;;  %v1744_v43 = vld [vmem:[%s2924_s4 + $0x1b0] sm:$0xff] }
 0x22d   : >> { %1741 = vst [vmem:[%s2920_s7 + $0x140] sm:$0xff] %v1740_v39  ;;  %1743 = vst [vmem:[%s2920_s7 + $0x190] sm:$0xff] %v1742_v42  ;;  %v1746_v17 = vld [vmem:[%s2924_s4 + $0x1f8] sm:$0xff]  ;;  %v1748_v35 = vld [vmem:[%s2924_s4 + $0x240] sm:$0xff]  ;;  %s6231_s15 = smov (%p1765_p12, %s1764_s15), 0  ;;  %1728 = sbr.rel (!%p1725_p13) target bundleno = 554 (0x22a), region = 290 }
 0x22e   : >> { %1745 = vst [vmem:[%s2920_s7 + $0x1e0] sm:$0xff] %v1744_v43  ;;  %1747 = vst [vmem:[%s2920_s7 + $0x230] sm:$0xff] %v1746_v17  ;;  %v1750_v25 = vld [vmem:[%s2924_s4 + $0x288] sm:$0xff]  ;;  %v1752_v27 = vld [vmem:[%s2924_s4 + $0x2d0] sm:$0xff]  ;;  %s2309_s23 = sshll.u32 %s6231_s15, 3  ;;  %s6193_s29 = smov %s6231_s15 }
 0x22f   : >> { %1749 = vst [vmem:[%s2920_s7 + $0x280] sm:$0xff] %v1748_v35  ;;  %v1754_v57 = vld [vmem:[%s2924_s4 + $0x318] sm:$0xff]  ;;  %1751 = vst [vmem:[%s2920_s7 + $0x2d0] sm:$0xff] %v1750_v25  ;;  %v1756_v31 = vld [vmem:[%s2924_s4 + $0x360] sm:$0xff] }
 0x230   : >> { %1753 = vst [vmem:[%s2920_s7 + $0x320] sm:$0xff] %v1752_v27  ;;  %1755 = vst [vmem:[%s2920_s7 + $0x370] sm:$0xff] %v1754_v57  ;;  %v1758_v45 = vld [vmem:[%s2924_s4 + $0x3a8] sm:$0xff]  ;;  %v1760_v40 = vld [vmem:[%s2924_s4 + $0x3f0] sm:$0xff] }
 0x231   : >> { %1757 = vst [vmem:[%s2920_s7 + $0x3c0] sm:$0xff] %v1756_v31  ;;  %1759 = vst [vmem:[%s2920_s7 + $0x410] sm:$0xff] %v1758_v45  ;;  %v1762_v6 = vld [vmem:[%s2924_s4 + $0x438] sm:$0xff]  ;;  %s1769_s4 = scalar_lea.vmem %s5260_s28, %s2309_s23 [#allocation3]  }
 0x232   : >> { %1761 = vst [vmem:[%s2920_s7 + $0x460] sm:$0xff] %v1760_v40  ;;  %1763 = vst [vmem:[%s2920_s7 + $0x4b0] sm:$0xff] %v1762_v6  ;;  %s1770_s7 = scalar_lea.vmem %s5263_s20, %s2309_s23  }
 0x234 PF: > { %1773 = sbr.rel (%p1560_p5) target bundleno = 649 (0x289), region = 143  ;;  %s1775_s10 = ssub.s32 (!%p1560_p5), %s5069_s21, %s5073_s14 }
 0x235   : > { %s1779_s6 = sshrl.u32 (!%p1560_p5), %s5069_s21, 3  ;;  %s5337_s25 = scalar_lea.vmem (!%p1560_p5), %s4525_s12, %s1775_s10 [#allocation3] }
 0x236   : > { %s5340_s11 = scalar_lea.vmem (!%p1560_p5), %s5067_s19, %s1775_s10  ;;  %s5344_s22 = sshrl.u32 (!%p1560_p5), %s1779_s6, 2 }
 0x237   : > { %p2311_p0 = scmp.le.s32.totalorder (!%p1560_p5), %s5344_s22, 0 }
 0x23b   : > { %2211 = sbr.rel (%p2311_p0) target bundleno = 611 (0x263), region = 295  ;;  %s6194_s5 = smov (!%p2311_p0), %s5067_s19 }
 0x23c   : > { %s6195_s30 = smov (!%p2311_p0), %s4525_s12  ;;  %s5353_s26 = smov (!%p2311_p0), 0  }
 0x23d   : > { %s5355_s0 = smov (!%p2311_p0), 0  }
 0x242 LB: >> { %v1792_v46 = vld [vmem:[%s2940_s30] sm:$0xff]  ;;  %v1794_v47 = vld [vmem:[%s2940_s30 + $0x8] sm:$0xff]  ;;  %v1796_v18 = vld [vmem:[%s2940_s30 + $0x10] sm:$0xff]  ;;  %s1920_s9 = sadd.s32 1, %s2944_s26  ;;  %s1786_s0 = sadd.s32 1, %s2948_s0   ;;  %s2948_s0 = sphi %s5355_s0, %s1786_s0   ;;  %s2944_s26 = sphi %s5353_s26, %s6198_s26   ;;  %s2940_s30 = sphi %s6195_s30, %s6197_s30   ;;  %s2936_s5 = sphi %s6194_s5, %s6196_s5  }
 0x243   : >> { %1793 = vst [vmem:[%s2936_s5] sm:$0xff] %v1792_v46  ;;  %1795 = vst [vmem:[%s2936_s5 + $0x8] sm:$0xff] %v1794_v47  ;;  %v1798_v29 = vld [vmem:[%s2940_s30 + $0x18] sm:$0xff]  ;;  %v1800_v48 = vld [vmem:[%s2940_s30 + $0x48] sm:$0xff]  ;;  %p1921_p1 = scmp.ge.s32.totalorder %s1920_s9, %s5344_s22  ;;  %p1785_p2 = scmp.ge.s32.totalorder %s1786_s0, %s5344_s22 }
 0x244   : >> { %1797 = vst [vmem:[%s2936_s5 + $0x10] sm:$0xff] %v1796_v18  ;;  %v1802_v11 = vld [vmem:[%s2940_s30 + $0x50] sm:$0xff]  ;;  %1799 = vst [vmem:[%s2936_s5 + $0x18] sm:$0xff] %v1798_v29  ;;  %v1804_v51 = vld [vmem:[%s2940_s30 + $0x58] sm:$0xff] }
 0x245   : >> { %1801 = vst [vmem:[%s2936_s5 + $0x50] sm:$0xff] %v1800_v48  ;;  %1803 = vst [vmem:[%s2936_s5 + $0x58] sm:$0xff] %v1802_v11  ;;  %v1806_v34 = vld [vmem:[%s2940_s30 + $0x60] sm:$0xff]  ;;  %v1808_v38 = vld [vmem:[%s2940_s30 + $0x90] sm:$0xff]  ;;  %s6233_s9 = smov (%p1921_p1, %s1920_s9), 0 }
 0x246   : >> { %1805 = vst [vmem:[%s2936_s5 + $0x60] sm:$0xff] %v1804_v51  ;;  %1807 = vst [vmem:[%s2936_s5 + $0x68] sm:$0xff] %v1806_v34  ;;  %v1810_v12 = vld [vmem:[%s2940_s30 + $0x98] sm:$0xff]  ;;  %v1812_v50 = vld [vmem:[%s2940_s30 + $0xa0] sm:$0xff]  ;;  %s2312_s8 = sshll.u32 %s6233_s9, 5  ;;  %s6198_s26 = smov %s6233_s9 }
 0x247   : >> { %1809 = vst [vmem:[%s2936_s5 + $0xa0] sm:$0xff] %v1808_v38  ;;  %v1814_v52 = vld [vmem:[%s2940_s30 + $0xa8] sm:$0xff]  ;;  %1811 = vst [vmem:[%s2936_s5 + $0xa8] sm:$0xff] %v1810_v12  ;;  %v1816_v53 = vld [vmem:[%s2940_s30 + $0xd8] sm:$0xff]  ;;  %s5411_s28 = scalar_lea.vmem %s4525_s12, %s2312_s8 [#allocation3]   ;;  %s5414_s20 = scalar_lea.vmem %s5067_s19, %s2312_s8  }
 0x248   : >> { %1813 = vst [vmem:[%s2936_s5 + $0xb0] sm:$0xff] %v1812_v50  ;;  %1815 = vst [vmem:[%s2936_s5 + $0xb8] sm:$0xff] %v1814_v52  ;;  %v1818_v30 = vld [vmem:[%s2940_s30 + $0xe0] sm:$0xff]  ;;  %v1820_v37 = vld [vmem:[%s2940_s30 + $0xe8] sm:$0xff] }
 0x249   : >> { %1817 = vst [vmem:[%s2936_s5 + $0xf0] sm:$0xff] %v1816_v53  ;;  %1819 = vst [vmem:[%s2936_s5 + $0xf8] sm:$0xff] %v1818_v30  ;;  %v1822_v54 = vld [vmem:[%s2940_s30 + $0xf0] sm:$0xff]  ;;  %v1824_v1 = vld [vmem:[%s2940_s30 + $0x120] sm:$0xff] }
 0x24a   : >> { %1821 = vst [vmem:[%s2936_s5 + $0x100] sm:$0xff] %v1820_v37  ;;  %v1826_v2 = vld [vmem:[%s2940_s30 + $0x128] sm:$0xff]  ;;  %1823 = vst [vmem:[%s2936_s5 + $0x108] sm:$0xff] %v1822_v54  ;;  %v1828_v49 = vld [vmem:[%s2940_s30 + $0x130] sm:$0xff] }
 0x24b   : >> { %1825 = vst [vmem:[%s2936_s5 + $0x140] sm:$0xff] %v1824_v1  ;;  %1827 = vst [vmem:[%s2936_s5 + $0x148] sm:$0xff] %v1826_v2  ;;  %v1830_v56 = vld [vmem:[%s2940_s30 + $0x138] sm:$0xff]  ;;  %v1832_v28 = vld [vmem:[%s2940_s30 + $0x168] sm:$0xff] }
 0x24c   : >> { %1829 = vst [vmem:[%s2936_s5 + $0x150] sm:$0xff] %v1828_v49  ;;  %1831 = vst [vmem:[%s2936_s5 + $0x158] sm:$0xff] %v1830_v56  ;;  %v1834_v13 = vld [vmem:[%s2940_s30 + $0x170] sm:$0xff]  ;;  %v1836_v63 = vld [vmem:[%s2940_s30 + $0x178] sm:$0xff] }
 0x24d   : >> { %1833 = vst [vmem:[%s2936_s5 + $0x190] sm:$0xff] %v1832_v28  ;;  %v1838_v59 = vld [vmem:[%s2940_s30 + $0x180] sm:$0xff]  ;;  %1835 = vst [vmem:[%s2936_s5 + $0x198] sm:$0xff] %v1834_v13  ;;  %v1840_v60 = vld [vmem:[%s2940_s30 + $0x1b0] sm:$0xff] }
 0x24e   : >> { %1837 = vst [vmem:[%s2936_s5 + $0x1a0] sm:$0xff] %v1836_v63  ;;  %1839 = vst [vmem:[%s2936_s5 + $0x1a8] sm:$0xff] %v1838_v59  ;;  %v1842_v14 = vld [vmem:[%s2940_s30 + $0x1b8] sm:$0xff]  ;;  %v1844_v55 = vld [vmem:[%s2940_s30 + $0x1c0] sm:$0xff] }
 0x24f   : >> { %1841 = vst [vmem:[%s2936_s5 + $0x1e0] sm:$0xff] %v1840_v60  ;;  %1843 = vst [vmem:[%s2936_s5 + $0x1e8] sm:$0xff] %v1842_v14  ;;  %v1846_v32 = vld [vmem:[%s2940_s30 + $0x1c8] sm:$0xff]  ;;  %v1848_v61 = vld [vmem:[%s2940_s30 + $0x1f8] sm:$0xff] }
 0x250   : >> { %1845 = vst [vmem:[%s2936_s5 + $0x1f0] sm:$0xff] %v1844_v55  ;;  %v1850_v62 = vld [vmem:[%s2940_s30 + $0x200] sm:$0xff]  ;;  %1847 = vst [vmem:[%s2936_s5 + $0x1f8] sm:$0xff] %v1846_v32  ;;  %v1852_v20 = vld [vmem:[%s2940_s30 + $0x208] sm:$0xff] }
 0x251   : >> { %1849 = vst [vmem:[%s2936_s5 + $0x230] sm:$0xff] %v1848_v61  ;;  %1851 = vst [vmem:[%s2936_s5 + $0x238] sm:$0xff] %v1850_v62  ;;  %v1854_v3 = vld [vmem:[%s2940_s30 + $0x210] sm:$0xff]  ;;  %v1856_v4 = vld [vmem:[%s2940_s30 + $0x240] sm:$0xff] }
 0x252   : >> { %1853 = vst [vmem:[%s2936_s5 + $0x240] sm:$0xff] %v1852_v20  ;;  %1855 = vst [vmem:[%s2936_s5 + $0x248] sm:$0xff] %v1854_v3  ;;  %v1858_v8 = vld [vmem:[%s2940_s30 + $0x248] sm:$0xff]  ;;  %v1860_v5 = vld [vmem:[%s2940_s30 + $0x250] sm:$0xff] }
 0x253   : >> { %1857 = vst [vmem:[%s2936_s5 + $0x280] sm:$0xff] %v1856_v4  ;;  %v1862_v7 = vld [vmem:[%s2940_s30 + $0x258] sm:$0xff]  ;;  %1859 = vst [vmem:[%s2936_s5 + $0x288] sm:$0xff] %v1858_v8  ;;  %v1864_v19 = vld [vmem:[%s2940_s30 + $0x288] sm:$0xff] }
 0x254   : >> { %1861 = vst [vmem:[%s2936_s5 + $0x290] sm:$0xff] %v1860_v5  ;;  %1863 = vst [vmem:[%s2936_s5 + $0x298] sm:$0xff] %v1862_v7  ;;  %v1866_v21 = vld [vmem:[%s2940_s30 + $0x290] sm:$0xff]  ;;  %v1868_v36 = vld [vmem:[%s2940_s30 + $0x298] sm:$0xff] }
 0x255   : >> { %1865 = vst [vmem:[%s2936_s5 + $0x2d0] sm:$0xff] %v1864_v19  ;;  %1867 = vst [vmem:[%s2936_s5 + $0x2d8] sm:$0xff] %v1866_v21  ;;  %v1870_v15 = vld [vmem:[%s2940_s30 + $0x2a0] sm:$0xff]  ;;  %v1872_v44 = vld [vmem:[%s2940_s30 + $0x2d0] sm:$0xff] }
 0x256   : >> { %1869 = vst [vmem:[%s2936_s5 + $0x2e0] sm:$0xff] %v1868_v36  ;;  %v1874_v16 = vld [vmem:[%s2940_s30 + $0x2d8] sm:$0xff]  ;;  %1871 = vst [vmem:[%s2936_s5 + $0x2e8] sm:$0xff] %v1870_v15  ;;  %v1876_v0 = vld [vmem:[%s2940_s30 + $0x2e0] sm:$0xff] }
 0x257   : >> { %1873 = vst [vmem:[%s2936_s5 + $0x320] sm:$0xff] %v1872_v44  ;;  %1875 = vst [vmem:[%s2936_s5 + $0x328] sm:$0xff] %v1874_v16  ;;  %v1878_v22 = vld [vmem:[%s2940_s30 + $0x2e8] sm:$0xff]  ;;  %v1880_v58 = vld [vmem:[%s2940_s30 + $0x318] sm:$0xff] }
 0x258   : >> { %1877 = vst [vmem:[%s2936_s5 + $0x330] sm:$0xff] %v1876_v0  ;;  %1879 = vst [vmem:[%s2936_s5 + $0x338] sm:$0xff] %v1878_v22  ;;  %v1882_v26 = vld [vmem:[%s2940_s30 + $0x320] sm:$0xff]  ;;  %v1884_v41 = vld [vmem:[%s2940_s30 + $0x328] sm:$0xff] }
 0x259   : >> { %1881 = vst [vmem:[%s2936_s5 + $0x370] sm:$0xff] %v1880_v58  ;;  %v1886_v9 = vld [vmem:[%s2940_s30 + $0x330] sm:$0xff]  ;;  %1883 = vst [vmem:[%s2936_s5 + $0x378] sm:$0xff] %v1882_v26  ;;  %v1888_v10 = vld [vmem:[%s2940_s30 + $0x360] sm:$0xff] }
 0x25a   : >> { %1885 = vst [vmem:[%s2936_s5 + $0x380] sm:$0xff] %v1884_v41  ;;  %1887 = vst [vmem:[%s2936_s5 + $0x388] sm:$0xff] %v1886_v9  ;;  %v1890_v23 = vld [vmem:[%s2940_s30 + $0x368] sm:$0xff]  ;;  %v1892_v33 = vld [vmem:[%s2940_s30 + $0x370] sm:$0xff] }
 0x25b   : >> { %1889 = vst [vmem:[%s2936_s5 + $0x3c0] sm:$0xff] %v1888_v10  ;;  %1891 = vst [vmem:[%s2936_s5 + $0x3c8] sm:$0xff] %v1890_v23  ;;  %v1894_v24 = vld [vmem:[%s2940_s30 + $0x378] sm:$0xff]  ;;  %v1896_v39 = vld [vmem:[%s2940_s30 + $0x3a8] sm:$0xff] }
 0x25c   : >> { %1893 = vst [vmem:[%s2936_s5 + $0x3d0] sm:$0xff] %v1892_v33  ;;  %v1898_v42 = vld [vmem:[%s2940_s30 + $0x3b0] sm:$0xff]  ;;  %1895 = vst [vmem:[%s2936_s5 + $0x3d8] sm:$0xff] %v1894_v24  ;;  %v1900_v43 = vld [vmem:[%s2940_s30 + $0x3b8] sm:$0xff]  ;;  %1788 = sbr.rel (!%p1785_p2) target bundleno = 578 (0x242), region = 301 }
 0x25d   : >> { %1897 = vst [vmem:[%s2936_s5 + $0x410] sm:$0xff] %v1896_v39  ;;  %1899 = vst [vmem:[%s2936_s5 + $0x418] sm:$0xff] %v1898_v42  ;;  %v1902_v17 = vld [vmem:[%s2940_s30 + $0x3c0] sm:$0xff]  ;;  %v1904_v35 = vld [vmem:[%s2940_s30 + $0x3f0] sm:$0xff] }
 0x25e   : >> { %1901 = vst [vmem:[%s2936_s5 + $0x420] sm:$0xff] %v1900_v43  ;;  %1903 = vst [vmem:[%s2936_s5 + $0x428] sm:$0xff] %v1902_v17  ;;  %v1906_v25 = vld [vmem:[%s2940_s30 + $0x3f8] sm:$0xff]  ;;  %v1908_v27 = vld [vmem:[%s2940_s30 + $0x400] sm:$0xff] }
 0x25f   : >> { %1905 = vst [vmem:[%s2936_s5 + $0x460] sm:$0xff] %v1904_v35  ;;  %v1910_v57 = vld [vmem:[%s2940_s30 + $0x408] sm:$0xff]  ;;  %1907 = vst [vmem:[%s2936_s5 + $0x468] sm:$0xff] %v1906_v25  ;;  %v1912_v31 = vld [vmem:[%s2940_s30 + $0x438] sm:$0xff] }
 0x260   : >> { %1909 = vst [vmem:[%s2936_s5 + $0x470] sm:$0xff] %v1908_v27  ;;  %1911 = vst [vmem:[%s2936_s5 + $0x478] sm:$0xff] %v1910_v57  ;;  %v1914_v45 = vld [vmem:[%s2940_s30 + $0x440] sm:$0xff]  ;;  %v1916_v40 = vld [vmem:[%s2940_s30 + $0x448] sm:$0xff] }
 0x261   : >> { %1913 = vst [vmem:[%s2936_s5 + $0x4b0] sm:$0xff] %v1912_v31  ;;  %1915 = vst [vmem:[%s2936_s5 + $0x4b8] sm:$0xff] %v1914_v45  ;;  %v1918_v6 = vld [vmem:[%s2940_s30 + $0x450] sm:$0xff]  ;;  %s6197_s30 = smov %s5411_s28 }
 0x262   : >> { %1917 = vst [vmem:[%s2936_s5 + $0x4c0] sm:$0xff] %v1916_v40  ;;  %1919 = vst [vmem:[%s2936_s5 + $0x4c8] sm:$0xff] %v1918_v6  ;;  %s6196_s5 = smov %s5414_s20 }
 0x263 PF: > { %s5520_s7 = sand.u32 3, %s1779_s6   ;;  %s2329_s4 = sshll.u32 %s5344_s22, 9 }
 0x264   : > { %s1931_s29 = sshra.s32 %s2329_s4, 4  ;;  %p2317_p3 = scmp.le.s32.totalorder %s5520_s7, 0 }
 0x265   : > { %s5524_s24 = scalar_lea.vmem %s4525_s12, %s1931_s29 [#allocation3]   ;;  %s5527_s15 = scalar_lea.vmem %s5067_s19, %s1931_s29  }
 0x266   : > { %2225 = sbr.rel (%p2317_p3) target bundleno = 631 (0x277), region = 306  ;;  %s6199_s23 = smov (!%p2317_p3), %s5527_s15 }
 0x267   : > { %s6200_s10 = smov (!%p2317_p3), %s5524_s24  ;;  %s5536_s5 = smov (!%p2317_p3), 0  }
 0x268   : > { %s5538_s30 = smov (!%p2317_p3), 0  }
 0x26d LB: >> { %v1947_v46 = vld [vmem:[%s2956_s10] sm:$0xff]  ;;  %v1949_v47 = vld [vmem:[%s2956_s10 + $0x48] sm:$0xff]  ;;  %v1951_v18 = vld [vmem:[%s2956_s10 + $0x90] sm:$0xff]  ;;  %s1979_s6 = sadd.s32 1, %s2960_s5  ;;  %s1941_s30 = sadd.s32 1, %s2964_s30   ;;  %s2964_s30 = sphi %s5538_s30, %s1941_s30   ;;  %s2960_s5 = sphi %s5536_s5, %s6201_s5   ;;  %s2956_s10 = sphi %s6200_s10, %s1984_s10   ;;  %s2952_s23 = sphi %s6199_s23, %s1985_s23  }
 0x26e   : >> { %1948 = vst [vmem:[%s2952_s23] sm:$0xff] %v1947_v46  ;;  %1950 = vst [vmem:[%s2952_s23 + $0x50] sm:$0xff] %v1949_v47  ;;  %v1953_v29 = vld [vmem:[%s2956_s10 + $0xd8] sm:$0xff]  ;;  %v1955_v48 = vld [vmem:[%s2956_s10 + $0x120] sm:$0xff]  ;;  %p1980_p4 = scmp.ge.s32.totalorder %s1979_s6, %s5520_s7  ;;  %p1940_p6 = scmp.ge.s32.totalorder %s1941_s30, %s5520_s7 }
 0x26f   : >> { %1952 = vst [vmem:[%s2952_s23 + $0xa0] sm:$0xff] %v1951_v18  ;;  %v1957_v11 = vld [vmem:[%s2956_s10 + $0x168] sm:$0xff]  ;;  %1954 = vst [vmem:[%s2952_s23 + $0xf0] sm:$0xff] %v1953_v29  ;;  %v1959_v51 = vld [vmem:[%s2956_s10 + $0x1b0] sm:$0xff] }
 0x270   : >> { %1956 = vst [vmem:[%s2952_s23 + $0x140] sm:$0xff] %v1955_v48  ;;  %1958 = vst [vmem:[%s2952_s23 + $0x190] sm:$0xff] %v1957_v11  ;;  %v1961_v34 = vld [vmem:[%s2956_s10 + $0x1f8] sm:$0xff]  ;;  %v1963_v38 = vld [vmem:[%s2956_s10 + $0x240] sm:$0xff]  ;;  %s6235_s6 = smov (%p1980_p4, %s1979_s6), 0  ;;  %1943 = sbr.rel (!%p1940_p6) target bundleno = 621 (0x26d), region = 312 }
 0x271   : >> { %1960 = vst [vmem:[%s2952_s23 + $0x1e0] sm:$0xff] %v1959_v51  ;;  %1962 = vst [vmem:[%s2952_s23 + $0x230] sm:$0xff] %v1961_v34  ;;  %v1965_v12 = vld [vmem:[%s2956_s10 + $0x288] sm:$0xff]  ;;  %v1967_v50 = vld [vmem:[%s2956_s10 + $0x2d0] sm:$0xff]  ;;  %s2318_s22 = sshll.u32 %s6235_s6, 3  ;;  %s6201_s5 = smov %s6235_s6 }
 0x272   : >> { %1964 = vst [vmem:[%s2952_s23 + $0x280] sm:$0xff] %v1963_v38  ;;  %v1969_v52 = vld [vmem:[%s2956_s10 + $0x318] sm:$0xff]  ;;  %1966 = vst [vmem:[%s2952_s23 + $0x2d0] sm:$0xff] %v1965_v12  ;;  %v1971_v53 = vld [vmem:[%s2956_s10 + $0x360] sm:$0xff] }
 0x273   : >> { %1968 = vst [vmem:[%s2952_s23 + $0x320] sm:$0xff] %v1967_v50  ;;  %1970 = vst [vmem:[%s2952_s23 + $0x370] sm:$0xff] %v1969_v52  ;;  %v1973_v30 = vld [vmem:[%s2956_s10 + $0x3a8] sm:$0xff]  ;;  %v1975_v37 = vld [vmem:[%s2956_s10 + $0x3f0] sm:$0xff] }
 0x274   : >> { %1972 = vst [vmem:[%s2952_s23 + $0x3c0] sm:$0xff] %v1971_v53  ;;  %1974 = vst [vmem:[%s2952_s23 + $0x410] sm:$0xff] %v1973_v30  ;;  %v1977_v54 = vld [vmem:[%s2956_s10 + $0x438] sm:$0xff]  ;;  %s1984_s10 = scalar_lea.vmem %s5524_s24, %s2318_s22 [#allocation3]  }
 0x275   : >> { %1976 = vst [vmem:[%s2952_s23 + $0x460] sm:$0xff] %v1975_v37  ;;  %1978 = vst [vmem:[%s2952_s23 + $0x4b0] sm:$0xff] %v1977_v54  ;;  %s1985_s23 = scalar_lea.vmem %s5527_s15, %s2318_s22  }
 0x277 PF: > { %s2969_s26 = smov 0  }
 0x278   : > { %s5596_s0 = sshllo.u32 %s2969_s26, %s5073_s14 }
 0x279   : > { %v1995_v1 = vld [vmem:[%s5337_s25] sm:%s5596_s0]  ;;  %v1997_v2 = vld [vmem:[%s5337_s25 + $0x48] sm:%s5596_s0] }
 0x27a   : > { %1996 = vst [vmem:[%s5340_s11] sm:%s5596_s0] %v1995_v1  ;;  %1998 = vst [vmem:[%s5340_s11 + $0x50] sm:%s5596_s0] %v1997_v2 }
 0x27b   : > { %v1999_v49 = vld [vmem:[%s5337_s25 + $0x90] sm:%s5596_s0]  ;;  %v2001_v56 = vld [vmem:[%s5337_s25 + $0xd8] sm:%s5596_s0] }
 0x27c   : > { %2000 = vst [vmem:[%s5340_s11 + $0xa0] sm:%s5596_s0] %v1999_v49  ;;  %2002 = vst [vmem:[%s5340_s11 + $0xf0] sm:%s5596_s0] %v2001_v56 }
 0x27d   : > { %v2003_v28 = vld [vmem:[%s5337_s25 + $0x120] sm:%s5596_s0]  ;;  %v2005_v13 = vld [vmem:[%s5337_s25 + $0x168] sm:%s5596_s0] }
 0x27e   : > { %2004 = vst [vmem:[%s5340_s11 + $0x140] sm:%s5596_s0] %v2003_v28  ;;  %2006 = vst [vmem:[%s5340_s11 + $0x190] sm:%s5596_s0] %v2005_v13 }
 0x27f   : > { %v2007_v63 = vld [vmem:[%s5337_s25 + $0x1b0] sm:%s5596_s0]  ;;  %v2009_v59 = vld [vmem:[%s5337_s25 + $0x1f8] sm:%s5596_s0] }
 0x280   : > { %2008 = vst [vmem:[%s5340_s11 + $0x1e0] sm:%s5596_s0] %v2007_v63  ;;  %2010 = vst [vmem:[%s5340_s11 + $0x230] sm:%s5596_s0] %v2009_v59 }
 0x281   : > { %v2011_v60 = vld [vmem:[%s5337_s25 + $0x240] sm:%s5596_s0]  ;;  %v2013_v14 = vld [vmem:[%s5337_s25 + $0x288] sm:%s5596_s0] }
 0x282   : > { %2012 = vst [vmem:[%s5340_s11 + $0x280] sm:%s5596_s0] %v2011_v60  ;;  %2014 = vst [vmem:[%s5340_s11 + $0x2d0] sm:%s5596_s0] %v2013_v14 }
 0x283   : > { %v2015_v55 = vld [vmem:[%s5337_s25 + $0x2d0] sm:%s5596_s0]  ;;  %v2017_v32 = vld [vmem:[%s5337_s25 + $0x318] sm:%s5596_s0] }
 0x284   : > { %2016 = vst [vmem:[%s5340_s11 + $0x320] sm:%s5596_s0] %v2015_v55  ;;  %2018 = vst [vmem:[%s5340_s11 + $0x370] sm:%s5596_s0] %v2017_v32 }
 0x285   : > { %v2019_v61 = vld [vmem:[%s5337_s25 + $0x360] sm:%s5596_s0]  ;;  %v2021_v62 = vld [vmem:[%s5337_s25 + $0x3a8] sm:%s5596_s0] }
 0x286   : > { %2020 = vst [vmem:[%s5340_s11 + $0x3c0] sm:%s5596_s0] %v2019_v61  ;;  %2022 = vst [vmem:[%s5340_s11 + $0x410] sm:%s5596_s0] %v2021_v62 }
 0x287   : > { %v2023_v20 = vld [vmem:[%s5337_s25 + $0x3f0] sm:%s5596_s0]  ;;  %v2025_v3 = vld [vmem:[%s5337_s25 + $0x438] sm:%s5596_s0] }
 0x288   : > { %2024 = vst [vmem:[%s5340_s11 + $0x460] sm:%s5596_s0] %v2023_v20  ;;  %2026 = vst [vmem:[%s5340_s11 + $0x4b0] sm:%s5596_s0] %v2025_v3 }
 0x289 PF: > { %p2320_p5 = scmp.ge.u32.totalorder %s5069_s21, 8 }
 0x28a   : > { %s2970_s14 = smov (!%p2320_p5), 0  }
 0x28b   : > { %1517 = sbr.rel (%p2320_p5) target bundleno = 668 (0x29c), region = 114  ;;  %s5664_s25 = sshllo.u32 (!%p2320_p5), %s2970_s14, %s5069_s21 }
 0x28c   : > { %v1527_v4 = vld [vmem:[%s4525_s12] sm:%s5664_s25] (!%p2320_p5)  ;;  %v1529_v8 = vld [vmem:[%s4525_s12 + $0x48] sm:%s5664_s25] (!%p2320_p5) }
 0x28d   : > { %1528 = vst [vmem:[%s5067_s19] sm:%s5664_s25] (!%p2320_p5), %v1527_v4  ;;  %1530 = vst [vmem:[%s5067_s19 + $0x50] sm:%s5664_s25] (!%p2320_p5), %v1529_v8 }
 0x28e   : > { %v1531_v5 = vld [vmem:[%s4525_s12 + $0x90] sm:%s5664_s25] (!%p2320_p5)  ;;  %v1533_v7 = vld [vmem:[%s4525_s12 + $0xd8] sm:%s5664_s25] (!%p2320_p5) }
 0x28f   : > { %1532 = vst [vmem:[%s5067_s19 + $0xa0] sm:%s5664_s25] (!%p2320_p5), %v1531_v5  ;;  %1534 = vst [vmem:[%s5067_s19 + $0xf0] sm:%s5664_s25] (!%p2320_p5), %v1533_v7 }
 0x290   : > { %v1535_v19 = vld [vmem:[%s4525_s12 + $0x120] sm:%s5664_s25] (!%p2320_p5)  ;;  %v1537_v21 = vld [vmem:[%s4525_s12 + $0x168] sm:%s5664_s25] (!%p2320_p5) }
 0x291   : > { %1536 = vst [vmem:[%s5067_s19 + $0x140] sm:%s5664_s25] (!%p2320_p5), %v1535_v19  ;;  %1538 = vst [vmem:[%s5067_s19 + $0x190] sm:%s5664_s25] (!%p2320_p5), %v1537_v21 }
 0x292   : > { %v1539_v36 = vld [vmem:[%s4525_s12 + $0x1b0] sm:%s5664_s25]  ;;  %v1541_v15 = vld [vmem:[%s4525_s12 + $0x1f8] sm:%s5664_s25] }
 0x293   : > { %1540 = vst [vmem:[%s5067_s19 + $0x1e0] sm:%s5664_s25] %v1539_v36  ;;  %1542 = vst [vmem:[%s5067_s19 + $0x230] sm:%s5664_s25] %v1541_v15 }
 0x294   : > { %v1543_v44 = vld [vmem:[%s4525_s12 + $0x240] sm:%s5664_s25]  ;;  %v1545_v16 = vld [vmem:[%s4525_s12 + $0x288] sm:%s5664_s25] }
 0x295   : > { %1544 = vst [vmem:[%s5067_s19 + $0x280] sm:%s5664_s25] %v1543_v44  ;;  %1546 = vst [vmem:[%s5067_s19 + $0x2d0] sm:%s5664_s25] %v1545_v16 }
 0x296   : > { %v1547_v0 = vld [vmem:[%s4525_s12 + $0x2d0] sm:%s5664_s25]  ;;  %v1549_v22 = vld [vmem:[%s4525_s12 + $0x318] sm:%s5664_s25] }
 0x297   : > { %1548 = vst [vmem:[%s5067_s19 + $0x320] sm:%s5664_s25] %v1547_v0  ;;  %1550 = vst [vmem:[%s5067_s19 + $0x370] sm:%s5664_s25] %v1549_v22 }
 0x298   : > { %v1551_v58 = vld [vmem:[%s4525_s12 + $0x360] sm:%s5664_s25]  ;;  %v1553_v26 = vld [vmem:[%s4525_s12 + $0x3a8] sm:%s5664_s25] }
 0x299   : > { %1552 = vst [vmem:[%s5067_s19 + $0x3c0] sm:%s5664_s25] %v1551_v58  ;;  %1554 = vst [vmem:[%s5067_s19 + $0x410] sm:%s5664_s25] %v1553_v26 }
 0x29a   : > { %v1555_v41 = vld [vmem:[%s4525_s12 + $0x3f0] sm:%s5664_s25]  ;;  %v1557_v9 = vld [vmem:[%s4525_s12 + $0x438] sm:%s5664_s25] }
 0x29b   : > { %1556 = vst [vmem:[%s5067_s19 + $0x460] sm:%s5664_s25] %v1555_v41  ;;  %1558 = vst [vmem:[%s5067_s19 + $0x4b0] sm:%s5664_s25] %v1557_v9 }
 0x29c PF: > { %s13_s18 = sadd.s32 1, %s2836_s18   ;;  %s6202_s21 = sld [smem:[#allocation4_spill]] }
 0x29d   : > { %p10_p7 = scmp.ge.s32.totalorder %s13_s18, 6   ;;  %s6203_s11 = sld [smem:[#allocation5_spill]] }
 0x29e   : > { %s6204_s12 = smov %s2816_s13  ;;  %s6205_s13 = smov %s3047_s27 }
 0x29f   : > { %s6206_s14 = smov %s2828_s16  ;;  %s6207_s15 = smov %s2832_s17 }
 0x2a0   :  { %12 = sbr.rel (!%p10_p7) target bundleno = 6 (0x6), region = 323 }
 0x2a2   : > { %s6208_s16 = smov %s6202_s21 }
 0x2a3   : > { %s6209_s17 = smov %s6203_s11 }

</bundles_post_ra>
